<compile_context>
chip_gen: v5e
topology: v5e:2x2
jax: 0.10.0
libtpu: 0.0.40
codegen_flags: <defaults>
</compile_context>

<pallas_src>
import jax
import jax.numpy as jnp
from jax.experimental import pallas as pl
from jax.experimental.pallas import tpu as pltpu

BN_EPS = 1e-4
LEAKY_SLOPE = 0.01
TM_MAX = 2048                      # max row tile for the im2col matmul
VMEM_LIMIT = 32 * 1024 * 1024      # safe on v5e / v6e / v7x


# ---------------------------------------------------------------------------
# Kernel 1: conv-as-matmul + per-tile BatchNorm partial statistics.
# Every grid step is independent (partials reduced in the wrapper), so the
# grid axis is "parallel" (megacore-friendly on v7x).
# ---------------------------------------------------------------------------
def conv_stats_kernel(p_ref, w_ref, y_ref, sum_ref, ssq_ref):
    y = jnp.dot(p_ref[...], w_ref[...], preferred_element_type=jnp.float32)
    y_ref[...] = y
    sum_ref[0] = jnp.sum(y, axis=0, keepdims=True)
    ssq_ref[0] = jnp.sum(y * y, axis=0, keepdims=True)


def conv_with_stats(patches, w_mat):
    r, k = patches.shape
    cout = w_mat.shape[1]
    tm = min(r, TM_MAX)
    while r % tm:                  # per-layer tile, robust to any batch size
        tm //= 2
    grid = r // tm
    return pl.pallas_call(
        conv_stats_kernel,
        grid=(grid,),
        in_specs=[
            pl.BlockSpec((tm, k), lambda i: (i, 0)),
            pl.BlockSpec((k, cout), lambda i: (0, 0)),
        ],
        out_specs=(
            pl.BlockSpec((tm, cout), lambda i: (i, 0)),
            pl.BlockSpec((1, 1, cout), lambda i: (i, 0, 0)),
            pl.BlockSpec((1, 1, cout), lambda i: (i, 0, 0)),
        ),
        out_shape=(
            jax.ShapeDtypeStruct((r, cout), jnp.float32),
            jax.ShapeDtypeStruct((grid, 1, cout), jnp.float32),
            jax.ShapeDtypeStruct((grid, 1, cout), jnp.float32),
        ),
        compiler_params=pltpu.CompilerParams(
            dimension_semantics=("parallel",),
            vmem_limit_bytes=VMEM_LIMIT),
    )(patches, w_mat)


# ---------------------------------------------------------------------------
# Kernel 2: fused 2x2 max-pool + BatchNorm-normalize + LeakyReLU.
# Input is a free wrapper-side view (N*H/2, 2, W/2, 2C) so both pooling
# partners of every 2x2 window are addressable with static slices.
# One whole image per grid step; mean / inv_std are precomputed (1, C).
# ---------------------------------------------------------------------------
def make_pool_bn_kernel(c):
    def kernel(x_ref, mean_ref, istd_ref, o_ref):
        x = x_ref[...]                                  # (H/2, 2, W/2, 2C)
        m = jnp.maximum(
            jnp.maximum(x[:, 0, :, :c], x[:, 0, :, c:]),
            jnp.maximum(x[:, 1, :, :c], x[:, 1, :, c:]))  # (H/2, W/2, C)
        y = (m - mean_ref[...]) * istd_ref[...]
        y = jnp.where(y >= 0.0, y, LEAKY_SLOPE * y)       # LeakyReLU(0.01)
        o_ref[...] = y
    return kernel


def pool_bn_lrelu(x4, mean, istd, n, c):
    nh2, _, w2, _ = x4.shape
    h2 = nh2 // n
    out = pl.pallas_call(
        make_pool_bn_kernel(c),
        grid=(n,),
        in_specs=[
            pl.BlockSpec((h2, 2, w2, 2 * c), lambda i: (i, 0, 0, 0)),
            pl.BlockSpec((1, c), lambda i: (0, 0)),
            pl.BlockSpec((1, c), lambda i: (0, 0)),
        ],
        out_specs=pl.BlockSpec((h2, w2, c), lambda i: (i, 0, 0)),
        out_shape=jax.ShapeDtypeStruct((nh2, w2, c), jnp.float32),
        compiler_params=pltpu.CompilerParams(
            dimension_semantics=("parallel",),
            vmem_limit_bytes=VMEM_LIMIT),
    )(x4, mean, istd)
    return out.reshape(n, h2, w2, c)


# ---------------------------------------------------------------------------
# Kernel 3: last layer = pool + BN + LeakyReLU + bias-free Linear epilogue.
# fc weights are re-ordered in the wrapper to the NHWC flatten order, so the
# kernel only needs elementwise multiplies + full reductions (n_z is tiny).
# ---------------------------------------------------------------------------
def make_pool_bn_fc_kernel(c, nz):
    def kernel(x_ref, mean_ref, istd_ref, wfc_ref, o_ref):
        x = x_ref[...]                                  # (H/2, 2, W/2, 2C)
        m = jnp.maximum(
            jnp.maximum(x[:, 0, :, :c], x[:, 0, :, c:]),
            jnp.maximum(x[:, 1, :, :c], x[:, 1, :, c:]))
        y = (m - mean_ref[...]) * istd_ref[...]
        y = jnp.where(y >= 0.0, y, LEAKY_SLOPE * y)     # (H/2, W/2, C)
        lane = jax.lax.broadcasted_iota(jnp.int32, (1, nz), 1)
        res = jnp.zeros((1, nz), jnp.float32)
        for z in range(nz):                             # nz = n_z (tiny)
            s = jnp.sum(y * wfc_ref[z])
            res = res + jnp.where(lane == z, s, 0.0)
        o_ref[0] = res
    return kernel


def pool_bn_lrelu_fc(x4, mean, istd, fc_w, n, c):
    nh2, _, w2, _ = x4.shape
    h2 = nh2 // n
    nz = fc_w.shape[0]
    # PyTorch flattens (C, H, W); the kernel's pooled tensor is (H, W, C).
    w_r = jnp.transpose(fc_w.reshape(nz, c, h2, w2), (0, 2, 3, 1))
    out3 = pl.pallas_call(
        make_pool_bn_fc_kernel(c, nz),
        grid=(n,),
        in_specs=[
            pl.BlockSpec((h2, 2, w2, 2 * c), lambda i: (i, 0, 0, 0)),
            pl.BlockSpec((1, c), lambda i: (0, 0)),
            pl.BlockSpec((1, c), lambda i: (0, 0)),
            pl.BlockSpec((nz, h2, w2, c), lambda i: (0, 0, 0, 0)),
        ],
        out_specs=pl.BlockSpec((1, 1, nz), lambda i: (i, 0, 0)),
        out_shape=jax.ShapeDtypeStruct((n, 1, nz), jnp.float32),
        compiler_params=pltpu.CompilerParams(
            dimension_semantics=("parallel",),
            vmem_limit_bytes=VMEM_LIMIT),
    )(x4, mean, istd, w_r)
    return out3[:, 0, :]


# ---------------------------------------------------------------------------
# Full Encoder forward (args.n_channel / args.dim_h are unused in forward;
# conv channel counts 32/16/8/4 are hard-coded in the PyTorch module).
# ---------------------------------------------------------------------------
def encoder_forward(x_nchw, conv_ws, fc_w):
    n = x_nchw.shape[0]
    x = jnp.transpose(x_nchw, (0, 2, 3, 1)).astype(jnp.float32)  # NHWC
    n_layers = len(conv_ws)
    out = None
    for li, w in enumerate(conv_ws):
        cout, cin, kh, kw = w.shape
        _, h, wd, _ = x.shape
        # im2col glue: same-padded 3x3 patches -> (N*H*W, 9*Cin)
        xp = jnp.pad(x, ((0, 0), (1, 1), (1, 1), (0, 0)))
        patches = jnp.concatenate(
            [xp[:, dy:dy + h, dx:dx + wd, :]
             for dy in range(kh) for dx in range(kw)], axis=-1)
        patches = patches.reshape(n * h * wd, kh * kw * cin)
        w_mat = jnp.transpose(w, (2, 3, 1, 0)).reshape(kh * kw * cin, cout)

        conv_flat, sum_p, ssq_p = conv_with_stats(patches, w_mat)

        # BatchNorm train-mode batch stats (biased var), hoisted to wrapper.
        count = float(n * h * wd)
        csum = jnp.sum(sum_p[:, 0, :], axis=0, keepdims=True)
        cssq = jnp.sum(ssq_p[:, 0, :], axis=0, keepdims=True)
        mean = csum / count
        var = cssq / count - mean * mean   # TODO(synk): E[x^2]-E[x]^2 is
        # cancellation-prone at large means; fine at these magnitudes.
        istd = jax.lax.rsqrt(var + BN_EPS)

        # Free view exposing the 2x2 pooling windows:
        # (N*H*W, C) -> (N*H/2, 2, W/2, 2C)
        x4 = conv_flat.reshape(n * (h // 2), 2, wd // 2, 2 * cout)
        if li < n_layers - 1:
            x = pool_bn_lrelu(x4, mean, istd, n, cout)
        else:
            out = pool_bn_lrelu_fc(x4, mean, istd, fc_w, n, cout)
    return out


# pure-JAX reference (train-mode BN, LeakyReLU(0.01), MaxPool2d(2,2), Linear)
def reference_encoder(x_nchw, conv_ws, fc_w):
    x = x_nchw.astype(jnp.float32)
    for w in conv_ws:
        x = jax.lax.conv_general_dilated(
            x, w, window_strides=(1, 1), padding="SAME",
            dimension_numbers=("NCHW", "OIHW", "NCHW"))
        mean = jnp.mean(x, axis=(0, 2, 3), keepdims=True)
        var = jnp.mean(x * x, axis=(0, 2, 3), keepdims=True) - mean * mean
        x = (x - mean) * jax.lax.rsqrt(var + BN_EPS)
        x = jnp.where(x >= 0.0, x, LEAKY_SLOPE * x)
        x = jax.lax.reduce_window(
            x, -jnp.inf, jax.lax.max,
            window_dimensions=(1, 1, 2, 2), window_strides=(1, 1, 2, 2),
            padding="VALID")
    feats = x.reshape(x.shape[0], -1)
    return feats @ fc_w.T


if __name__ == "__main__":
    key = jax.random.PRNGKey(0)
    k_x, k1, k2, k3, k4, kf = jax.random.split(key, 6)

    batch = 2
    n_z = 8
    # fc expects 4*8*8 features => four 2x2 pools => 128x128 input spatial
    x = jax.random.normal(k_x, (batch, 3, 128, 128), jnp.float32)
    conv_ws = [
        0.1 * jax.random.normal(k1, (32, 3, 3, 3), jnp.float32),
        0.1 * jax.random.normal(k2, (16, 32, 3, 3), jnp.float32),
        0.1 * jax.random.normal(k3, (8, 16, 3, 3), jnp.float32),
        0.1 * jax.random.normal(k4, (4, 8, 3, 3), jnp.float32),
    ]
    fc_w = 0.05 * jax.random.normal(kf, (n_z, 4 * 8 * 8), jnp.float32)

    out = encoder_forward(x, conv_ws, fc_w)
    out = jax.block_until_ready(out)
    assert out.shape == (batch, n_z), out.shape

    ref = reference_encoder(x, conv_ws, fc_w)
    assert jnp.allclose(out, ref, atol=1e-2, rtol=1e-2), \
        float(jnp.max(jnp.abs(out - ref)))

    print("KERNEL_OK")
</pallas_src>

<mosaic_0001>
module attributes {stable_mosaic.version = 11 : i64} {
  func.func @conv_stats_kernel(%arg0: i32, %arg1: memref<2048x27xf32, #tpu.memory_space<vmem>>, %arg2: memref<27x32xf32, #tpu.memory_space<vmem>>, %arg3: memref<2048x32xf32, #tpu.memory_space<vmem>>, %arg4: memref<1x1x32xf32, #tpu.memory_space<vmem>>, %arg5: memref<1x1x32xf32, #tpu.memory_space<vmem>>) attributes {dimension_semantics = [#tpu.dimension_semantics<parallel>], iteration_bounds = array<i64: 16>, scalar_prefetch = 0 : i64, scratch_operands = 0 : i64, tpu.core_type = #tpu.core_type<tc>, window_params = [{transform_indices = @transform_0, window_bounds = array<i64: 2048, 27>}, {pipeline_mode = #tpu.pipeline_mode<synchronous>, transform_indices = @transform_1, window_bounds = array<i64: 27, 32>}, {transform_indices = @transform_2, window_bounds = array<i64: 2048, 32>}, {transform_indices = @transform_3, window_bounds = array<i64: 1, 1, 32>}, {transform_indices = @transform_4, window_bounds = array<i64: 1, 1, 32>}]} {
    %c0 = arith.constant 0 : index
    %c0_0 = arith.constant 0 : index
    %0 = vector.load %arg1[%c0, %c0_0] : memref<2048x27xf32, #tpu.memory_space<vmem>>, vector<2048x27xf32>
    %c0_1 = arith.constant 0 : index
    %c0_2 = arith.constant 0 : index
    %1 = vector.load %arg2[%c0_1, %c0_2] : memref<27x32xf32, #tpu.memory_space<vmem>>, vector<27x32xf32>
    %cst = arith.constant dense<0.000000e+00> : vector<2048x32xf32>
    %2 = tpu.matmul %0, %1, %cst {dimension_numbers = #tpu.dot_dimension_numbers<[1], [0], [0], [1], [0, 0, 1, 1], [], []>} : vector<2048x27xf32>, vector<27x32xf32>, vector<2048x32xf32> -> vector<2048x32xf32>
    %c0_3 = arith.constant 0 : index
    %c0_4 = arith.constant 0 : index
    %3 = vector.load %arg3[%c0_3, %c0_4] : memref<2048x32xf32, #tpu.memory_space<vmem>>, vector<2048x32xf32>
    tpu.vector_store %arg3[%c0_3, %c0_4], %2 {strides = array<i32>} : memref<2048x32xf32, #tpu.memory_space<vmem>>, vector<2048x32xf32>,
    %cst_5 = arith.constant dense<0.000000e+00> : vector<32xf32>
    %4 = vector.multi_reduction <add>, %2, %cst_5 [0] : vector<2048x32xf32> to vector<32xf32>
    %5 = vector.shape_cast %4 : vector<32xf32> to vector<1x32xf32>
    %c0_6 = arith.constant 0 : index
    %c0_7 = arith.constant 0 : index
    %c0_8 = arith.constant 0 : index
    %6 = vector.load %arg4[%c0_6, %c0_7, %c0_8] : memref<1x1x32xf32, #tpu.memory_space<vmem>>, vector<1x1x32xf32>
    %7 = vector.shape_cast %6 : vector<1x1x32xf32> to vector<1x32xf32>
    %8 = vector.shape_cast %5 : vector<1x32xf32> to vector<1x1x32xf32>
    tpu.vector_store %arg4[%c0_6, %c0_7, %c0_8], %8 {strides = array<i32>} : memref<1x1x32xf32, #tpu.memory_space<vmem>>, vector<1x1x32xf32>,
    %9 = arith.mulf %2, %2 : vector<2048x32xf32>
    %cst_9 = arith.constant dense<0.000000e+00> : vector<32xf32>
    %10 = vector.multi_reduction <add>, %9, %cst_9 [0] : vector<2048x32xf32> to vector<32xf32>
    %11 = vector.shape_cast %10 : vector<32xf32> to vector<1x32xf32>
    %c0_10 = arith.constant 0 : index
    %c0_11 = arith.constant 0 : index
    %c0_12 = arith.constant 0 : index
    %12 = vector.load %arg5[%c0_10, %c0_11, %c0_12] : memref<1x1x32xf32, #tpu.memory_space<vmem>>, vector<1x1x32xf32>
    %13 = vector.shape_cast %12 : vector<1x1x32xf32> to vector<1x32xf32>
    %14 = vector.shape_cast %11 : vector<1x32xf32> to vector<1x1x32xf32>
    tpu.vector_store %arg5[%c0_10, %c0_11, %c0_12], %14 {strides = array<i32>} : memref<1x1x32xf32, #tpu.memory_space<vmem>>, vector<1x1x32xf32>,
    return
  }
  func.func @transform_0(%arg0: i32) -> (i32, i32) {
    %c0_i32 = arith.constant 0 : i32
    %c0_i32_0 = arith.constant 0 : i32
    return %arg0, %c0_i32 : i32, i32
  }
  func.func @transform_1(%arg0: i32) -> (i32, i32) {
    %c0_i32 = arith.constant 0 : i32
    %c0_i32_0 = arith.constant 0 : i32
    %c0_i32_1 = arith.constant 0 : i32
    return %c0_i32, %c0_i32_0 : i32, i32
  }
  func.func @transform_2(%arg0: i32) -> (i32, i32) {
    %c0_i32 = arith.constant 0 : i32
    %c0_i32_0 = arith.constant 0 : i32
    return %arg0, %c0_i32 : i32, i32
  }
  func.func @transform_3(%arg0: i32) -> (i32, i32, i32) {
    %c0_i32 = arith.constant 0 : i32
    %c0_i32_0 = arith.constant 0 : i32
    %c0_i32_1 = arith.constant 0 : i32
    return %arg0, %c0_i32, %c0_i32_0 : i32, i32, i32
  }
  func.func @transform_4(%arg0: i32) -> (i32, i32, i32) {
    %c0_i32 = arith.constant 0 : i32
    %c0_i32_0 = arith.constant 0 : i32
    %c0_i32_1 = arith.constant 0 : i32
    return %arg0, %c0_i32, %c0_i32_0 : i32, i32, i32
  }
}

</mosaic_0001>

<bundles_post_ra>
// kernel: tpu_custom_call.1
= control target key start
LH: loop header
LB: loop body
LE: loop exit
PB: predicated region body
PF: predicated region fallthrough
CT: control target
= control target key end

     0   :  { %10 = vsyncpa [#allocation3], 0  ;;  %s7299_s0 = inlined_call_operand.vmem [shape: f32[32768,27], index: 0, kind: input, shape index: {}]   ;;  %s7300_s1 = inlined_call_operand.vmem [shape: f32[27,32], index: 1, kind: input, shape index: {}]   ;;  %s7301_s2 = inlined_call_operand.vmem [shape: f32[32768,32], index: 2, kind: output, shape index: {0}]   ;;  %s7302_s3 = inlined_call_operand.hbm [shape: f32[16,1,32], index: 3, kind: output, shape index: {1}]   ;;  %s7303_s4 = inlined_call_operand.hbm [shape: f32[16,1,32], index: 4, kind: output, shape index: {2}]  }
   0x1   :  { %12 = vsyncpa [#allocation3 + $0x1], 0 }
   0x2   :  { %13 = vsyncpa [#allocation5], 0 }
   0x3   :  { %15 = vsyncpa [#allocation5 + $0x1], 0  ;;  %s4179_s15 = smov 0   ;;  %s4181_s16 = smov 0  }
   0x4   :  { %s4183_s17 = smov 0   ;;  %s4185_s18 = smov 0  }
   0x5 LB: > { %s4200_s19 = sadd.s32 4294967295, %s4152_s18   ;;  %s3735_s20 = sadd.s32 4294967294, %s4152_s18   ;;  %s4152_s18 = sphi %s4185_s18, %s7565_s18   ;;  %s4148_s17 = sphi %s4183_s17, %s7564_s17   ;;  %s4144_s16 = sphi %s4181_s16, %s7563_s16   ;;  %s4140_s15 = sphi %s4179_s15, %s7562_s15  }
   0x6   : > { %s4204_s21 = sadd.s32 1, %s4152_s18   ;;  %s101_s22 = sadd.s32 1, %s4148_s17 }
   0x7   : > { %s98_s23 = ssub.s32 %s4152_s18, %s4204_s21  ;;  %p111_p0 = scmp.ne.s32.totalorder %s4148_s17, %s4144_s16 }
   0x8   : > { %p99_p1 = scmp.eq.s32.totalorder %s98_s23, 0  ;;  %p112_p2 = scmp.eq.s32.totalorder %s4200_s19, 15 }
   0x9   : > { %p117_p3 = scmp.ne.s32.totalorder %s4144_s16, %s4140_s15  ;;  %p118_p4 = scmp.eq.s32.totalorder %s3735_s20, 15 }
   0xa   : > { %s4215_s24 = scalar_select %p99_p1, %s4148_s17, %s101_s22  }
   0xb   : > { %p4217_p5 = por %p112_p2, %p111_p0  ;;  %p4221_p6 = por %p118_p4, %p117_p3 }
   0xc   : > { %p3738_p7 = scmp.ge.s32.totalorder %s4152_s18, 1  ;;  %p174_p8 = scmp.lt.s32.totalorder %s4152_s18, 17 }
   0xe   : > { %p175_p9 = pnand %p3738_p7, %p174_p8 }
  0x10   : > { %178 = sbr.rel (%p175_p9) target bundleno = 1073 (0x431), region = 28 }
  0x15   : > { %v479_v0 = vld [vmem:[%s7300_s1 + $0x18] sm:$0x7]  ;;  %vm1249_vm0 = vcmask 1042432   ;;  %v478_v1 = vld [vmem:[%s7300_s1 + $0x10] sm:$0xff]  ;;  %s3739_s5 = sshll.u32 %s4200_s19, 8  ;;  %v477_v2 = vld [vmem:[%s7300_s1 + $0x8] sm:$0xff]  ;;  %s3610_s29 = scalar_lea.hbm %s7302_s3, %s4200_s19 }
  0x16   : > { %3743 = vmatpush.msk.msra.mxu0 %vm1249_vm0, %v479_v0  ;;  %p209_p10 = scmp.lt.s32.totalorder %s3739_s5, 4095  ;;  %4002 = vmatpush.msk.msra.mxu1 %vm1249_vm0, %v479_v0  ;;  %v476_v3 = vld [vmem:[%s7300_s1] sm:$0xff]  ;;  %vm480_vm1 = vcmask 220160   ;;  %vm2038_vm2 = vcmask 261120   ;;  %s7228_s23 = sand.u32 1, %s4144_s16   ;;  %vm2812_vm3 = vcmask 253952  }
  0x17   : > { %4003 = vmatpush.msk.msra.mxu2 %vm1249_vm0, %v479_v0  ;;  %4004 = vmatpush.msk.msra.mxu3 %vm1249_vm0, %v479_v0  ;;  %s3623_s6 = scalar_lea.hbm %s7303_s4, %s4200_s19  ;;  %s201_s7 = scalar_lea.vmem [#allocation2], %s7228_s23 }
  0x18   : > { %1266 = vmatpush.msra.mxu0 %v478_v1  ;;  %s7567_s5 = smov (!%p209_p10, %s3739_s5), 4095  ;;  %4005 = vmatpush.msra.mxu1 %v478_v1  ;;  %s7239_s8 = sshll.u32 %s201_s7, 4  ;;  %s3613_s8 = int_to_ptr.vmem [resolvable:$true] %s7239_s8 }
  0x19   : > { %4006 = vmatpush.msra.mxu2 %v478_v1  ;;  %4007 = vmatpush.msra.mxu3 %v478_v1  ;;  %s3740_s10 = sshll.u32 %s7567_s5, 3  ;;  %s7241_s9 = sshll.u32 %s3610_s29, 4  ;;  %s3615_s9 = int_to_ptr.hbm [resolvable:$true] %s7241_s9 }
  0x1a   : > { %1267 = vmatpush.msra.mxu0 %v477_v2  ;;  %4008 = vmatpush.msra.mxu1 %v477_v2  ;;  %s4248_s13 = scalar_lea.vmem %s7299_s0, %s3740_s10  ;;  %s4295_s22 = scalar_lea.vmem %s7301_s2, %s3740_s10 }
  0x1b   : > { %4009 = vmatpush.msra.mxu2 %v477_v2  ;;  %4010 = vmatpush.msra.mxu3 %v477_v2  ;;  %v220_v4 = vld [vmem:[%s4248_s13] sm:$0xff]  ;;  %v221_v5 = vld [vmem:[%s4248_s13 + $0x8] sm:$0xff]  ;;  %v222_v6 = vld [vmem:[%s4248_s13 + $0x10] sm:$0xff]  ;;  %s207_s10 = scalar_lea.vmem [#allocation4], %s7228_s23  ;;  %s7246_s12 = sshll.u32 %s3623_s6, 4  ;;  %s3628_s12 = int_to_ptr.hbm [resolvable:$true] %s7246_s12 }
  0x1c   : > { %1268 = vmatpush.msra.mxu0 %v476_v3  ;;  %4011 = vmatpush.msra.mxu1 %v476_v3  ;;  %v223_v7 = vld [vmem:[%s4248_s13 + $0x18] sm:$0xff]  ;;  %v224_v8 = vld [vmem:[%s4248_s13 + $0x20] sm:$0xff]  ;;  %v225_v9 = vld [vmem:[%s4248_s13 + $0x28] sm:$0xff]  ;;  %s7244_s11 = sshll.u32 %s207_s10, 4  ;;  %s3594_s19 = scalar_lea.sflag [#allocation3], %s7228_s23  ;;  %s3626_s11 = int_to_ptr.vmem [resolvable:$true] %s7244_s11 }
  0x1d   : > { %3744 = vmatmul.msk.f32.vlgmr.msra.gmra.mxu0 %vm480_vm1, %v220_v4  ;;  %4012 = vmatpush.msra.mxu2 %v476_v3  ;;  %v226_v10 = vld [vmem:[%s4248_s13 + $0x30] sm:$0xff]  ;;  %v227_v11 = vld [vmem:[%s4248_s13 + $0x38] sm:$0xff]  ;;  %v228_v12 = vld [vmem:[%s4248_s13 + $0x40] sm:$0xff]  ;;  %s4078_s27 = scalar_lea.hbm %s7302_s3, 16 }
  0x1e   : > { %4013 = vmatpush.msra.mxu3 %v476_v3  ;;  %v229_v13 = vld [vmem:[%s4248_s13 + $0x48] sm:$0xff]  ;;  %v230_v14 = vld [vmem:[%s4248_s13 + $0x50] sm:$0xff]  ;;  %v231_v15 = vld [vmem:[%s4248_s13 + $0x58] sm:$0xff] }
  0x1f   : > { %v232_v16 = vld [vmem:[%s4248_s13 + $0x60] sm:$0xff]  ;;  %v233_v18 = vld [vmem:[%s4248_s13 + $0x68] sm:$0xff]  ;;  %v234_v20 = vld [vmem:[%s4248_s13 + $0x70] sm:$0xff] }
  0x20   : > { %v284_v17 = vld [vmem:[%s4248_s13 + $0x200] sm:$0xff]  ;;  %v285_v19 = vld [vmem:[%s4248_s13 + $0x208] sm:$0xff]  ;;  %v286_v21 = vld [vmem:[%s4248_s13 + $0x210] sm:$0xff] }
  0x21   : > { %3808 = vmatmul.msk.f32.vlgmr.msra.gmra.mxu1 %vm480_vm1, %v284_v17  ;;  %v235_v22 = vld [vmem:[%s4248_s13 + $0x78] sm:$0xff]  ;;  %v236_v25 = vld [vmem:[%s4248_s13 + $0x80] sm:$0xff]  ;;  %v237_v28 = vld [vmem:[%s4248_s13 + $0x88] sm:$0xff] }
  0x22   : > { %v287_v23 = vld [vmem:[%s4248_s13 + $0x218] sm:$0xff]  ;;  %v288_v26 = vld [vmem:[%s4248_s13 + $0x220] sm:$0xff]  ;;  %v289_v29 = vld [vmem:[%s4248_s13 + $0x228] sm:$0xff] }
  0x23   : > { %v238_v31 = vld [vmem:[%s4248_s13 + $0x90] sm:$0xff]  ;;  %v239_v34 = vld [vmem:[%s4248_s13 + $0x98] sm:$0xff]  ;;  %v240_v37 = vld [vmem:[%s4248_s13 + $0xa0] sm:$0xff] }
  0x24   : > { %v290_v32 = vld [vmem:[%s4248_s13 + $0x230] sm:$0xff]  ;;  %v291_v35 = vld [vmem:[%s4248_s13 + $0x238] sm:$0xff]  ;;  %v292_v38 = vld [vmem:[%s4248_s13 + $0x240] sm:$0xff] }
  0x25   : > { %3745 = vmatmul.msk.f32.gmra.mxu0 %vm480_vm1, %v221_v5  ;;  %v241_v40 = vld [vmem:[%s4248_s13 + $0xa8] sm:$0xff]  ;;  %v242_v43 = vld [vmem:[%s4248_s13 + $0xb0] sm:$0xff]  ;;  %v243_v46 = vld [vmem:[%s4248_s13 + $0xb8] sm:$0xff] }
  0x26   : > { %v293_v41 = vld [vmem:[%s4248_s13 + $0x248] sm:$0xff]  ;;  %v294_v44 = vld [vmem:[%s4248_s13 + $0x250] sm:$0xff]  ;;  %v295_v47 = vld [vmem:[%s4248_s13 + $0x258] sm:$0xff] }
  0x27   : > { %v244_v49 = vld [vmem:[%s4248_s13 + $0xc0] sm:$0xff]  ;;  %v245_v52 = vld [vmem:[%s4248_s13 + $0xc8] sm:$0xff]  ;;  %v246_v55 = vld [vmem:[%s4248_s13 + $0xd0] sm:$0xff] }
  0x28   : > { %v296_v50 = vld [vmem:[%s4248_s13 + $0x260] sm:$0xff]  ;;  %v297_v53 = vld [vmem:[%s4248_s13 + $0x268] sm:$0xff]  ;;  %v298_v56 = vld [vmem:[%s4248_s13 + $0x270] sm:$0xff] }
  0x29   : > { %3809 = vmatmul.msk.f32.gmra.mxu1 %vm480_vm1, %v285_v19  ;;  %v247_v58 = vld [vmem:[%s4248_s13 + $0xd8] sm:$0xff]  ;;  %v348_v60 = vld [vmem:[%s4248_s13 + $0x400] sm:$0xff]  ;;  %v349_v1 = vld [vmem:[%s4248_s13 + $0x408] sm:$0xff] }
  0x2a   : > { %v299_v59 = vld [vmem:[%s4248_s13 + $0x278] sm:$0xff]  ;;  %3872 = vmatmul.msk.f32.vlgmr.msra.gmra.mxu2 %vm480_vm1, %v348_v60  ;;  %v248_v62 = vld [vmem:[%s4248_s13 + $0xe0] sm:$0xff]  ;;  %v249_v3 = vld [vmem:[%s4248_s13 + $0xe8] sm:$0xff] }
  0x2b   : > { %v300_v0 = vld [vmem:[%s4248_s13 + $0x280] sm:$0xff]  ;;  %v301_v5 = vld [vmem:[%s4248_s13 + $0x288] sm:$0xff]  ;;  %v258_v60 = vld [vmem:[%s4248_s13 + $0x130] sm:$0xff] }
  0x2d   : > { %3746 = vmatmul.msk.f32.gmra.mxu0 %vm480_vm1, %v222_v6  ;;  %v350_v6 = vld [vmem:[%s4248_s13 + $0x410] sm:$0xff] }
  0x31   : > { %3810 = vmatmul.msk.f32.gmra.mxu1 %vm480_vm1, %v286_v21  ;;  %v353_v21 = vld [vmem:[%s4248_s13 + $0x428] sm:$0xff] }
  0x32   : > { %3873 = vmatmul.msk.f32.gmra.mxu2 %vm480_vm1, %v349_v1  ;;  %v359_v1 = vld [vmem:[%s4248_s13 + $0x458] sm:$0xff] }
  0x35   : > { %3747 = vmatmul.msk.f32.gmra.mxu0 %vm480_vm1, %v223_v7 }
  0x39   : > { %3811 = vmatmul.msk.f32.gmra.mxu1 %vm480_vm1, %v287_v23  ;;  %v253_v23 = vld [vmem:[%s4248_s13 + $0x108] sm:$0xff] }
  0x3a   : > { %3874 = vmatmul.msk.f32.gmra.mxu2 %vm480_vm1, %v350_v6 }
  0x3d   : > { %3748 = vmatmul.msk.f32.gmra.mxu0 %vm480_vm1, %v224_v8  ;;  %v250_v8 = vld [vmem:[%s4248_s13 + $0xf0] sm:$0xff] }
  0x41   : > { %3812 = vmatmul.msk.f32.gmra.mxu1 %vm480_vm1, %v288_v26  ;;  %v305_v26 = vld [vmem:[%s4248_s13 + $0x2a8] sm:$0xff] }
  0x45   : > { %3749 = vmatmul.msk.f32.gmra.mxu0 %vm480_vm1, %v225_v9 }
  0x49   : > { %3813 = vmatmul.msk.f32.gmra.mxu1 %vm480_vm1, %v289_v29 }
  0x4d   : > { %3750 = vmatmul.msk.f32.gmra.mxu0 %vm480_vm1, %v226_v10  ;;  %v302_v10 = vld [vmem:[%s4248_s13 + $0x290] sm:$0xff] }
  0x51   : > { %3814 = vmatmul.msk.f32.gmra.mxu1 %vm480_vm1, %v290_v32 }
  0x55   : > { %3751 = vmatmul.msk.f32.gmra.mxu0 %vm480_vm1, %v227_v11  ;;  %v351_v11 = vld [vmem:[%s4248_s13 + $0x418] sm:$0xff] }
  0x56   : > { %3875 = vmatmul.msk.f32.gmra.mxu2 %vm480_vm1, %v351_v11 }
  0x59   : > { %3815 = vmatmul.msk.f32.gmra.mxu1 %vm480_vm1, %v291_v35  ;;  %v355_v35 = vld [vmem:[%s4248_s13 + $0x438] sm:$0xff] }
  0x5d   : > { %3752 = vmatmul.msk.f32.gmra.mxu0 %vm480_vm1, %v228_v12 }
  0x61   : > { %3816 = vmatmul.msk.f32.gmra.mxu1 %vm480_vm1, %v292_v38  ;;  %v255_v38 = vld [vmem:[%s4248_s13 + $0x118] sm:$0xff] }
  0x65   : > { %3753 = vmatmul.msk.f32.gmra.mxu0 %vm480_vm1, %v229_v13  ;;  %v251_v13 = vld [vmem:[%s4248_s13 + $0xf8] sm:$0xff] }
  0x69   : > { %3817 = vmatmul.msk.f32.gmra.mxu1 %vm480_vm1, %v293_v41  ;;  %v307_v41 = vld [vmem:[%s4248_s13 + $0x2b8] sm:$0xff] }
  0x6d   : > { %3754 = vmatmul.msk.f32.gmra.mxu0 %vm480_vm1, %v230_v14 }
  0x71   : > { %3818 = vmatmul.msk.f32.gmra.mxu1 %vm480_vm1, %v294_v44 }
  0x75   : > { %3755 = vmatmul.msk.f32.gmra.mxu0 %vm480_vm1, %v231_v15  ;;  %v303_v15 = vld [vmem:[%s4248_s13 + $0x298] sm:$0xff] }
  0x79   : > { %3819 = vmatmul.msk.f32.gmra.mxu1 %vm480_vm1, %v295_v47 }
  0x7d   : > { %3756 = vmatmul.msk.f32.gmra.mxu0 %vm480_vm1, %v232_v16  ;;  %v352_v16 = vld [vmem:[%s4248_s13 + $0x420] sm:$0xff] }
  0x7e   : > { %3876 = vmatmul.msk.f32.gmra.mxu2 %vm480_vm1, %v352_v16  ;;  %v312_v16 = vld [vmem:[%s4248_s13 + $0x2e0] sm:$0xff] }
  0x81   : > { %3820 = vmatmul.msk.f32.gmra.mxu1 %vm480_vm1, %v296_v50  ;;  %v357_v50 = vld [vmem:[%s4248_s13 + $0x448] sm:$0xff] }
  0x85   : > { %3757 = vmatmul.msk.f32.gmra.mxu0 %vm480_vm1, %v233_v18  ;;  %v252_v18 = vld [vmem:[%s4248_s13 + $0x100] sm:$0xff] }
  0x86   : > { %3877 = vmatmul.msk.f32.gmra.mxu2 %vm480_vm1, %v353_v21  ;;  %v261_v21 = vld [vmem:[%s4248_s13 + $0x148] sm:$0xff] }
  0x89   : > { %3821 = vmatmul.msk.f32.gmra.mxu1 %vm480_vm1, %v297_v53  ;;  %v257_v53 = vld [vmem:[%s4248_s13 + $0x128] sm:$0xff] }
  0x8d   : > { %3758 = vmatmul.msk.f32.gmra.mxu0 %vm480_vm1, %v234_v20  ;;  %v304_v20 = vld [vmem:[%s4248_s13 + $0x2a0] sm:$0xff] }
  0x91   : > { %3822 = vmatmul.msk.f32.gmra.mxu1 %vm480_vm1, %v298_v56  ;;  %v309_v56 = vld [vmem:[%s4248_s13 + $0x2c8] sm:$0xff] }
  0x95   : > { %3759 = vmatmul.msk.f32.gmra.mxu0 %vm480_vm1, %v235_v22 }
  0x99   : > { %3823 = vmatmul.msk.f32.gmra.mxu1 %vm480_vm1, %v299_v59 }
  0x9a   : > { %v4297_v24 = vpop.f32.mrf.mxu0 }
  0x9b   : > { %2039 = vst.msk [vmem:[%s4295_s22] sm:$0xff] %vm2038_vm2, %v4297_v24 }
  0x9d   : > { %3760 = vmatmul.msk.f32.gmra.mxu0 %vm480_vm1, %v236_v25 }
  0x9e   : > { %v4410_v63 = vpop.f32.mrf.mxu1 }
  0x9f   : > { %2103 = vst.msk [vmem:[%s4295_s22 + $0x200] sm:$0xff] %vm2038_vm2, %v4410_v63 }
  0xa1   : > { %3824 = vmatmul.msk.f32.gmra.mxu1 %vm480_vm1, %v300_v0  ;;  %v310_v0 = vld [vmem:[%s4248_s13 + $0x2d0] sm:$0xff] }
  0xa2   : > { %v4306_v27 = vpop.f32.mrf.mxu0 }
  0xa3   : > { %2040 = vst.msk [vmem:[%s4295_s22 + $0x8] sm:$0xff] %vm2038_vm2, %v4306_v27 }
  0xa5   : > { %3761 = vmatmul.msk.f32.gmra.mxu0 %vm480_vm1, %v237_v28  ;;  %v354_v28 = vld [vmem:[%s4248_s13 + $0x430] sm:$0xff] }
  0xa6   : > { %v4426_v4 = vpop.f32.mrf.mxu1  ;;  %3878 = vmatmul.msk.f32.gmra.mxu2 %vm480_vm1, %v354_v28  ;;  %v362_v28 = vld [vmem:[%s4248_s13 + $0x470] sm:$0xff] }
  0xa7   : > { %2104 = vst.msk [vmem:[%s4295_s22 + $0x208] sm:$0xff] %vm2038_vm2, %v4426_v4 }
  0xa9   : > { %3825 = vmatmul.msk.f32.gmra.mxu1 %vm480_vm1, %v301_v5  ;;  %v259_v5 = vld [vmem:[%s4248_s13 + $0x138] sm:$0xff] }
  0xaa   : > { %v4315_v30 = vpop.f32.mrf.mxu0 }
  0xab   : > { %2041 = vst.msk [vmem:[%s4295_s22 + $0x10] sm:$0xff] %vm2038_vm2, %v4315_v30 }
  0xad   : > { %3762 = vmatmul.msk.f32.gmra.mxu0 %vm480_vm1, %v238_v31  ;;  %v254_v31 = vld [vmem:[%s4248_s13 + $0x110] sm:$0xff] }
  0xae   : > { %v4442_v9 = vpop.f32.mrf.mxu1  ;;  %3879 = vmatmul.msk.f32.gmra.mxu2 %vm480_vm1, %v355_v35 }
  0xaf   : > { %2105 = vst.msk [vmem:[%s4295_s22 + $0x210] sm:$0xff] %vm2038_vm2, %v4442_v9 }
  0xb1   : > { %3826 = vmatmul.msk.f32.gmra.mxu1 %vm480_vm1, %v302_v10  ;;  %v360_v10 = vld [vmem:[%s4248_s13 + $0x460] sm:$0xff] }
  0xb2   : > { %v4324_v33 = vpop.f32.mrf.mxu0 }
  0xb3   : > { %2042 = vst.msk [vmem:[%s4295_s22 + $0x18] sm:$0xff] %vm2038_vm2, %v4324_v33 }
  0xb5   : > { %3763 = vmatmul.msk.f32.gmra.mxu0 %vm480_vm1, %v239_v34  ;;  %v306_v34 = vld [vmem:[%s4248_s13 + $0x2b0] sm:$0xff] }
  0xb6   : > { %v4458_v14 = vpop.f32.mrf.mxu1 }
  0xb7   : > { %2106 = vst.msk [vmem:[%s4295_s22 + $0x218] sm:$0xff] %vm2038_vm2, %v4458_v14 }
  0xb9   : > { %3827 = vmatmul.msk.f32.gmra.mxu1 %vm480_vm1, %v303_v15 }
  0xba   : > { %v4333_v36 = vpop.f32.mrf.mxu0 }
  0xbb   : > { %2043 = vst.msk [vmem:[%s4295_s22 + $0x20] sm:$0xff] %vm2038_vm2, %v4333_v36 }
  0xbd   : > { %3764 = vmatmul.msk.f32.gmra.mxu0 %vm480_vm1, %v240_v37 }
  0xbe   : > { %v4474_v19 = vpop.f32.mrf.mxu1 }
  0xbf   : > { %2107 = vst.msk [vmem:[%s4295_s22 + $0x220] sm:$0xff] %vm2038_vm2, %v4474_v19 }
  0xc1   : > { %3828 = vmatmul.msk.f32.gmra.mxu1 %vm480_vm1, %v304_v20 }
  0xc2   : > { %v4342_v39 = vpop.f32.mrf.mxu0 }
  0xc3   : > { %2044 = vst.msk [vmem:[%s4295_s22 + $0x28] sm:$0xff] %vm2038_vm2, %v4342_v39 }
  0xc5   : > { %3765 = vmatmul.msk.f32.gmra.mxu0 %vm480_vm1, %v241_v40 }
  0xc6   : > { %v4490_v25 = vpop.f32.mrf.mxu1 }
  0xc7   : > { %2108 = vst.msk [vmem:[%s4295_s22 + $0x228] sm:$0xff] %vm2038_vm2, %v4490_v25 }
  0xc9   : > { %3829 = vmatmul.msk.f32.gmra.mxu1 %vm480_vm1, %v305_v26  ;;  %v313_v26 = vld [vmem:[%s4248_s13 + $0x2e8] sm:$0xff] }
  0xca   : > { %v4351_v42 = vpop.f32.mrf.mxu0 }
  0xcb   : > { %2045 = vst.msk [vmem:[%s4295_s22 + $0x30] sm:$0xff] %vm2038_vm2, %v4351_v42 }
  0xcd   : > { %3766 = vmatmul.msk.f32.gmra.mxu0 %vm480_vm1, %v242_v43  ;;  %v356_v43 = vld [vmem:[%s4248_s13 + $0x440] sm:$0xff] }
  0xce   : > { %v4506_v32 = vpop.f32.mrf.mxu1  ;;  %3880 = vmatmul.msk.f32.gmra.mxu2 %vm480_vm1, %v356_v43 }
  0xcf   : > { %2109 = vst.msk [vmem:[%s4295_s22 + $0x230] sm:$0xff] %vm2038_vm2, %v4506_v32 }
  0xd1   : > { %3830 = vmatmul.msk.f32.gmra.mxu1 %vm480_vm1, %v306_v34  ;;  %v262_v34 = vld [vmem:[%s4248_s13 + $0x150] sm:$0xff] }
  0xd2   : > { %v4360_v45 = vpop.f32.mrf.mxu0 }
  0xd3   : > { %2046 = vst.msk [vmem:[%s4295_s22 + $0x38] sm:$0xff] %vm2038_vm2, %v4360_v45 }
  0xd5   : > { %3767 = vmatmul.msk.f32.gmra.mxu0 %vm480_vm1, %v243_v46  ;;  %v256_v46 = vld [vmem:[%s4248_s13 + $0x120] sm:$0xff] }
  0xd6   : > { %v4522_v40 = vpop.f32.mrf.mxu1  ;;  %3881 = vmatmul.msk.f32.gmra.mxu2 %vm480_vm1, %v357_v50  ;;  %v315_v50 = vld [vmem:[%s4248_s13 + $0x2f8] sm:$0xff] }
  0xd7   : > { %2110 = vst.msk [vmem:[%s4295_s22 + $0x238] sm:$0xff] %vm2038_vm2, %v4522_v40 }
  0xd9   : > { %3831 = vmatmul.msk.f32.gmra.mxu1 %vm480_vm1, %v307_v41  ;;  %v363_v41 = vld [vmem:[%s4248_s13 + $0x478] sm:$0xff] }
  0xda   : > { %v4369_v48 = vpop.f32.mrf.mxu0 }
  0xdb   : > { %2047 = vst.msk [vmem:[%s4295_s22 + $0x40] sm:$0xff] %vm2038_vm2, %v4369_v48 }
  0xdd   : > { %3768 = vmatmul.msk.f32.gmra.mxu0 %vm480_vm1, %v244_v49  ;;  %v308_v49 = vld [vmem:[%s4248_s13 + $0x2c0] sm:$0xff] }
  0xde   : > { %v4538_v47 = vpop.f32.mrf.mxu1 }
  0xdf   : > { %2111 = vst.msk [vmem:[%s4295_s22 + $0x240] sm:$0xff] %vm2038_vm2, %v4538_v47 }
  0xe1   : > { %3832 = vmatmul.msk.f32.gmra.mxu1 %vm480_vm1, %v308_v49 }
  0xe2   : > { %v4378_v51 = vpop.f32.mrf.mxu0 }
  0xe3   : > { %2048 = vst.msk [vmem:[%s4295_s22 + $0x48] sm:$0xff] %vm2038_vm2, %v4378_v51 }
  0xe5   : > { %3769 = vmatmul.msk.f32.gmra.mxu0 %vm480_vm1, %v245_v52 }
  0xe9   : > { %3833 = vmatmul.msk.f32.gmra.mxu1 %vm480_vm1, %v309_v56  ;;  %v412_v56 = vld [vmem:[%s4248_s13 + $0x600] sm:$0xff] }
  0xea   : > { %v4387_v54 = vpop.f32.mrf.mxu0  ;;  %3936 = vmatmul.msk.f32.vlgmr.msra.gmra.mxu3 %vm480_vm1, %v412_v56  ;;  %v367_v56 = vld [vmem:[%s4248_s13 + $0x498] sm:$0xff] }
  0xeb   : > { %2049 = vst.msk [vmem:[%s4295_s22 + $0x50] sm:$0xff] %vm2038_vm2, %v4387_v54 }
  0xed   : > { %3770 = vmatmul.msk.f32.gmra.mxu0 %vm480_vm1, %v246_v55  ;;  %v4554_v55 = vpop.f32.mrf.mxu1 }
  0xee   : > { %2112 = vst.msk [vmem:[%s4295_s22 + $0x248] sm:$0xff] %vm2038_vm2, %v4554_v55 }
  0xf1   : > { %3834 = vmatmul.msk.f32.gmra.mxu1 %vm480_vm1, %v310_v0 }
  0xf2   : > { %v4396_v57 = vpop.f32.mrf.mxu0 }
  0xf3   : > { %2050 = vst.msk [vmem:[%s4295_s22 + $0x58] sm:$0xff] %vm2038_vm2, %v4396_v57 }
  0xf5   : > { %3771 = vmatmul.msk.f32.gmra.mxu0 %vm480_vm1, %v247_v58  ;;  %v358_v58 = vld [vmem:[%s4248_s13 + $0x450] sm:$0xff] }
  0xf6   : > { %3882 = vmatmul.msk.f32.gmra.mxu2 %vm480_vm1, %v358_v58 }
  0xfa   : > { %v4407_v61 = vpop.f32.mrf.mxu0 }
  0xfb   : > { %2051 = vst.msk [vmem:[%s4295_s22 + $0x60] sm:$0xff] %vm2038_vm2, %v4407_v61 }
  0xfd   : > { %3772 = vmatmul.msk.f32.gmra.mxu0 %vm480_vm1, %v248_v62  ;;  %v4570_v62 = vpop.f32.mrf.mxu1 }
  0xfe   : > { %2113 = vst.msk [vmem:[%s4295_s22 + $0x250] sm:$0xff] %vm2038_vm2, %v4570_v62  ;;  %3883 = vmatmul.msk.f32.gmra.mxu2 %vm480_vm1, %v359_v1  ;;  %v4673_v1 = vpop.f32.mrf.mxu2 }
  0xff   : > { %7434 = vst [vmem:[#allocation8_spill] sm:$0xff] %v4673_v1 }
 0x100   : > { %2167 = vst.msk [vmem:[%s4295_s22 + $0x400] sm:$0xff] %vm2038_vm2, %v4673_v1  ;;  %v2818_v1 = vmul.f32 %v4333_v36, %v4333_v36 }
 0x102   : > { %v4423_v2 = vpop.f32.mrf.mxu0 }
 0x103   : > { %2052 = vst.msk [vmem:[%s4295_s22 + $0x68] sm:$0xff] %vm2038_vm2, %v4423_v2 }
 0x105   : > { %3773 = vmatmul.msk.f32.gmra.mxu0 %vm480_vm1, %v249_v3  ;;  %v4586_v6 = vpop.f32.mrf.mxu1 }
 0x106   : > { %2114 = vst.msk [vmem:[%s4295_s22 + $0x258] sm:$0xff] %vm2038_vm2, %v4586_v6  ;;  %3884 = vmatmul.msk.f32.gmra.mxu2 %vm480_vm1, %v360_v10  ;;  %v413_v10 = vld [vmem:[%s4248_s13 + $0x608] sm:$0xff] }
 0x107   : > { %3937 = vmatmul.msk.f32.gmra.mxu3 %vm480_vm1, %v413_v10  ;;  %v2296_v10 = vsel %vm2038_vm2, %v4306_v27, 0.0 }
 0x10a   : > { %v4439_v7 = vpop.f32.mrf.mxu0 }
 0x10b   : > { %2053 = vst.msk [vmem:[%s4295_s22 + $0x70] sm:$0xff] %vm2038_vm2, %v4439_v7 }
 0x10d   : > { %3774 = vmatmul.msk.f32.gmra.mxu0 %vm480_vm1, %v250_v8  ;;  %v311_v8 = vld [vmem:[%s4248_s13 + $0x2d8] sm:$0xff]  ;;  %v4602_v15 = vpop.f32.mrf.mxu1 }
 0x10e   : > { %3835 = vmatmul.msk.f32.gmra.mxu1 %vm480_vm1, %v311_v8  ;;  %2115 = vst.msk [vmem:[%s4295_s22 + $0x260] sm:$0xff] %vm2038_vm2, %v4602_v15  ;;  %v365_v8 = vld [vmem:[%s4248_s13 + $0x488] sm:$0xff] }
 0x112   : > { %v4455_v12 = vpop.f32.mrf.mxu0 }
 0x113   : > { %2054 = vst.msk [vmem:[%s4295_s22 + $0x78] sm:$0xff] %vm2038_vm2, %v4455_v12 }
 0x115   : > { %3775 = vmatmul.msk.f32.gmra.mxu0 %vm480_vm1, %v251_v13  ;;  %v260_v13 = vld [vmem:[%s4248_s13 + $0x140] sm:$0xff] }
 0x116   : > { %3836 = vmatmul.msk.f32.gmra.mxu1 %vm480_vm1, %v312_v16  ;;  %v265_v16 = vld [vmem:[%s4248_s13 + $0x168] sm:$0xff] }
 0x11a   : > { %v4471_v17 = vpop.f32.mrf.mxu0 }
 0x11b   : > { %2055 = vst.msk [vmem:[%s4295_s22 + $0x80] sm:$0xff] %vm2038_vm2, %v4471_v17 }
 0x11d   : > { %3776 = vmatmul.msk.f32.gmra.mxu0 %vm480_vm1, %v252_v18  ;;  %v361_v18 = vld [vmem:[%s4248_s13 + $0x468] sm:$0xff] }
 0x11e   : > { %3885 = vmatmul.msk.f32.gmra.mxu2 %vm480_vm1, %v361_v18  ;;  %3837 = vmatmul.msk.f32.gmra.mxu1 %vm480_vm1, %v313_v26  ;;  %v317_v26 = vld [vmem:[%s4248_s13 + $0x308] sm:$0xff] }
 0x122   : > { %v4487_v22 = vpop.f32.mrf.mxu0 }
 0x123   : > { %2056 = vst.msk [vmem:[%s4295_s22 + $0x88] sm:$0xff] %vm2038_vm2, %v4487_v22 }
 0x125   : > { %3777 = vmatmul.msk.f32.gmra.mxu0 %vm480_vm1, %v253_v23  ;;  %v4618_v23 = vpop.f32.mrf.mxu1 }
 0x126   : > { %2116 = vst.msk [vmem:[%s4295_s22 + $0x268] sm:$0xff] %vm2038_vm2, %v4618_v23  ;;  %3886 = vmatmul.msk.f32.gmra.mxu2 %vm480_vm1, %v362_v28  ;;  %v366_v28 = vld [vmem:[%s4248_s13 + $0x490] sm:$0xff] }
 0x12a   : > { %v4503_v29 = vpop.f32.mrf.mxu0 }
 0x12b   : > { %2057 = vst.msk [vmem:[%s4295_s22 + $0x90] sm:$0xff] %vm2038_vm2, %v4503_v29 }
 0x12d   : > { %3778 = vmatmul.msk.f32.gmra.mxu0 %vm480_vm1, %v254_v31  ;;  %v4634_v35 = vpop.f32.mrf.mxu1 }
 0x12e   : > { %2117 = vst.msk [vmem:[%s4295_s22 + $0x270] sm:$0xff] %vm2038_vm2, %v4634_v35  ;;  %3887 = vmatmul.msk.f32.gmra.mxu2 %vm480_vm1, %v363_v41  ;;  %v266_v41 = vld [vmem:[%s4248_s13 + $0x170] sm:$0xff] }
 0x132   : > { %v4519_v37 = vpop.f32.mrf.mxu0 }
 0x133   : > { %2058 = vst.msk [vmem:[%s4295_s22 + $0x98] sm:$0xff] %vm2038_vm2, %v4519_v37 }
 0x135   : > { %3779 = vmatmul.msk.f32.gmra.mxu0 %vm480_vm1, %v255_v38  ;;  %v314_v38 = vld [vmem:[%s4248_s13 + $0x2f0] sm:$0xff]  ;;  %v4650_v49 = vpop.f32.mrf.mxu1 }
 0x136   : > { %3838 = vmatmul.msk.f32.gmra.mxu1 %vm480_vm1, %v314_v38  ;;  %2118 = vst.msk [vmem:[%s4295_s22 + $0x278] sm:$0xff] %vm2038_vm2, %v4650_v49 }
 0x13a   : > { %v4535_v44 = vpop.f32.mrf.mxu0 }
 0x13b   : > { %2059 = vst.msk [vmem:[%s4295_s22 + $0xa0] sm:$0xff] %vm2038_vm2, %v4535_v44 }
 0x13d   : > { %3780 = vmatmul.msk.f32.gmra.mxu0 %vm480_vm1, %v256_v46  ;;  %v263_v46 = vld [vmem:[%s4248_s13 + $0x158] sm:$0xff]  ;;  %v4668_v0 = vpop.f32.mrf.mxu1 }
 0x13e   : > { %3839 = vmatmul.msk.f32.gmra.mxu1 %vm480_vm1, %v315_v50  ;;  %2119 = vst.msk [vmem:[%s4295_s22 + $0x280] sm:$0xff] %vm2038_vm2, %v4668_v0 }
 0x142   : > { %v4551_v52 = vpop.f32.mrf.mxu0 }
 0x143   : > { %2060 = vst.msk [vmem:[%s4295_s22 + $0xa8] sm:$0xff] %vm2038_vm2, %v4551_v52 }
 0x145   : > { %3781 = vmatmul.msk.f32.gmra.mxu0 %vm480_vm1, %v257_v53  ;;  %v364_v53 = vld [vmem:[%s4248_s13 + $0x480] sm:$0xff]  ;;  %v4691_v18 = vpop.f32.mrf.mxu1 }
 0x146   : > { %3888 = vmatmul.msk.f32.gmra.mxu2 %vm480_vm1, %v364_v53  ;;  %2120 = vst.msk [vmem:[%s4295_s22 + $0x288] sm:$0xff] %vm2038_vm2, %v4691_v18  ;;  %v318_v53 = vld [vmem:[%s4248_s13 + $0x310] sm:$0xff] }
 0x14a   : > { %v4567_v59 = vpop.f32.mrf.mxu0 }
 0x14b   : > { %2061 = vst.msk [vmem:[%s4295_s22 + $0xb0] sm:$0xff] %vm2038_vm2, %v4567_v59 }
 0x14d   : > { %3782 = vmatmul.msk.f32.gmra.mxu0 %vm480_vm1, %v258_v60  ;;  %v264_v60 = vld [vmem:[%s4248_s13 + $0x160] sm:$0xff] }
 0x14e   : > { %3889 = vmatmul.msk.f32.gmra.mxu2 %vm480_vm1, %v365_v8  ;;  %v2814_v8 = vmul.f32 %v4297_v24, %v4297_v24 }
 0x152   : > { %v4583_v3 = vpop.f32.mrf.mxu0 }
 0x153   : > { %2062 = vst.msk [vmem:[%s4295_s22 + $0xb8] sm:$0xff] %vm2038_vm2, %v4583_v3 }
 0x155   : > { %3783 = vmatmul.msk.f32.gmra.mxu0 %vm480_vm1, %v259_v5  ;;  %v316_v5 = vld [vmem:[%s4248_s13 + $0x300] sm:$0xff] }
 0x156   : > { %3840 = vmatmul.msk.f32.gmra.mxu1 %vm480_vm1, %v316_v5  ;;  %3890 = vmatmul.msk.f32.gmra.mxu2 %vm480_vm1, %v366_v28  ;;  %v2815_v5 = vmul.f32 %v4306_v27, %v4306_v27  ;;  %v267_v28 = vld [vmem:[%s4248_s13 + $0x178] sm:$0xff]  ;;  %v2817_v27 = vmul.f32 %v4324_v33, %v4324_v33 }
 0x15a   : > { %v4599_v11 = vpop.f32.mrf.mxu0 }
 0x15b   : > { %2063 = vst.msk [vmem:[%s4295_s22 + $0xc0] sm:$0xff] %vm2038_vm2, %v4599_v11 }
 0x15d   : > { %3784 = vmatmul.msk.f32.gmra.mxu0 %vm480_vm1, %v260_v13 }
 0x15e   : > { %3841 = vmatmul.msk.f32.gmra.mxu1 %vm480_vm1, %v317_v26  ;;  %3891 = vmatmul.msk.f32.gmra.mxu2 %vm480_vm1, %v367_v56  ;;  %v2298_v56 = vsel %vm2038_vm2, %v4315_v30, 0.0 }
 0x162   : > { %v4615_v20 = vpop.f32.mrf.mxu0 }
 0x163   : > { %2064 = vst.msk [vmem:[%s4295_s22 + $0xc8] sm:$0xff] %vm2038_vm2, %v4615_v20 }
 0x165   : > { %3785 = vmatmul.msk.f32.gmra.mxu0 %vm480_vm1, %v261_v21  ;;  %v4696_v21 = vpop.f32.mrf.mxu2 }
 0x166   : > { %7435 = vst [vmem:[#allocation9_spill] sm:$0xff] %v4696_v21  ;;  %3842 = vmatmul.msk.f32.gmra.mxu1 %vm480_vm1, %v318_v53  ;;  %v3071_v53 = vsel %vm2038_vm2, %v2815_v5, 0.0  ;;  %v3070_v5 = vsel %vm2038_vm2, %v2814_v8, 0.0  ;;  %v416_v8 = vld [vmem:[%s4248_s13 + $0x620] sm:$0xff] }
 0x167   : > { %2168 = vst.msk [vmem:[%s4295_s22 + $0x408] sm:$0xff] %vm2038_vm2, %v4696_v21 }
 0x16a   : > { %v4631_v31 = vpop.f32.mrf.mxu0 }
 0x16b   : > { %2065 = vst.msk [vmem:[%s4295_s22 + $0xd0] sm:$0xff] %vm2038_vm2, %v4631_v31 }
 0x16d   : > { %3786 = vmatmul.msk.f32.gmra.mxu0 %vm480_vm1, %v262_v34  ;;  %v414_v34 = vld [vmem:[%s4248_s13 + $0x610] sm:$0xff]  ;;  %v4719_v50 = vpop.f32.mrf.mxu2 }
 0x16e   : > { %3938 = vmatmul.msk.f32.gmra.mxu3 %vm480_vm1, %v414_v34  ;;  %7437 = vst [vmem:[#allocation11_spill] sm:$0xff] %v4719_v50 }
 0x16f   : > { %2169 = vst.msk [vmem:[%s4295_s22 + $0x410] sm:$0xff] %vm2038_vm2, %v4719_v50 }
 0x172   : > { %v4647_v43 = vpop.f32.mrf.mxu0 }
 0x173   : > { %2066 = vst.msk [vmem:[%s4295_s22 + $0xd8] sm:$0xff] %vm2038_vm2, %v4647_v43 }
 0x175   : > { %3787 = vmatmul.msk.f32.gmra.mxu0 %vm480_vm1, %v263_v46  ;;  %v4714_v46 = vpop.f32.mrf.mxu1 }
 0x176   : > { %7436 = vst [vmem:[#allocation10_spill] sm:$0xff] %v4714_v46 }
 0x177   : > { %2121 = vst.msk [vmem:[%s4295_s22 + $0x290] sm:$0xff] %vm2038_vm2, %v4714_v46  ;;  %v2819_v46 = vmul.f32 %v4342_v39, %v4342_v39 }
 0x17a   : > { %v4665_v58 = vpop.f32.mrf.mxu0 }
 0x17b   : > { %2067 = vst.msk [vmem:[%s4295_s22 + $0xe0] sm:$0xff] %vm2038_vm2, %v4665_v58 }
 0x17d   : > { %3788 = vmatmul.msk.f32.gmra.mxu0 %vm480_vm1, %v264_v60  ;;  %v415_v60 = vld [vmem:[%s4248_s13 + $0x618] sm:$0xff]  ;;  %v4745_v34 = vpop.f32.mrf.mxu1 }
 0x17e   : > { %3939 = vmatmul.msk.f32.gmra.mxu3 %vm480_vm1, %v415_v60  ;;  %7438 = vst [vmem:[#allocation12_spill] sm:$0xff] %v4745_v34  ;;  %v4757_v60 = vpop.f32.mrf.mxu2 }
 0x17f   : > { %7439 = vst [vmem:[#allocation13_spill] sm:$0xff] %v4757_v60 }
 0x180   : > { %2122 = vst.msk [vmem:[%s4295_s22 + $0x298] sm:$0xff] %vm2038_vm2, %v4745_v34  ;;  %v368_v34 = vld [vmem:[%s4248_s13 + $0x4a0] sm:$0xff] }
 0x181   : > { %2170 = vst.msk [vmem:[%s4295_s22 + $0x418] sm:$0xff] %vm2038_vm2, %v4757_v60  ;;  %3892 = vmatmul.msk.f32.gmra.mxu2 %vm480_vm1, %v368_v34  ;;  %v268_v34 = vld [vmem:[%s4248_s13 + $0x180] sm:$0xff] }
 0x182   : > { %v4688_v13 = vpop.f32.mrf.mxu0 }
 0x183   : > { %2068 = vst.msk [vmem:[%s4295_s22 + $0xe8] sm:$0xff] %vm2038_vm2, %v4688_v13 }
 0x185   : > { %3789 = vmatmul.msk.f32.gmra.mxu0 %vm480_vm1, %v265_v16  ;;  %v2816_v16 = vmul.f32 %v4315_v30, %v4315_v30  ;;  %v2300_v30 = vsel %vm2038_vm2, %v4324_v33, 0.0  ;;  %v2302_v33 = vsel %vm2038_vm2, %v4333_v36, 0.0  ;;  %v2820_v36 = vmul.f32 %v4351_v42, %v4351_v42  ;;  %v4791_v60 = vpop.f32.mrf.mxu1 }
 0x186   : > { %3940 = vmatmul.msk.f32.gmra.mxu3 %vm480_vm1, %v416_v8  ;;  %2123 = vst.msk [vmem:[%s4295_s22 + $0x2a0] sm:$0xff] %vm2038_vm2, %v4791_v60  ;;  %v320_v8 = vld [vmem:[%s4248_s13 + $0x320] sm:$0xff] }
 0x187   : > { %v3073_v21 = vsel %vm2038_vm2, %v2816_v16, 0.0  ;;  %v3075_v16 = vsel %vm2038_vm2, %v2817_v27, 0.0 }
 0x18a   : > { %v4711_v38 = vpop.f32.mrf.mxu0 }
 0x18b   : > { %2069 = vst.msk [vmem:[%s4295_s22 + $0xf0] sm:$0xff] %vm2038_vm2, %v4711_v38 }
 0x18d   : > { %3790 = vmatmul.msk.f32.gmra.mxu0 %vm480_vm1, %v266_v41  ;;  %v2295_v41 = vsel %vm2038_vm2, %v4297_v24, 0.0  ;;  %v319_v24 = vld [vmem:[%s4248_s13 + $0x318] sm:$0xff] }
 0x18e   : > { %v2297_v50 = vadd.f32 %v2296_v10, %v2295_v41  ;;  %3843 = vmatmul.msk.f32.gmra.mxu1 %vm480_vm1, %v319_v24  ;;  %v3072_v10 = vadd.f32 %v3071_v53, %v3070_v5  ;;  %v2304_v53 = vsel %vm2038_vm2, %v4342_v39, 0.0  ;;  %v2821_v39 = vmul.f32 %v4360_v45, %v4360_v45 }
 0x190   : > { %v2299_v41 = vadd.f32 %v2298_v56, %v2297_v50  ;;  %v3077_v50 = vsel %vm2038_vm2, %v2818_v1, 0.0  ;;  %v2306_v1 = vsel %vm2038_vm2, %v4351_v42, 0.0  ;;  %v2308_v42 = vsel %vm2038_vm2, %v4360_v45, 0.0 }
 0x191   : > { %v2310_v45 = vsel %vm2038_vm2, %v4369_v48, 0.0 }
 0x192   : > { %v4742_v26 = vpop.f32.mrf.mxu0  ;;  %v2301_v24 = vadd.f32 %v2300_v30, %v2299_v41  ;;  %v4801_v30 = vpop.f32.mrf.mxu2 }
 0x193   : > { %2070 = vst.msk [vmem:[%s4295_s22 + $0xf8] sm:$0xff] %vm2038_vm2, %v4742_v26 }
 0x194   : > { %v2303_v27 = vadd.f32 %v2302_v33, %v2301_v24  ;;  %7440 = vst [vmem:[#allocation14_spill] sm:$0xff] %v4801_v30  ;;  %v369_v24 = vld [vmem:[%s4248_s13 + $0x4a8] sm:$0xff] }
 0x195   : > { %3791 = vmatmul.msk.f32.gmra.mxu0 %vm480_vm1, %v267_v28  ;;  %v3074_v28 = vadd.f32 %v3073_v21, %v3072_v10  ;;  %v3079_v21 = vsel %vm2038_vm2, %v2819_v46, 0.0  ;;  %v3081_v46 = vsel %vm2038_vm2, %v2820_v36, 0.0  ;;  %2171 = vst.msk [vmem:[%s4295_s22 + $0x420] sm:$0xff] %vm2038_vm2, %v4801_v30  ;;  %v2823_v36 = vmul.f32 %v4378_v51, %v4378_v51  ;;  %3893 = vmatmul.msk.f32.gmra.mxu2 %vm480_vm1, %v369_v24  ;;  %v321_v24 = vld [vmem:[%s4248_s13 + $0x328] sm:$0xff] }
 0x196   : > { %v2305_v41 = vadd.f32 %v2304_v53, %v2303_v27  ;;  %3844 = vmatmul.msk.f32.gmra.mxu1 %vm480_vm1, %v320_v8  ;;  %v3083_v53 = vsel %vm2038_vm2, %v2821_v39, 0.0  ;;  %v4834_v8 = vpop.f32.mrf.mxu1  ;;  %v445_v30 = vld [vmem:[%s4248_s13 + $0x708] sm:$0xff] }
 0x197   : > { %v3076_v56 = vadd.f32 %v3075_v16, %v3074_v28  ;;  %v2822_v16 = vmul.f32 %v4369_v48, %v4369_v48  ;;  %v2824_v48 = vmul.f32 %v4387_v54, %v4387_v54  ;;  %2124 = vst.msk [vmem:[%s4295_s22 + $0x2a8] sm:$0xff] %vm2038_vm2, %v4834_v8 }
 0x198   : > { %v2307_v28 = vadd.f32 %v2306_v1, %v2305_v41  ;;  %v269_v41 = vld [vmem:[%s4248_s13 + $0x188] sm:$0xff] }
 0x199   : > { %v3078_v10 = vadd.f32 %v3077_v50, %v3076_v56  ;;  %v417_v50 = vld [vmem:[%s4248_s13 + $0x628] sm:$0xff] }
 0x19a   : > { %v4788_v5 = vpop.f32.mrf.mxu0  ;;  %3941 = vmatmul.msk.f32.gmra.mxu3 %vm480_vm1, %v417_v50  ;;  %v2309_v27 = vadd.f32 %v2308_v42, %v2307_v28  ;;  %v2314_v42 = vsel %vm2038_vm2, %v4387_v54, 0.0  ;;  %v3089_v50 = vsel %vm2038_vm2, %v2824_v48, 0.0  ;;  %v2316_v54 = vsel %vm2038_vm2, %v4396_v57, 0.0 }
 0x19b   : > { %2071 = vst.msk [vmem:[%s4295_s22 + $0x100] sm:$0xff] %vm2038_vm2, %v4788_v5  ;;  %v3080_v33 = vadd.f32 %v3079_v21, %v3078_v10  ;;  %v2312_v21 = vsel %vm2038_vm2, %v4378_v51, 0.0  ;;  %v2825_v51 = vmul.f32 %v4396_v57, %v4396_v57  ;;  %v2318_v57 = vsel %vm2038_vm2, %v4407_v61, 0.0 }
 0x19c   : > { %v2311_v39 = vadd.f32 %v2310_v45, %v2309_v27  ;;  %v418_v27 = vld [vmem:[%s4248_s13 + $0x630] sm:$0xff] }
 0x19d   : > { %3792 = vmatmul.msk.f32.gmra.mxu0 %vm480_vm1, %v268_v34  ;;  %v3082_v56 = vadd.f32 %v3081_v46, %v3080_v33  ;;  %v3085_v34 = vsel %vm2038_vm2, %v2822_v16, 0.0  ;;  %v3087_v46 = vsel %vm2038_vm2, %v2823_v36, 0.0  ;;  %v4844_v16 = vpop.f32.mrf.mxu2 }
 0x19e   : > { %7441 = vst [vmem:[#allocation15_spill] sm:$0xff] %v4844_v16  ;;  %v2313_v28 = vadd.f32 %v2312_v21, %v2311_v39  ;;  %3845 = vmatmul.msk.f32.gmra.mxu1 %vm480_vm1, %v321_v24  ;;  %v2827_v21 = vmul.f32 %v4423_v2, %v4423_v2 }
 0x19f   : > { %v3084_v1 = vadd.f32 %v3083_v53, %v3082_v56  ;;  %v2826_v53 = vmul.f32 %v4407_v61, %v4407_v61  ;;  %2172 = vst.msk [vmem:[%s4295_s22 + $0x428] sm:$0xff] %vm2038_vm2, %v4844_v16  ;;  %v370_v56 = vld [vmem:[%s4248_s13 + $0x4b0] sm:$0xff]  ;;  %v2828_v61 = vmul.f32 %v4439_v7, %v4439_v7 }
 0x1a0   : > { %v2315_v36 = vadd.f32 %v2314_v42, %v2313_v28  ;;  %3894 = vmatmul.msk.f32.gmra.mxu2 %vm480_vm1, %v370_v56  ;;  %v4877_v28 = vpop.f32.mrf.mxu1  ;;  %v3095_v24 = vsel %vm2038_vm2, %v2827_v21, 0.0  ;;  %v371_v21 = vld [vmem:[%s4248_s13 + $0x4b8] sm:$0xff] }
 0x1a1   : > { %v3086_v33 = vadd.f32 %v3085_v34, %v3084_v1  ;;  %v3091_v34 = vsel %vm2038_vm2, %v2825_v51, 0.0  ;;  %v3093_v39 = vsel %vm2038_vm2, %v2826_v53, 0.0  ;;  %2125 = vst.msk [vmem:[%s4295_s22 + $0x2b0] sm:$0xff] %vm2038_vm2, %v4877_v28  ;;  %v3097_v56 = vsel %vm2038_vm2, %v2828_v61, 0.0 }
 0x1a2   : > { %v4831_v10 = vpop.f32.mrf.mxu0  ;;  %3942 = vmatmul.msk.f32.gmra.mxu3 %vm480_vm1, %v418_v27  ;;  %v2317_v1 = vadd.f32 %v2316_v54, %v2315_v36  ;;  %v322_v36 = vld [vmem:[%s4248_s13 + $0x330] sm:$0xff]  ;;  %v2830_v27 = vmul.f32 %v4471_v17, %v4471_v17 }
 0x1a3   : > { %2072 = vst.msk [vmem:[%s4295_s22 + $0x108] sm:$0xff] %vm2038_vm2, %v4831_v10  ;;  %v3088_v45 = vadd.f32 %v3087_v46, %v3086_v33  ;;  %v270_v33 = vld [vmem:[%s4248_s13 + $0x190] sm:$0xff] }
 0x1a4   : > { %v2319_v42 = vadd.f32 %v2318_v57, %v2317_v1 }
 0x1a5   : > { %3793 = vmatmul.msk.f32.gmra.mxu0 %vm480_vm1, %v269_v41  ;;  %v3090_v48 = vadd.f32 %v3089_v50, %v3088_v45  ;;  %v2320_v41 = vsel %vm2038_vm2, %v4423_v2, 0.0  ;;  %v2322_v50 = vsel %vm2038_vm2, %v4439_v7, 0.0  ;;  %v2829_v2 = vmul.f32 %v4455_v12, %v4455_v12  ;;  %v4887_v54 = vpop.f32.mrf.mxu2 }
 0x1a6   : > { %7442 = vst [vmem:[#allocation16_spill] sm:$0xff] %v4887_v54  ;;  %v2321_v45 = vadd.f32 %v2320_v41, %v2319_v42  ;;  %v2324_v7 = vsel %vm2038_vm2, %v4455_v12, 0.0  ;;  %3846 = vmatmul.msk.f32.gmra.mxu1 %vm480_vm1, %v322_v36  ;;  %v2326_v12 = vsel %vm2038_vm2, %v4471_v17, 0.0  ;;  %v2328_v42 = vsel %vm2038_vm2, %v4487_v22, 0.0 }
 0x1a7   : > { %v3092_v46 = vadd.f32 %v3091_v34, %v3090_v48  ;;  %2173 = vst.msk [vmem:[%s4295_s22 + $0x430] sm:$0xff] %vm2038_vm2, %v4887_v54  ;;  %v419_v48 = vld [vmem:[%s4248_s13 + $0x638] sm:$0xff]  ;;  %v3099_v1 = vsel %vm2038_vm2, %v2829_v2, 0.0  ;;  %v2832_v17 = vmul.f32 %v4503_v29, %v4503_v29  ;;  %v2330_v36 = vsel %vm2038_vm2, %v4503_v29, 0.0 }
 0x1a8   : > { %v2323_v57 = vadd.f32 %v2322_v50, %v2321_v45  ;;  %3895 = vmatmul.msk.f32.gmra.mxu2 %vm480_vm1, %v371_v21  ;;  %v271_v2 = vld [vmem:[%s4248_s13 + $0x198] sm:$0xff]  ;;  %v2332_v21 = vsel %vm2038_vm2, %v4519_v37, 0.0  ;;  %v2834_v29 = vmul.f32 %v4535_v44, %v4535_v44 }
 0x1a9   : > { %v3094_v53 = vadd.f32 %v3093_v39, %v3092_v46  ;;  %v2831_v39 = vmul.f32 %v4487_v22, %v4487_v22  ;;  %v3101_v46 = vsel %vm2038_vm2, %v2830_v27, 0.0  ;;  %v2833_v22 = vmul.f32 %v4519_v37, %v4519_v37 }
 0x1aa   : > { %v4874_v51 = vpop.f32.mrf.mxu0  ;;  %3943 = vmatmul.msk.f32.gmra.mxu3 %vm480_vm1, %v419_v48  ;;  %v2325_v61 = vadd.f32 %v2324_v7, %v2323_v57  ;;  %v3105_v57 = vsel %vm2038_vm2, %v2832_v17, 0.0  ;;  %v372_v48 = vld [vmem:[%s4248_s13 + $0x4c0] sm:$0xff]  ;;  %v2334_v37 = vsel %vm2038_vm2, %v4535_v44, 0.0  ;;  %v3109_v17 = vsel %vm2038_vm2, %v2834_v29, 0.0 }
 0x1ab   : > { %2073 = vst.msk [vmem:[%s4295_s22 + $0x110] sm:$0xff] %vm2038_vm2, %v4874_v51  ;;  %v3096_v34 = vadd.f32 %v3095_v24, %v3094_v53  ;;  %v4920_v53 = vpop.f32.mrf.mxu1  ;;  %v3103_v45 = vsel %vm2038_vm2, %v2831_v39, 0.0  ;;  %v2836_v44 = vmul.f32 %v4567_v59, %v4567_v59  ;;  %v324_v29 = vld [vmem:[%s4248_s13 + $0x340] sm:$0xff] }
 0x1ac   : > { %v2327_v24 = vadd.f32 %v2326_v12, %v2325_v61  ;;  %2126 = vst.msk [vmem:[%s4295_s22 + $0x2b8] sm:$0xff] %vm2038_vm2, %v4920_v53  ;;  %v2835_v61 = vmul.f32 %v4551_v52, %v4551_v52 }
 0x1ad   : > { %3794 = vmatmul.msk.f32.gmra.mxu0 %vm480_vm1, %v270_v33  ;;  %v3098_v41 = vadd.f32 %v3097_v56, %v3096_v34  ;;  %v4930_v56 = vpop.f32.mrf.mxu2  ;;  %v323_v34 = vld [vmem:[%s4248_s13 + $0x338] sm:$0xff] }
 0x1ae   : > { %7443 = vst [vmem:[#allocation17_spill] sm:$0xff] %v4930_v56  ;;  %v2329_v27 = vadd.f32 %v2328_v42, %v2327_v24  ;;  %3847 = vmatmul.msk.f32.gmra.mxu1 %vm480_vm1, %v323_v34 }
 0x1af   : > { %v3100_v33 = vadd.f32 %v3099_v1, %v3098_v41  ;;  %2174 = vst.msk [vmem:[%s4295_s22 + $0x438] sm:$0xff] %vm2038_vm2, %v4930_v56  ;;  %v420_v1 = vld [vmem:[%s4248_s13 + $0x640] sm:$0xff]  ;;  %v3107_v41 = vsel %vm2038_vm2, %v2833_v22, 0.0 }
 0x1b0   : > { %v2331_v39 = vadd.f32 %v2330_v36, %v2329_v27  ;;  %3896 = vmatmul.msk.f32.gmra.mxu2 %vm480_vm1, %v372_v48  ;;  %v272_v36 = vld [vmem:[%s4248_s13 + $0x1a0] sm:$0xff]  ;;  %v2338_v27 = vsel %vm2038_vm2, %v4567_v59, 0.0  ;;  %v3113_v48 = vsel %vm2038_vm2, %v2836_v44, 0.0  ;;  %v2340_v59 = vsel %vm2038_vm2, %v4583_v3, 0.0 }
 0x1b1   : > { %v3102_v7 = vadd.f32 %v3101_v46, %v3100_v33  ;;  %v2336_v33 = vsel %vm2038_vm2, %v4551_v52, 0.0  ;;  %v2837_v52 = vmul.f32 %v4583_v3, %v4583_v3  ;;  %v2342_v3 = vsel %vm2038_vm2, %v4599_v11, 0.0 }
 0x1b2   : > { %v4917_v50 = vpop.f32.mrf.mxu0  ;;  %3944 = vmatmul.msk.f32.gmra.mxu3 %vm480_vm1, %v420_v1  ;;  %v2333_v42 = vadd.f32 %v2332_v21, %v2331_v39  ;;  %v2838_v1 = vmul.f32 %v4599_v11, %v4599_v11  ;;  %v2344_v44 = vsel %vm2038_vm2, %v4615_v20, 0.0  ;;  %v2840_v11 = vmul.f32 %v4631_v31, %v4631_v31 }
 0x1b3   : > { %2074 = vst.msk [vmem:[%s4295_s22 + $0x118] sm:$0xff] %vm2038_vm2, %v4917_v50  ;;  %v3104_v12 = vadd.f32 %v3103_v45, %v3102_v7  ;;  %v4963_v22 = vpop.f32.mrf.mxu1  ;;  %v3111_v7 = vsel %vm2038_vm2, %v2835_v61, 0.0  ;;  %v3115_v61 = vsel %vm2038_vm2, %v2837_v52, 0.0 }
 0x1b4   : > { %2127 = vst.msk [vmem:[%s4295_s22 + $0x2c0] sm:$0xff] %vm2038_vm2, %v4963_v22 }
 0x1b5   : > { %3795 = vmatmul.msk.f32.gmra.mxu0 %vm480_vm1, %v271_v2  ;;  %v3106_v46 = vadd.f32 %v3105_v57, %v3104_v12  ;;  %v2335_v2 = vadd.f32 %v2334_v37, %v2333_v42  ;;  %v4973_v34 = vpop.f32.mrf.mxu2  ;;  %v421_v37 = vld [vmem:[%s4248_s13 + $0x648] sm:$0xff] }
 0x1b6   : > { %7444 = vst [vmem:[#allocation18_spill] sm:$0xff] %v4973_v34  ;;  %3848 = vmatmul.msk.f32.gmra.mxu1 %vm480_vm1, %v324_v29 }
 0x1b7   : > { %v3108_v24 = vadd.f32 %v3107_v41, %v3106_v46  ;;  %v2337_v21 = vadd.f32 %v2336_v33, %v2335_v2  ;;  %2175 = vst.msk [vmem:[%s4295_s22 + $0x440] sm:$0xff] %vm2038_vm2, %v4973_v34  ;;  %v373_v41 = vld [vmem:[%s4248_s13 + $0x4c8] sm:$0xff]  ;;  %v2839_v46 = vmul.f32 %v4615_v20, %v4615_v20  ;;  %v3117_v33 = vsel %vm2038_vm2, %v2838_v1, 0.0 }
 0x1b8   : > { %3897 = vmatmul.msk.f32.gmra.mxu2 %vm480_vm1, %v373_v41  ;;  %v2841_v20 = vmul.f32 %v4647_v43, %v4647_v43  ;;  %v3121_v1 = vsel %vm2038_vm2, %v2840_v11, 0.0 }
 0x1b9   : > { %v3110_v57 = vadd.f32 %v3109_v17, %v3108_v24  ;;  %v2339_v39 = vadd.f32 %v2338_v27, %v2337_v21  ;;  %v3119_v52 = vsel %vm2038_vm2, %v2839_v46, 0.0  ;;  %v2843_v46 = vmul.f32 %v4688_v13, %v4688_v13 }
 0x1ba   : > { %v4960_v45 = vpop.f32.mrf.mxu0  ;;  %3945 = vmatmul.msk.f32.gmra.mxu3 %vm480_vm1, %v421_v37  ;;  %v374_v37 = vld [vmem:[%s4248_s13 + $0x4d0] sm:$0xff] }
 0x1bb   : > { %2075 = vst.msk [vmem:[%s4295_s22 + $0x120] sm:$0xff] %vm2038_vm2, %v4960_v45  ;;  %v3112_v12 = vadd.f32 %v3111_v7, %v3110_v57  ;;  %v2341_v17 = vadd.f32 %v2340_v59, %v2339_v39  ;;  %v273_v7 = vld [vmem:[%s4248_s13 + $0x1a8] sm:$0xff]  ;;  %v5006_v27 = vpop.f32.mrf.mxu1  ;;  %v2346_v57 = vsel %vm2038_vm2, %v4631_v31, 0.0  ;;  %v2348_v31 = vsel %vm2038_vm2, %v4647_v43, 0.0 }
 0x1bc   : > { %2128 = vst.msk [vmem:[%s4295_s22 + $0x2c8] sm:$0xff] %vm2038_vm2, %v5006_v27  ;;  %v325_v59 = vld [vmem:[%s4248_s13 + $0x348] sm:$0xff]  ;;  %v2350_v43 = vsel %vm2038_vm2, %v4665_v58, 0.0 }
 0x1bd   : > { %3796 = vmatmul.msk.f32.gmra.mxu0 %vm480_vm1, %v272_v36  ;;  %v3114_v42 = vadd.f32 %v3113_v48, %v3112_v12  ;;  %v2343_v2 = vadd.f32 %v2342_v3, %v2341_v17  ;;  %v5016_v21 = vpop.f32.mrf.mxu2  ;;  %v2842_v12 = vmul.f32 %v4665_v58, %v4665_v58  ;;  %v3123_v3 = vsel %vm2038_vm2, %v2841_v20, 0.0 }
 0x1be   : > { %7445 = vst [vmem:[#allocation19_spill] sm:$0xff] %v5016_v21  ;;  %3849 = vmatmul.msk.f32.gmra.mxu1 %vm480_vm1, %v325_v59  ;;  %v2844_v58 = vmul.f32 %v4711_v38, %v4711_v38  ;;  %v2354_v20 = vsel %vm2038_vm2, %v4711_v38, 0.0  ;;  %v2356_v38 = vsel %vm2038_vm2, %v4742_v26, 0.0 }
 0x1bf   : > { %v3116_v24 = vadd.f32 %v3115_v61, %v3114_v42  ;;  %v2345_v48 = vadd.f32 %v2344_v44, %v2343_v2  ;;  %2176 = vst.msk [vmem:[%s4295_s22 + $0x448] sm:$0xff] %vm2038_vm2, %v5016_v21  ;;  %v422_v61 = vld [vmem:[%s4248_s13 + $0x650] sm:$0xff]  ;;  %v2352_v44 = vsel %vm2038_vm2, %v4688_v13, 0.0  ;;  %v2845_v13 = vmul.f32 %v4742_v26, %v4742_v26 }
 0x1c0   : > { %3898 = vmatmul.msk.f32.gmra.mxu2 %vm480_vm1, %v374_v37  ;;  %v375_v37 = vld [vmem:[%s4248_s13 + $0x4d8] sm:$0xff]  ;;  %v2358_v26 = vsel %vm2038_vm2, %v4788_v5, 0.0 }
 0x1c1   : > { %v3118_v29 = vadd.f32 %v3117_v33, %v3116_v24  ;;  %v2347_v41 = vadd.f32 %v2346_v57, %v2345_v48  ;;  %v3125_v33 = vsel %vm2038_vm2, %v2842_v12, 0.0  ;;  %v3127_v57 = vsel %vm2038_vm2, %v2843_v46, 0.0 }
 0x1c2   : > { %v5003_v36 = vpop.f32.mrf.mxu0  ;;  %3946 = vmatmul.msk.f32.gmra.mxu3 %vm480_vm1, %v422_v61  ;;  %v2846_v12 = vmul.f32 %v4788_v5, %v4788_v5  ;;  %v423_v61 = vld [vmem:[%s4248_s13 + $0x658] sm:$0xff]  ;;  %v2848_v5 = vmul.f32 %v4874_v51, %v4874_v51 }
 0x1c3   : > { %2076 = vst.msk [vmem:[%s4295_s22 + $0x128] sm:$0xff] %vm2038_vm2, %v5003_v36  ;;  %v3120_v39 = vadd.f32 %v3119_v52, %v3118_v29  ;;  %v2349_v17 = vadd.f32 %v2348_v31, %v2347_v41  ;;  %v5049_v52 = vpop.f32.mrf.mxu1  ;;  %v3129_v31 = vsel %vm2038_vm2, %v2844_v58, 0.0 }
 0x1c4   : > { %2129 = vst.msk [vmem:[%s4295_s22 + $0x2d0] sm:$0xff] %vm2038_vm2, %v5049_v52 }
 0x1c5   : > { %3797 = vmatmul.msk.f32.gmra.mxu0 %vm480_vm1, %v273_v7  ;;  %v3122_v42 = vadd.f32 %v3121_v1, %v3120_v39  ;;  %v2351_v24 = vadd.f32 %v2350_v43, %v2349_v17  ;;  %v274_v7 = vld [vmem:[%s4248_s13 + $0x1b0] sm:$0xff]  ;;  %v5059_v29 = vpop.f32.mrf.mxu2  ;;  %v2847_v43 = vmul.f32 %v4831_v10, %v4831_v10  ;;  %v3133_v17 = vsel %vm2038_vm2, %v2846_v12, 0.0 }
 0x1c6   : > { %7446 = vst [vmem:[#allocation20_spill] sm:$0xff] %v5059_v29  ;;  %v326_v1 = vld [vmem:[%s4248_s13 + $0x350] sm:$0xff] }
 0x1c7   : > { %v3124_v11 = vadd.f32 %v3123_v3, %v3122_v42  ;;  %v2353_v59 = vadd.f32 %v2352_v44, %v2351_v24  ;;  %2177 = vst.msk [vmem:[%s4295_s22 + $0x450] sm:$0xff] %vm2038_vm2, %v5059_v29  ;;  %3850 = vmatmul.msk.f32.gmra.mxu1 %vm480_vm1, %v326_v1  ;;  %v3131_v3 = vsel %vm2038_vm2, %v2845_v13, 0.0  ;;  %v275_v24 = vld [vmem:[%s4248_s13 + $0x1b8] sm:$0xff]  ;;  %v2849_v13 = vmul.f32 %v4917_v50, %v4917_v50 }
 0x1c8   : > { %3899 = vmatmul.msk.f32.gmra.mxu2 %vm480_vm1, %v375_v37  ;;  %v327_v1 = vld [vmem:[%s4248_s13 + $0x358] sm:$0xff]  ;;  %v424_v37 = vld [vmem:[%s4248_s13 + $0x660] sm:$0xff] }
 0x1c9   : > { %v3126_v48 = vadd.f32 %v3125_v33, %v3124_v11  ;;  %v2355_v41 = vadd.f32 %v2354_v20, %v2353_v59  ;;  %v2360_v33 = vsel %vm2038_vm2, %v4831_v10, 0.0  ;;  %v2362_v20 = vsel %vm2038_vm2, %v4874_v51, 0.0 }
 0x1ca   : > { %v5046_v2 = vpop.f32.mrf.mxu0  ;;  %3947 = vmatmul.msk.f32.gmra.mxu3 %vm480_vm1, %v423_v61  ;;  %v2364_v51 = vsel %vm2038_vm2, %v4917_v50, 0.0  ;;  %v3139_v61 = vsel %vm2038_vm2, %v2849_v13, 0.0  ;;  %v2366_v50 = vsel %vm2038_vm2, %v4960_v45, 0.0 }
 0x1cb   : > { %2077 = vst.msk [vmem:[%s4295_s22 + $0x130] sm:$0xff] %vm2038_vm2, %v5046_v2  ;;  %v3128_v39 = vadd.f32 %v3127_v57, %v3126_v48  ;;  %v2357_v42 = vadd.f32 %v2356_v38, %v2355_v41  ;;  %v3135_v57 = vsel %vm2038_vm2, %v2847_v43, 0.0  ;;  %v2850_v38 = vmul.f32 %v4960_v45, %v4960_v45  ;;  %v376_v41 = vld [vmem:[%s4248_s13 + $0x4e0] sm:$0xff] }
 0x1cc   : > { %v2852_v45 = vmul.f32 %v5046_v2, %v5046_v2 }
 0x1cd   : > { %3798 = vmatmul.msk.f32.gmra.mxu0 %vm480_vm1, %v274_v7  ;;  %v3130_v46 = vadd.f32 %v3129_v31, %v3128_v39  ;;  %v2359_v58 = vadd.f32 %v2358_v26, %v2357_v42  ;;  %v5090_v7 = vpop.f32.mrf.mxu1  ;;  %v5099_v10 = vpop.f32.mrf.mxu2  ;;  %v3137_v31 = vsel %vm2038_vm2, %v2848_v5, 0.0  ;;  %v2368_v42 = vsel %vm2038_vm2, %v5003_v36, 0.0 }
 0x1ce   : > { %7447 = vst [vmem:[#allocation21_spill] sm:$0xff] %v5099_v10 }
 0x1cf   : > { %v3132_v44 = vadd.f32 %v3131_v3, %v3130_v46  ;;  %v2361_v59 = vadd.f32 %v2360_v33, %v2359_v58  ;;  %2130 = vst.msk [vmem:[%s4295_s22 + $0x2d8] sm:$0xff] %vm2038_vm2, %v5090_v7  ;;  %3851 = vmatmul.msk.f32.gmra.mxu1 %vm480_vm1, %v327_v1  ;;  %v2851_v3 = vmul.f32 %v5003_v36, %v5003_v36  ;;  %v3141_v46 = vsel %vm2038_vm2, %v2850_v38, 0.0 }
 0x1d0   : > { %2178 = vst.msk [vmem:[%s4295_s22 + $0x458] sm:$0xff] %vm2038_vm2, %v5099_v10  ;;  %3900 = vmatmul.msk.f32.gmra.mxu2 %vm480_vm1, %v376_v41  ;;  %v3145_v1 = vsel %vm2038_vm2, %v2852_v45, 0.0 }
 0x1d1   : > { %v3134_v48 = vadd.f32 %v3133_v17, %v3132_v44  ;;  %v2363_v39 = vadd.f32 %v2362_v20, %v2361_v59  ;;  %v276_v44 = vld [vmem:[%s4248_s13 + $0x1c0] sm:$0xff] }
 0x1d2   : > { %v1387_v11 = vpop.f32.mrf.mxu0  ;;  %3948 = vmatmul.msk.f32.gmra.mxu3 %vm480_vm1, %v424_v37  ;;  %v328_v59 = vld [vmem:[%s4248_s13 + $0x360] sm:$0xff] }
 0x1d3   : > { %2078 = vst.msk [vmem:[%s4295_s22 + $0x138] sm:$0xff] %vm2038_vm2, %v1387_v11  ;;  %v3136_v12 = vadd.f32 %v3135_v57, %v3134_v48  ;;  %v2365_v43 = vadd.f32 %v2364_v51, %v2363_v39  ;;  %v2370_v57 = vsel %vm2038_vm2, %v5046_v2, 0.0  ;;  %v2853_v20 = vmul.f32 %v1387_v11, %v1387_v11  ;;  %v425_v39 = vld [vmem:[%s4248_s13 + $0x668] sm:$0xff] }
 0x1d5   : > { %3799 = vmatmul.msk.f32.gmra.mxu0 %vm480_vm1, %v275_v24  ;;  %v3138_v26 = vadd.f32 %v3137_v31, %v3136_v12  ;;  %v2367_v33 = vadd.f32 %v2366_v50, %v2365_v43  ;;  %v5130_v58 = vpop.f32.mrf.mxu1  ;;  %v3143_v24 = vsel %vm2038_vm2, %v2851_v3, 0.0  ;;  %v5137_v36 = vpop.f32.mrf.mxu2  ;;  %v2372_v31 = vsel %vm2038_vm2, %v1387_v11, 0.0  ;;  %v377_v12 = vld [vmem:[%s4248_s13 + $0x4e8] sm:$0xff] }
 0x1d6   : > { %7448 = vst [vmem:[#allocation22_spill] sm:$0xff] %v5137_v36  ;;  %v3147_v41 = vsel %vm2038_vm2, %v2853_v20, 0.0 }
 0x1d7   : > { %v3140_v17 = vadd.f32 %v3139_v61, %v3138_v26  ;;  %v2369_v48 = vadd.f32 %v2368_v42, %v2367_v33  ;;  %2131 = vst.msk [vmem:[%s4295_s22 + $0x2e0] sm:$0xff] %vm2038_vm2, %v5130_v58  ;;  %3852 = vmatmul.msk.f32.gmra.mxu1 %vm480_vm1, %v328_v59 }
 0x1d8   : > { %2179 = vst.msk [vmem:[%s4295_s22 + $0x460] sm:$0xff] %vm2038_vm2, %v5137_v36  ;;  %3901 = vmatmul.msk.f32.gmra.mxu2 %vm480_vm1, %v377_v12 }
 0x1d9   : > { %v3142_v13 = vadd.f32 %v3141_v46, %v3140_v17  ;;  %v2371_v38 = vadd.f32 %v2370_v57, %v2369_v48  ;;  %v277_v46 = vld [vmem:[%s4248_s13 + $0x1c8] sm:$0xff]  ;;  %v426_v48 = vld [vmem:[%s4248_s13 + $0x670] sm:$0xff] }
 0x1da   : > { %v1390_v5 = vpop.f32.mrf.mxu0  ;;  %3949 = vmatmul.msk.f32.gmra.mxu3 %vm480_vm1, %v425_v39  ;;  %v330_v39 = vld [vmem:[%s4248_s13 + $0x370] sm:$0xff] }
 0x1db   : > { %2079 = vst.msk [vmem:[%s4295_s22 + $0x140] sm:$0xff] %vm2038_vm2, %v1390_v5  ;;  %v2854_v51 = vmul.f32 %v1390_v5, %v1390_v5  ;;  %v3144_v2 = vadd.f32 %v3143_v24, %v3142_v13  ;;  %v2374_v37 = vsel %vm2038_vm2, %v1390_v5, 0.0  ;;  %v2373_v61 = vadd.f32 %v2372_v31, %v2371_v38  ;;  %v329_v24 = vld [vmem:[%s4248_s13 + $0x368] sm:$0xff]  ;;  %v378_v13 = vld [vmem:[%s4248_s13 + $0x4f0] sm:$0xff] }
 0x1dd   : > { %3800 = vmatmul.msk.f32.gmra.mxu0 %vm480_vm1, %v276_v44  ;;  %v3146_v11 = vadd.f32 %v3145_v1, %v3144_v2  ;;  %v3149_v50 = vsel %vm2038_vm2, %v2854_v51, 0.0  ;;  %v2375_v3 = vadd.f32 %v2374_v37, %v2373_v61  ;;  %v5158_v42 = vpop.f32.mrf.mxu1  ;;  %v5163_v33 = vpop.f32.mrf.mxu2  ;;  %v278_v1 = vld [vmem:[%s4248_s13 + $0x1d0] sm:$0xff]  ;;  %v427_v61 = vld [vmem:[%s4248_s13 + $0x678] sm:$0xff] }
 0x1de   : > { %7449 = vst [vmem:[#allocation23_spill] sm:$0xff] %v5163_v33 }
 0x1df   : > { %v3148_v26 = vadd.f32 %v3147_v41, %v3146_v11  ;;  %2132 = vst.msk [vmem:[%s4295_s22 + $0x2e8] sm:$0xff] %vm2038_vm2, %v5158_v42  ;;  %3853 = vmatmul.msk.f32.gmra.mxu1 %vm480_vm1, %v329_v24  ;;  %v379_v11 = vld [vmem:[%s4248_s13 + $0x4f8] sm:$0xff] }
 0x1e0   : > { %2180 = vst.msk [vmem:[%s4295_s22 + $0x468] sm:$0xff] %vm2038_vm2, %v5163_v33  ;;  %3902 = vmatmul.msk.f32.gmra.mxu2 %vm480_vm1, %v378_v13 }
 0x1e1   : > { %v3150_v5 = vadd.f32 %v3149_v50, %v3148_v26 }
 0x1e2   : > { %v1393_v43 = vpop.f32.mrf.mxu0  ;;  %3950 = vmatmul.msk.f32.gmra.mxu3 %vm480_vm1, %v426_v48  ;;  %v280_v48 = vld [vmem:[%s4248_s13 + $0x1e0] sm:$0xff] }
 0x1e3   : > { %2080 = vst.msk [vmem:[%s4295_s22 + $0x148] sm:$0xff] %vm2038_vm2, %v1393_v43  ;;  %v2376_v45 = vsel %vm2038_vm2, %v1393_v43, 0.0  ;;  %v2855_v17 = vmul.f32 %v1393_v43, %v1393_v43 }
 0x1e4   : > { %v2377_v44 = vadd.f32 %v2376_v45, %v2375_v3  ;;  %v279_v3 = vld [vmem:[%s4248_s13 + $0x1d8] sm:$0xff] }
 0x1e5   : > { %v3151_v57 = vsel %vm2038_vm2, %v2855_v17, 0.0  ;;  %3801 = vmatmul.msk.f32.gmra.mxu0 %vm480_vm1, %v277_v46  ;;  %v5180_v31 = vpop.f32.mrf.mxu1  ;;  %v5185_v38 = vpop.f32.mrf.mxu2 }
 0x1e6   : > { %v3152_v20 = vadd.f32 %v3151_v57, %v3150_v5  ;;  %7450 = vst [vmem:[#allocation24_spill] sm:$0xff] %v5185_v38  ;;  %v331_v5 = vld [vmem:[%s4248_s13 + $0x378] sm:$0xff]  ;;  %v380_v57 = vld [vmem:[%s4248_s13 + $0x500] sm:$0xff] }
 0x1e7   : > { %2133 = vst.msk [vmem:[%s4295_s22 + $0x2f0] sm:$0xff] %vm2038_vm2, %v5180_v31  ;;  %3854 = vmatmul.msk.f32.gmra.mxu1 %vm480_vm1, %v330_v39 }
 0x1e8   : > { %2181 = vst.msk [vmem:[%s4295_s22 + $0x470] sm:$0xff] %vm2038_vm2, %v5185_v38  ;;  %3903 = vmatmul.msk.f32.gmra.mxu2 %vm480_vm1, %v379_v11 }
 0x1ea   : > { %v1396_v59 = vpop.f32.mrf.mxu0  ;;  %3951 = vmatmul.msk.f32.gmra.mxu3 %vm480_vm1, %v427_v61  ;;  %v381_v61 = vld [vmem:[%s4248_s13 + $0x508] sm:$0xff] }
 0x1eb   : > { %2081 = vst.msk [vmem:[%s4295_s22 + $0x150] sm:$0xff] %vm2038_vm2, %v1396_v59  ;;  %v2378_v51 = vsel %vm2038_vm2, %v1396_v59, 0.0  ;;  %v2856_v2 = vmul.f32 %v1396_v59, %v1396_v59 }
 0x1ec   : > { %v2379_v12 = vadd.f32 %v2378_v51, %v2377_v44 }
 0x1ed   : > { %v3153_v41 = vsel %vm2038_vm2, %v2856_v2, 0.0  ;;  %3802 = vmatmul.msk.f32.gmra.mxu0 %vm480_vm1, %v278_v1  ;;  %v5202_v26 = vpop.f32.mrf.mxu1  ;;  %v5207_v45 = vpop.f32.mrf.mxu2 }
 0x1ee   : > { %v3154_v37 = vadd.f32 %v3153_v41, %v3152_v20  ;;  %7451 = vst [vmem:[#allocation25_spill] sm:$0xff] %v5207_v45  ;;  %v428_v20 = vld [vmem:[%s4248_s13 + $0x680] sm:$0xff] }
 0x1ef   : > { %2134 = vst.msk [vmem:[%s4295_s22 + $0x2f8] sm:$0xff] %vm2038_vm2, %v5202_v26  ;;  %3855 = vmatmul.msk.f32.gmra.mxu1 %vm480_vm1, %v331_v5  ;;  %v332_v41 = vld [vmem:[%s4248_s13 + $0x380] sm:$0xff] }
 0x1f0   : > { %2182 = vst.msk [vmem:[%s4295_s22 + $0x478] sm:$0xff] %vm2038_vm2, %v5207_v45  ;;  %3904 = vmatmul.msk.f32.gmra.mxu2 %vm480_vm1, %v380_v57 }
 0x1f2   : > { %v1399_v50 = vpop.f32.mrf.mxu0  ;;  %3952 = vmatmul.msk.f32.gmra.mxu3 %vm480_vm1, %v428_v20  ;;  %v333_v20 = vld [vmem:[%s4248_s13 + $0x388] sm:$0xff] }
 0x1f3   : > { %2082 = vst.msk [vmem:[%s4295_s22 + $0x158] sm:$0xff] %vm2038_vm2, %v1399_v50  ;;  %v2380_v43 = vsel %vm2038_vm2, %v1399_v50, 0.0  ;;  %v2857_v46 = vmul.f32 %v1399_v50, %v1399_v50  ;;  %v429_v50 = vld [vmem:[%s4248_s13 + $0x688] sm:$0xff] }
 0x1f4   : > { %v2381_v17 = vadd.f32 %v2380_v43, %v2379_v12  ;;  %v5231_v12 = vpop.f32.mrf.mxu3  ;;  %v281_v43 = vld [vmem:[%s4248_s13 + $0x1e8] sm:$0xff] }
 0x1f5   : > { %v3155_v44 = vsel %vm2038_vm2, %v2857_v46, 0.0  ;;  %3803 = vmatmul.msk.f32.gmra.mxu0 %vm480_vm1, %v279_v3  ;;  %v5224_v59 = vpop.f32.mrf.mxu1  ;;  %v5229_v2 = vpop.f32.mrf.mxu2  ;;  %7453 = vst [vmem:[#allocation27_spill] sm:$0xff] %v5231_v12 }
 0x1f6   : > { %v3156_v24 = vadd.f32 %v3155_v44, %v3154_v37  ;;  %7452 = vst [vmem:[#allocation26_spill] sm:$0xff] %v5229_v2 }
 0x1f7   : > { %2135 = vst.msk [vmem:[%s4295_s22 + $0x300] sm:$0xff] %vm2038_vm2, %v5224_v59  ;;  %3856 = vmatmul.msk.f32.gmra.mxu1 %vm480_vm1, %v332_v41  ;;  %v282_v41 = vld [vmem:[%s4248_s13 + $0x1f0] sm:$0xff] }
 0x1f8   : > { %2183 = vst.msk [vmem:[%s4295_s22 + $0x480] sm:$0xff] %vm2038_vm2, %v5229_v2  ;;  %3905 = vmatmul.msk.f32.gmra.mxu2 %vm480_vm1, %v381_v61 }
 0x1f9   : > { %2231 = vst.msk [vmem:[%s4295_s22 + $0x600] sm:$0xff] %vm2038_vm2, %v5231_v12  ;;  %v386_v12 = vld [vmem:[%s4248_s13 + $0x530] sm:$0xff] }
 0x1fa   : > { %v1402_v13 = vpop.f32.mrf.mxu0  ;;  %3953 = vmatmul.msk.f32.gmra.mxu3 %vm480_vm1, %v429_v50 }
 0x1fb   : > { %2083 = vst.msk [vmem:[%s4295_s22 + $0x160] sm:$0xff] %vm2038_vm2, %v1402_v13  ;;  %v2382_v1 = vsel %vm2038_vm2, %v1402_v13, 0.0  ;;  %v2858_v51 = vmul.f32 %v1402_v13, %v1402_v13 }
 0x1fc   : > { %v2383_v39 = vadd.f32 %v2382_v1, %v2381_v17  ;;  %v382_v1 = vld [vmem:[%s4248_s13 + $0x510] sm:$0xff] }
 0x1fd   : > { %v3157_v37 = vsel %vm2038_vm2, %v2858_v51, 0.0  ;;  %3804 = vmatmul.msk.f32.gmra.mxu0 %vm480_vm1, %v280_v48  ;;  %v5251_v46 = vpop.f32.mrf.mxu1  ;;  %v5256_v44 = vpop.f32.mrf.mxu2  ;;  %v430_v51 = vld [vmem:[%s4248_s13 + $0x690] sm:$0xff] }
 0x1fe   : > { %v3158_v11 = vadd.f32 %v3157_v37, %v3156_v24  ;;  %7454 = vst [vmem:[#allocation28_spill] sm:$0xff] %v5256_v44  ;;  %v5258_v24 = vpop.f32.mrf.mxu3 }
 0x1ff   : > { %7455 = vst [vmem:[#allocation29_spill] sm:$0xff] %v5258_v24  ;;  %3857 = vmatmul.msk.f32.gmra.mxu1 %vm480_vm1, %v333_v20 }
 0x200   : > { %2136 = vst.msk [vmem:[%s4295_s22 + $0x308] sm:$0xff] %vm2038_vm2, %v5251_v46  ;;  %3906 = vmatmul.msk.f32.gmra.mxu2 %vm480_vm1, %v382_v1 }
 0x201   : > { %2184 = vst.msk [vmem:[%s4295_s22 + $0x488] sm:$0xff] %vm2038_vm2, %v5256_v44 }
 0x202   : > { %v1405_v3 = vpop.f32.mrf.mxu0  ;;  %2232 = vst.msk [vmem:[%s4295_s22 + $0x608] sm:$0xff] %vm2038_vm2, %v5258_v24  ;;  %3954 = vmatmul.msk.f32.gmra.mxu3 %vm480_vm1, %v430_v51  ;;  %v283_v51 = vld [vmem:[%s4248_s13 + $0x1f8] sm:$0xff] }
 0x203   : > { %2084 = vst.msk [vmem:[%s4295_s22 + $0x168] sm:$0xff] %vm2038_vm2, %v1405_v3  ;;  %v2384_v17 = vsel %vm2038_vm2, %v1405_v3, 0.0  ;;  %v2859_v5 = vmul.f32 %v1405_v3, %v1405_v3 }
 0x204   : > { %v2385_v57 = vadd.f32 %v2384_v17, %v2383_v39  ;;  %v334_v17 = vld [vmem:[%s4248_s13 + $0x390] sm:$0xff] }
 0x205   : > { %v3159_v13 = vsel %vm2038_vm2, %v2859_v5, 0.0  ;;  %3805 = vmatmul.msk.f32.gmra.mxu0 %vm480_vm1, %v281_v43  ;;  %v5278_v37 = vpop.f32.mrf.mxu1  ;;  %v5283_v50 = vpop.f32.mrf.mxu2 }
 0x206   : > { %v3160_v48 = vadd.f32 %v3159_v13, %v3158_v11  ;;  %7456 = vst [vmem:[#allocation30_spill] sm:$0xff] %v5283_v50  ;;  %v5285_v3 = vpop.f32.mrf.mxu3  ;;  %v431_v13 = vld [vmem:[%s4248_s13 + $0x698] sm:$0xff] }
 0x207   : > { %7457 = vst [vmem:[#allocation31_spill] sm:$0xff] %v5285_v3  ;;  %3858 = vmatmul.msk.f32.gmra.mxu1 %vm480_vm1, %v334_v17 }
 0x208   : > { %2137 = vst.msk [vmem:[%s4295_s22 + $0x310] sm:$0xff] %vm2038_vm2, %v5278_v37 }
 0x209   : > { %2185 = vst.msk [vmem:[%s4295_s22 + $0x490] sm:$0xff] %vm2038_vm2, %v5283_v50 }
 0x20a   : > { %v1408_v39 = vpop.f32.mrf.mxu0  ;;  %2233 = vst.msk [vmem:[%s4295_s22 + $0x610] sm:$0xff] %vm2038_vm2, %v5285_v3  ;;  %3955 = vmatmul.msk.f32.gmra.mxu3 %vm480_vm1, %v431_v13  ;;  %v385_v3 = vld [vmem:[%s4248_s13 + $0x528] sm:$0xff] }
 0x20b   : > { %2085 = vst.msk [vmem:[%s4295_s22 + $0x170] sm:$0xff] %vm2038_vm2, %v1408_v39  ;;  %v2386_v11 = vsel %vm2038_vm2, %v1408_v39, 0.0  ;;  %v2860_v61 = vmul.f32 %v1408_v39, %v1408_v39 }
 0x20c   : > { %v2387_v43 = vadd.f32 %v2386_v11, %v2385_v57  ;;  %v383_v57 = vld [vmem:[%s4248_s13 + $0x518] sm:$0xff] }
 0x20d   : > { %v3161_v5 = vsel %vm2038_vm2, %v2860_v61, 0.0  ;;  %3806 = vmatmul.msk.f32.gmra.mxu0 %vm480_vm1, %v282_v41  ;;  %3907 = vmatmul.msk.f32.gmra.mxu2 %vm480_vm1, %v383_v57  ;;  %v5305_v39 = vpop.f32.mrf.mxu1  ;;  %v5310_v11 = vpop.f32.mrf.mxu2 }
 0x20e   : > { %v3162_v20 = vadd.f32 %v3161_v5, %v3160_v48  ;;  %7458 = vst [vmem:[#allocation32_spill] sm:$0xff] %v5310_v11  ;;  %v5312_v61 = vpop.f32.mrf.mxu3  ;;  %v335_v5 = vld [vmem:[%s4248_s13 + $0x398] sm:$0xff] }
 0x20f   : > { %7459 = vst [vmem:[#allocation33_spill] sm:$0xff] %v5312_v61  ;;  %3859 = vmatmul.msk.f32.gmra.mxu1 %vm480_vm1, %v335_v5 }
 0x210   : > { %2138 = vst.msk [vmem:[%s4295_s22 + $0x318] sm:$0xff] %vm2038_vm2, %v5305_v39 }
 0x211   : > { %2186 = vst.msk [vmem:[%s4295_s22 + $0x498] sm:$0xff] %vm2038_vm2, %v5310_v11  ;;  %v388_v11 = vld [vmem:[%s4248_s13 + $0x540] sm:$0xff] }
 0x212   : > { %v1411_v1 = vpop.f32.mrf.mxu0  ;;  %2234 = vst.msk [vmem:[%s4295_s22 + $0x618] sm:$0xff] %vm2038_vm2, %v5312_v61 }
 0x213   : > { %2086 = vst.msk [vmem:[%s4295_s22 + $0x178] sm:$0xff] %vm2038_vm2, %v1411_v1  ;;  %v2388_v48 = vsel %vm2038_vm2, %v1411_v1, 0.0  ;;  %v2861_v41 = vmul.f32 %v1411_v1, %v1411_v1  ;;  %v432_v1 = vld [vmem:[%s4248_s13 + $0x6a0] sm:$0xff] }
 0x214   : > { %v2389_v17 = vadd.f32 %v2388_v48, %v2387_v43  ;;  %v384_v43 = vld [vmem:[%s4248_s13 + $0x520] sm:$0xff]  ;;  %3956 = vmatmul.msk.f32.gmra.mxu3 %vm480_vm1, %v432_v1 }
 0x215   : > { %v3163_v57 = vsel %vm2038_vm2, %v2861_v41, 0.0  ;;  %3807 = vmatmul.msk.f32.gmra.mxu0 %vm480_vm1, %v283_v51  ;;  %3908 = vmatmul.msk.f32.gmra.mxu2 %vm480_vm1, %v384_v43  ;;  %v5331_v48 = vpop.f32.mrf.mxu1  ;;  %v5336_v5 = vpop.f32.mrf.mxu2  ;;  %v336_v43 = vld [vmem:[%s4248_s13 + $0x3a0] sm:$0xff] }
 0x216   : > { %v3164_v13 = vadd.f32 %v3163_v57, %v3162_v20  ;;  %7460 = vst [vmem:[#allocation34_spill] sm:$0xff] %v5336_v5  ;;  %v5338_v57 = vpop.f32.mrf.mxu3 }
 0x217   : > { %7461 = vst [vmem:[#allocation35_spill] sm:$0xff] %v5338_v57  ;;  %3860 = vmatmul.msk.f32.gmra.mxu1 %vm480_vm1, %v336_v43 }
 0x218   : > { %2139 = vst.msk [vmem:[%s4295_s22 + $0x320] sm:$0xff] %vm2038_vm2, %v5331_v48 }
 0x219   : > { %2187 = vst.msk [vmem:[%s4295_s22 + $0x4a0] sm:$0xff] %vm2038_vm2, %v5336_v5  ;;  %v387_v5 = vld [vmem:[%s4248_s13 + $0x538] sm:$0xff] }
 0x21a   : > { %v1414_v51 = vpop.f32.mrf.mxu0  ;;  %2235 = vst.msk [vmem:[%s4295_s22 + $0x620] sm:$0xff] %vm2038_vm2, %v5338_v57 }
 0x21b   : > { %2087 = vst.msk [vmem:[%s4295_s22 + $0x180] sm:$0xff] %vm2038_vm2, %v1414_v51  ;;  %v2390_v20 = vsel %vm2038_vm2, %v1414_v51, 0.0  ;;  %v2862_v41 = vmul.f32 %v1414_v51, %v1414_v51 }
 0x21c   : > { %v2391_v61 = vadd.f32 %v2390_v20, %v2389_v17  ;;  %v433_v17 = vld [vmem:[%s4248_s13 + $0x6a8] sm:$0xff] }
 0x21d   : > { %v3165_v1 = vsel %vm2038_vm2, %v2862_v41, 0.0  ;;  %3909 = vmatmul.msk.f32.gmra.mxu2 %vm480_vm1, %v385_v3  ;;  %3957 = vmatmul.msk.f32.gmra.mxu3 %vm480_vm1, %v433_v17  ;;  %v5356_v41 = vpop.f32.mrf.mxu1  ;;  %v337_v3 = vld [vmem:[%s4248_s13 + $0x3a8] sm:$0xff] }
 0x21e   : > { %v3166_v51 = vadd.f32 %v3165_v1, %v3164_v13  ;;  %v5361_v1 = vpop.f32.mrf.mxu2  ;;  %v5363_v57 = vpop.f32.mrf.mxu3  ;;  %2140 = vst.msk [vmem:[%s4295_s22 + $0x328] sm:$0xff] %vm2038_vm2, %v5356_v41 }
 0x21f   : > { %7462 = vst [vmem:[#allocation36_spill] sm:$0xff] %v5361_v1  ;;  %3861 = vmatmul.msk.f32.gmra.mxu1 %vm480_vm1, %v337_v3 }
 0x220   : > { %7463 = vst [vmem:[#allocation37_spill] sm:$0xff] %v5363_v57 }
 0x221   : > { %2188 = vst.msk [vmem:[%s4295_s22 + $0x4a8] sm:$0xff] %vm2038_vm2, %v5361_v1 }
 0x222   : > { %v1417_v20 = vpop.f32.mrf.mxu0  ;;  %2236 = vst.msk [vmem:[%s4295_s22 + $0x628] sm:$0xff] %vm2038_vm2, %v5363_v57 }
 0x223   : > { %2088 = vst.msk [vmem:[%s4295_s22 + $0x188] sm:$0xff] %vm2038_vm2, %v1417_v20  ;;  %v2392_v13 = vsel %vm2038_vm2, %v1417_v20, 0.0  ;;  %v2863_v43 = vmul.f32 %v1417_v20, %v1417_v20 }
 0x224   : > { %v2393_v24 = vadd.f32 %v2392_v13, %v2391_v61  ;;  %v434_v61 = vld [vmem:[%s4248_s13 + $0x6b0] sm:$0xff] }
 0x225   : > { %v3167_v17 = vsel %vm2038_vm2, %v2863_v43, 0.0  ;;  %3910 = vmatmul.msk.f32.gmra.mxu2 %vm480_vm1, %v386_v12  ;;  %3958 = vmatmul.msk.f32.gmra.mxu3 %vm480_vm1, %v434_v61  ;;  %v5381_v43 = vpop.f32.mrf.mxu1  ;;  %v338_v12 = vld [vmem:[%s4248_s13 + $0x3b0] sm:$0xff] }
 0x226   : > { %v3168_v20 = vadd.f32 %v3167_v17, %v3166_v51  ;;  %v5386_v17 = vpop.f32.mrf.mxu2  ;;  %v5388_v57 = vpop.f32.mrf.mxu3  ;;  %2141 = vst.msk [vmem:[%s4295_s22 + $0x330] sm:$0xff] %vm2038_vm2, %v5381_v43 }
 0x227   : > { %7464 = vst [vmem:[#allocation38_spill] sm:$0xff] %v5386_v17  ;;  %3862 = vmatmul.msk.f32.gmra.mxu1 %vm480_vm1, %v338_v12 }
 0x228   : > { %7465 = vst [vmem:[#allocation39_spill] sm:$0xff] %v5388_v57 }
 0x229   : > { %2189 = vst.msk [vmem:[%s4295_s22 + $0x4b0] sm:$0xff] %vm2038_vm2, %v5386_v17 }
 0x22a   : > { %v1420_v13 = vpop.f32.mrf.mxu0  ;;  %2237 = vst.msk [vmem:[%s4295_s22 + $0x630] sm:$0xff] %vm2038_vm2, %v5388_v57 }
 0x22b   : > { %2089 = vst.msk [vmem:[%s4295_s22 + $0x190] sm:$0xff] %vm2038_vm2, %v1420_v13  ;;  %v2394_v51 = vsel %vm2038_vm2, %v1420_v13, 0.0  ;;  %v2864_v3 = vmul.f32 %v1420_v13, %v1420_v13 }
 0x22c   : > { %v2395_v1 = vadd.f32 %v2394_v51, %v2393_v24  ;;  %v435_v24 = vld [vmem:[%s4248_s13 + $0x6b8] sm:$0xff] }
 0x22d   : > { %v3169_v61 = vsel %vm2038_vm2, %v2864_v3, 0.0  ;;  %3911 = vmatmul.msk.f32.gmra.mxu2 %vm480_vm1, %v387_v5  ;;  %3959 = vmatmul.msk.f32.gmra.mxu3 %vm480_vm1, %v435_v24  ;;  %v5406_v3 = vpop.f32.mrf.mxu1  ;;  %v339_v5 = vld [vmem:[%s4248_s13 + $0x3b8] sm:$0xff] }
 0x22e   : > { %v3170_v13 = vadd.f32 %v3169_v61, %v3168_v20  ;;  %v5411_v61 = vpop.f32.mrf.mxu2  ;;  %v5413_v57 = vpop.f32.mrf.mxu3  ;;  %2142 = vst.msk [vmem:[%s4295_s22 + $0x338] sm:$0xff] %vm2038_vm2, %v5406_v3 }
 0x22f   : > { %7466 = vst [vmem:[#allocation40_spill] sm:$0xff] %v5411_v61  ;;  %3863 = vmatmul.msk.f32.gmra.mxu1 %vm480_vm1, %v339_v5 }
 0x230   : > { %7467 = vst [vmem:[#allocation41_spill] sm:$0xff] %v5413_v57 }
 0x231   : > { %2190 = vst.msk [vmem:[%s4295_s22 + $0x4b8] sm:$0xff] %vm2038_vm2, %v5411_v61 }
 0x232   : > { %v1423_v51 = vpop.f32.mrf.mxu0  ;;  %2238 = vst.msk [vmem:[%s4295_s22 + $0x638] sm:$0xff] %vm2038_vm2, %v5413_v57 }
 0x233   : > { %2090 = vst.msk [vmem:[%s4295_s22 + $0x198] sm:$0xff] %vm2038_vm2, %v1423_v51  ;;  %v2396_v20 = vsel %vm2038_vm2, %v1423_v51, 0.0  ;;  %v2865_v12 = vmul.f32 %v1423_v51, %v1423_v51 }
 0x234   : > { %v2397_v17 = vadd.f32 %v2396_v20, %v2395_v1  ;;  %v436_v1 = vld [vmem:[%s4248_s13 + $0x6c0] sm:$0xff] }
 0x235   : > { %v3171_v24 = vsel %vm2038_vm2, %v2865_v12, 0.0  ;;  %3912 = vmatmul.msk.f32.gmra.mxu2 %vm480_vm1, %v388_v11  ;;  %3960 = vmatmul.msk.f32.gmra.mxu3 %vm480_vm1, %v436_v1  ;;  %v5431_v12 = vpop.f32.mrf.mxu1  ;;  %v340_v11 = vld [vmem:[%s4248_s13 + $0x3c0] sm:$0xff] }
 0x236   : > { %v3172_v51 = vadd.f32 %v3171_v24, %v3170_v13  ;;  %v5436_v24 = vpop.f32.mrf.mxu2  ;;  %v5438_v57 = vpop.f32.mrf.mxu3  ;;  %2143 = vst.msk [vmem:[%s4295_s22 + $0x340] sm:$0xff] %vm2038_vm2, %v5431_v12 }
 0x237   : > { %7468 = vst [vmem:[#allocation42_spill] sm:$0xff] %v5436_v24  ;;  %3864 = vmatmul.msk.f32.gmra.mxu1 %vm480_vm1, %v340_v11 }
 0x238   : > { %7469 = vst [vmem:[#allocation43_spill] sm:$0xff] %v5438_v57 }
 0x239   : > { %2191 = vst.msk [vmem:[%s4295_s22 + $0x4c0] sm:$0xff] %vm2038_vm2, %v5436_v24 }
 0x23a   : > { %v1426_v20 = vpop.f32.mrf.mxu0  ;;  %2239 = vst.msk [vmem:[%s4295_s22 + $0x640] sm:$0xff] %vm2038_vm2, %v5438_v57 }
 0x23b   : > { %2091 = vst.msk [vmem:[%s4295_s22 + $0x1a0] sm:$0xff] %vm2038_vm2, %v1426_v20  ;;  %v2398_v13 = vsel %vm2038_vm2, %v1426_v20, 0.0  ;;  %v2866_v5 = vmul.f32 %v1426_v20, %v1426_v20 }
 0x23c   : > { %v5440_v61 = vadd.f32 %v2398_v13, %v2397_v17  ;;  %v389_v17 = vld [vmem:[%s4248_s13 + $0x548] sm:$0xff] }
 0x23d   : > { %v3173_v1 = vsel %vm2038_vm2, %v2866_v5, 0.0  ;;  %v437_v13 = vld [vmem:[%s4248_s13 + $0x6c8] sm:$0xff]  ;;  %3913 = vmatmul.msk.f32.gmra.mxu2 %vm480_vm1, %v389_v17  ;;  %v5462_v24 = vpop.f32.mrf.mxu1  ;;  %v390_v17 = vld [vmem:[%s4248_s13 + $0x550] sm:$0xff] }
 0x23e   : > { %v5451_v20 = vadd.f32 %v3173_v1, %v3172_v51  ;;  %3961 = vmatmul.msk.f32.gmra.mxu3 %vm480_vm1, %v437_v13  ;;  %v5467_v51 = vpop.f32.mrf.mxu2  ;;  %v5469_v11 = vpop.f32.mrf.mxu3  ;;  %2144 = vst.msk [vmem:[%s4295_s22 + $0x348] sm:$0xff] %vm2038_vm2, %v5462_v24  ;;  %v341_v1 = vld [vmem:[%s4248_s13 + $0x3c8] sm:$0xff]  ;;  %v438_v13 = vld [vmem:[%s4248_s13 + $0x6d0] sm:$0xff] }
 0x23f   : > { %7470 = vst [vmem:[#allocation44_spill] sm:$0xff] %v5467_v51  ;;  %3865 = vmatmul.msk.f32.gmra.mxu1 %vm480_vm1, %v341_v1 }
 0x240   : > { %7471 = vst [vmem:[#allocation45_spill] sm:$0xff] %v5469_v11 }
 0x241   : > { %2192 = vst.msk [vmem:[%s4295_s22 + $0x4c8] sm:$0xff] %vm2038_vm2, %v5467_v51 }
 0x242   : > { %v5460_v5 = vpop.f32.mrf.mxu0  ;;  %2240 = vst.msk [vmem:[%s4295_s22 + $0x648] sm:$0xff] %vm2038_vm2, %v5469_v11  ;;  %v439_v11 = vld [vmem:[%s4248_s13 + $0x6d8] sm:$0xff] }
 0x243   : > { %2092 = vst.msk [vmem:[%s4295_s22 + $0x1a8] sm:$0xff] %vm2038_vm2, %v5460_v5 }
 0x245   : > { %3914 = vmatmul.msk.f32.gmra.mxu2 %vm480_vm1, %v390_v17  ;;  %v5488_v50 = vpop.f32.mrf.mxu1  ;;  %v342_v17 = vld [vmem:[%s4248_s13 + $0x3d0] sm:$0xff] }
 0x246   : > { %3962 = vmatmul.msk.f32.gmra.mxu3 %vm480_vm1, %v438_v13  ;;  %v5493_v1 = vpop.f32.mrf.mxu2  ;;  %v5495_v51 = vpop.f32.mrf.mxu3  ;;  %2145 = vst.msk [vmem:[%s4295_s22 + $0x350] sm:$0xff] %vm2038_vm2, %v5488_v50  ;;  %v391_v13 = vld [vmem:[%s4248_s13 + $0x558] sm:$0xff] }
 0x247   : > { %7472 = vst [vmem:[#allocation46_spill] sm:$0xff] %v5493_v1  ;;  %3866 = vmatmul.msk.f32.gmra.mxu1 %vm480_vm1, %v342_v17 }
 0x248   : > { %7473 = vst [vmem:[#allocation47_spill] sm:$0xff] %v5495_v51 }
 0x249   : > { %2193 = vst.msk [vmem:[%s4295_s22 + $0x4d0] sm:$0xff] %vm2038_vm2, %v5493_v1 }
 0x24a   : > { %v5486_v57 = vpop.f32.mrf.mxu0  ;;  %2241 = vst.msk [vmem:[%s4295_s22 + $0x650] sm:$0xff] %vm2038_vm2, %v5495_v51  ;;  %v440_v51 = vld [vmem:[%s4248_s13 + $0x6e0] sm:$0xff] }
 0x24b   : > { %2093 = vst.msk [vmem:[%s4295_s22 + $0x1b0] sm:$0xff] %vm2038_vm2, %v5486_v57 }
 0x24d   : > { %3915 = vmatmul.msk.f32.gmra.mxu2 %vm480_vm1, %v391_v13  ;;  %v5514_v2 = vpop.f32.mrf.mxu1  ;;  %v343_v13 = vld [vmem:[%s4248_s13 + $0x3d8] sm:$0xff] }
 0x24e   : > { %3963 = vmatmul.msk.f32.gmra.mxu3 %vm480_vm1, %v439_v11  ;;  %7474 = vst [vmem:[#allocation48_spill] sm:$0xff] %v5514_v2  ;;  %v5519_v17 = vpop.f32.mrf.mxu2  ;;  %v5521_v1 = vpop.f32.mrf.mxu3  ;;  %v392_v11 = vld [vmem:[%s4248_s13 + $0x560] sm:$0xff] }
 0x24f   : > { %7475 = vst [vmem:[#allocation49_spill] sm:$0xff] %v5519_v17  ;;  %3867 = vmatmul.msk.f32.gmra.mxu1 %vm480_vm1, %v343_v13 }
 0x250   : > { %7476 = vst [vmem:[#allocation50_spill] sm:$0xff] %v5521_v1 }
 0x251   : > { %2146 = vst.msk [vmem:[%s4295_s22 + $0x358] sm:$0xff] %vm2038_vm2, %v5514_v2 }
 0x252   : > { %v5512_v44 = vpop.f32.mrf.mxu0  ;;  %2194 = vst.msk [vmem:[%s4295_s22 + $0x4d8] sm:$0xff] %vm2038_vm2, %v5519_v17 }
 0x253   : > { %2094 = vst.msk [vmem:[%s4295_s22 + $0x1b8] sm:$0xff] %vm2038_vm2, %v5512_v44 }
 0x254   : > { %2242 = vst.msk [vmem:[%s4295_s22 + $0x658] sm:$0xff] %vm2038_vm2, %v5521_v1  ;;  %v441_v1 = vld [vmem:[%s4248_s13 + $0x6e8] sm:$0xff] }
 0x255   : > { %3916 = vmatmul.msk.f32.gmra.mxu2 %vm480_vm1, %v392_v11  ;;  %v5540_v38 = vpop.f32.mrf.mxu1  ;;  %v344_v11 = vld [vmem:[%s4248_s13 + $0x3e0] sm:$0xff] }
 0x256   : > { %3964 = vmatmul.msk.f32.gmra.mxu3 %vm480_vm1, %v440_v51  ;;  %7477 = vst [vmem:[#allocation51_spill] sm:$0xff] %v5540_v38  ;;  %v5545_v13 = vpop.f32.mrf.mxu2  ;;  %v5547_v17 = vpop.f32.mrf.mxu3  ;;  %v393_v51 = vld [vmem:[%s4248_s13 + $0x568] sm:$0xff] }
 0x257   : > { %7478 = vst [vmem:[#allocation52_spill] sm:$0xff] %v5545_v13  ;;  %3868 = vmatmul.msk.f32.gmra.mxu1 %vm480_vm1, %v344_v11 }
 0x258   : > { %7479 = vst [vmem:[#allocation53_spill] sm:$0xff] %v5547_v17 }
 0x259   : > { %2147 = vst.msk [vmem:[%s4295_s22 + $0x360] sm:$0xff] %vm2038_vm2, %v5540_v38 }
 0x25a   : > { %v5538_v45 = vpop.f32.mrf.mxu0  ;;  %2195 = vst.msk [vmem:[%s4295_s22 + $0x4e0] sm:$0xff] %vm2038_vm2, %v5545_v13 }
 0x25b   : > { %2095 = vst.msk [vmem:[%s4295_s22 + $0x1c0] sm:$0xff] %vm2038_vm2, %v5538_v45 }
 0x25c   : > { %2243 = vst.msk [vmem:[%s4295_s22 + $0x660] sm:$0xff] %vm2038_vm2, %v5547_v17  ;;  %v442_v17 = vld [vmem:[%s4248_s13 + $0x6f0] sm:$0xff] }
 0x25d   : > { %3917 = vmatmul.msk.f32.gmra.mxu2 %vm480_vm1, %v393_v51  ;;  %v5566_v36 = vpop.f32.mrf.mxu1  ;;  %v345_v51 = vld [vmem:[%s4248_s13 + $0x3e8] sm:$0xff] }
 0x25e   : > { %3965 = vmatmul.msk.f32.gmra.mxu3 %vm480_vm1, %v441_v1  ;;  %7480 = vst [vmem:[#allocation54_spill] sm:$0xff] %v5566_v36  ;;  %v5571_v11 = vpop.f32.mrf.mxu2  ;;  %v5573_v13 = vpop.f32.mrf.mxu3  ;;  %v394_v1 = vld [vmem:[%s4248_s13 + $0x570] sm:$0xff] }
 0x25f   : > { %7481 = vst [vmem:[#allocation55_spill] sm:$0xff] %v5571_v11  ;;  %3869 = vmatmul.msk.f32.gmra.mxu1 %vm480_vm1, %v345_v51 }
 0x260   : > { %7482 = vst [vmem:[#allocation56_spill] sm:$0xff] %v5573_v13 }
 0x261   : > { %2148 = vst.msk [vmem:[%s4295_s22 + $0x368] sm:$0xff] %vm2038_vm2, %v5566_v36 }
 0x262   : > { %v5564_v33 = vpop.f32.mrf.mxu0  ;;  %2196 = vst.msk [vmem:[%s4295_s22 + $0x4e8] sm:$0xff] %vm2038_vm2, %v5571_v11 }
 0x263   : > { %2096 = vst.msk [vmem:[%s4295_s22 + $0x1c8] sm:$0xff] %vm2038_vm2, %v5564_v33 }
 0x264   : > { %2244 = vst.msk [vmem:[%s4295_s22 + $0x668] sm:$0xff] %vm2038_vm2, %v5573_v13  ;;  %v443_v13 = vld [vmem:[%s4248_s13 + $0x6f8] sm:$0xff] }
 0x265   : > { %3918 = vmatmul.msk.f32.gmra.mxu2 %vm480_vm1, %v394_v1  ;;  %v5592_v29 = vpop.f32.mrf.mxu1  ;;  %v346_v1 = vld [vmem:[%s4248_s13 + $0x3f0] sm:$0xff] }
 0x266   : > { %3966 = vmatmul.msk.f32.gmra.mxu3 %vm480_vm1, %v442_v17  ;;  %7483 = vst [vmem:[#allocation57_spill] sm:$0xff] %v5592_v29  ;;  %v5597_v51 = vpop.f32.mrf.mxu2  ;;  %v5599_v11 = vpop.f32.mrf.mxu3  ;;  %v395_v17 = vld [vmem:[%s4248_s13 + $0x578] sm:$0xff] }
 0x267   : > { %7484 = vst [vmem:[#allocation58_spill] sm:$0xff] %v5597_v51  ;;  %3870 = vmatmul.msk.f32.gmra.mxu1 %vm480_vm1, %v346_v1 }
 0x268   : > { %7485 = vst [vmem:[#allocation59_spill] sm:$0xff] %v5599_v11 }
 0x269   : > { %2149 = vst.msk [vmem:[%s4295_s22 + $0x370] sm:$0xff] %vm2038_vm2, %v5592_v29  ;;  %v2404_v29 = vsel %vm2038_vm2, %v5512_v44, 0.0 }
 0x26a   : > { %v5590_v10 = vpop.f32.mrf.mxu0  ;;  %2197 = vst.msk [vmem:[%s4295_s22 + $0x4f0] sm:$0xff] %vm2038_vm2, %v5597_v51 }
 0x26b   : > { %2097 = vst.msk [vmem:[%s4295_s22 + $0x1d0] sm:$0xff] %vm2038_vm2, %v5590_v10 }
 0x26c   : > { %2245 = vst.msk [vmem:[%s4295_s22 + $0x670] sm:$0xff] %vm2038_vm2, %v5599_v11  ;;  %v347_v11 = vld [vmem:[%s4248_s13 + $0x3f8] sm:$0xff] }
 0x26d   : > { %3919 = vmatmul.msk.f32.gmra.mxu2 %vm480_vm1, %v395_v17  ;;  %v5618_v34 = vpop.f32.mrf.mxu1  ;;  %v444_v17 = vld [vmem:[%s4248_s13 + $0x700] sm:$0xff] }
 0x26e   : > { %3967 = vmatmul.msk.f32.gmra.mxu3 %vm480_vm1, %v443_v13  ;;  %7486 = vst [vmem:[#allocation60_spill] sm:$0xff] %v5618_v34  ;;  %v5623_v1 = vpop.f32.mrf.mxu2  ;;  %v5625_v51 = vpop.f32.mrf.mxu3  ;;  %v396_v13 = vld [vmem:[%s4248_s13 + $0x580] sm:$0xff] }
 0x26f   : > { %7487 = vst [vmem:[#allocation61_spill] sm:$0xff] %v5623_v1  ;;  %3871 = vmatmul.msk.f32.gmra.mxu1 %vm480_vm1, %v347_v11 }
 0x270   : > { %7488 = vst [vmem:[#allocation62_spill] sm:$0xff] %v5625_v51 }
 0x271   : > { %2150 = vst.msk [vmem:[%s4295_s22 + $0x378] sm:$0xff] %vm2038_vm2, %v5618_v34 }
 0x272   : > { %v5616_v21 = vpop.f32.mrf.mxu0  ;;  %2198 = vst.msk [vmem:[%s4295_s22 + $0x4f8] sm:$0xff] %vm2038_vm2, %v5623_v1  ;;  %v2867_v1 = vmul.f32 %v5460_v5, %v5460_v5 }
 0x273   : > { %2098 = vst.msk [vmem:[%s4295_s22 + $0x1d8] sm:$0xff] %vm2038_vm2, %v5616_v21 }
 0x274   : > { %2246 = vst.msk [vmem:[%s4295_s22 + $0x678] sm:$0xff] %vm2038_vm2, %v5625_v51  ;;  %v397_v51 = vld [vmem:[%s4248_s13 + $0x588] sm:$0xff]  ;;  %v3175_v34 = vsel %vm2038_vm2, %v2867_v1, 0.0  ;;  %v2870_v1 = vmul.f32 %v5538_v45, %v5538_v45 }
 0x275   : > { %3920 = vmatmul.msk.f32.gmra.mxu2 %vm480_vm1, %v396_v13  ;;  %v5642_v54 = vpop.f32.mrf.mxu1  ;;  %v2400_v13 = vsel %vm2038_vm2, %v5460_v5, 0.0  ;;  %v2869_v5 = vmul.f32 %v5512_v44, %v5512_v44  ;;  %v2871_v44 = vmul.f32 %v5564_v33, %v5564_v33 }
 0x276   : > { %3968 = vmatmul.msk.f32.gmra.mxu3 %vm480_vm1, %v444_v17  ;;  %7489 = vst [vmem:[#allocation63_spill] sm:$0xff] %v5642_v54  ;;  %v5648_v11 = vpop.f32.mrf.mxu2  ;;  %v5650_v16 = vpop.f32.mrf.mxu3  ;;  %v2868_v17 = vmul.f32 %v5486_v57, %v5486_v57 }
 0x277   : > { %7490 = vst [vmem:[#allocation64_spill] sm:$0xff] %v5648_v11 }
 0x278   : > { %7491 = vst [vmem:[#allocation65_spill] sm:$0xff] %v5650_v16 }
 0x279   : > { %2151 = vst.msk [vmem:[%s4295_s22 + $0x380] sm:$0xff] %vm2038_vm2, %v5642_v54  ;;  %v2402_v54 = vsel %vm2038_vm2, %v5486_v57, 0.0  ;;  %v3176_v57 = vadd.f32 %v3175_v34, %v5451_v20 }
 0x27a   : > { %v1450_v56 = vpop.f32.mrf.mxu0  ;;  %2199 = vst.msk [vmem:[%s4295_s22 + $0x500] sm:$0xff] %vm2038_vm2, %v5648_v11  ;;  %v2401_v11 = vadd.f32 %v2400_v13, %v5440_v61  ;;  %v2406_v61 = vsel %vm2038_vm2, %v5538_v45, 0.0  ;;  %v2408_v45 = vsel %vm2038_vm2, %v5564_v33, 0.0  ;;  %v2872_v13 = vmul.f32 %v5590_v10, %v5590_v10 }
 0x27b   : > { %2099 = vst.msk [vmem:[%s4295_s22 + $0x1e0] sm:$0xff] %vm2038_vm2, %v1450_v56  ;;  %v2873_v33 = vmul.f32 %v5616_v21, %v5616_v21 }
 0x27c   : > { %2247 = vst.msk [vmem:[%s4295_s22 + $0x680] sm:$0xff] %vm2038_vm2, %v5650_v16  ;;  %v3177_v16 = vsel %vm2038_vm2, %v2868_v17, 0.0  ;;  %v2403_v36 = vadd.f32 %v2402_v54, %v2401_v11  ;;  %v3181_v11 = vsel %vm2038_vm2, %v2870_v1, 0.0  ;;  %v2410_v1 = vsel %vm2038_vm2, %v5590_v10, 0.0 }
 0x27d   : > { %3921 = vmatmul.msk.f32.gmra.mxu2 %vm480_vm1, %v397_v51  ;;  %v5681_v2 = vpop.f32.mrf.mxu1  ;;  %v3178_v54 = vadd.f32 %v3177_v16, %v3176_v57  ;;  %v398_v16 = vld [vmem:[%s4248_s13 + $0x590] sm:$0xff] }
 0x27e   : > { %3969 = vmatmul.msk.f32.gmra.mxu3 %vm480_vm1, %v445_v30  ;;  %v3179_v30 = vsel %vm2038_vm2, %v2869_v5, 0.0  ;;  %v5690_v51 = vpop.f32.mrf.mxu2  ;;  %v5692_v34 = vpop.f32.mrf.mxu3  ;;  %v2405_v20 = vadd.f32 %v2404_v29, %v2403_v36  ;;  %2152 = vst.msk [vmem:[%s4295_s22 + $0x388] sm:$0xff] %vm2038_vm2, %v5681_v2  ;;  %v446_v29 = vld [vmem:[%s4248_s13 + $0x710] sm:$0xff]  ;;  %v3183_v36 = vsel %vm2038_vm2, %v2871_v44, 0.0  ;;  %v2874_v44 = vmul.f32 %v1450_v56, %v1450_v56 }
 0x27f   : > { %7492 = vst [vmem:[#allocation66_spill] sm:$0xff] %v5690_v51  ;;  %v3180_v17 = vadd.f32 %v3179_v30, %v3178_v54  ;;  %v2412_v54 = vsel %vm2038_vm2, %v5616_v21, 0.0 }
 0x280   : > { %7493 = vst [vmem:[#allocation67_spill] sm:$0xff] %v5692_v34  ;;  %v2407_v5 = vadd.f32 %v2406_v61, %v2405_v20  ;;  %v3185_v61 = vsel %vm2038_vm2, %v2872_v13, 0.0 }
 0x281   : > { %2200 = vst.msk [vmem:[%s4295_s22 + $0x508] sm:$0xff] %vm2038_vm2, %v5690_v51  ;;  %v3182_v57 = vadd.f32 %v3181_v11, %v3180_v17  ;;  %v2414_v11 = vsel %vm2038_vm2, %v1450_v56, 0.0 }
 0x282   : > { %v1453_v38 = vpop.f32.mrf.mxu0  ;;  %2248 = vst.msk [vmem:[%s4295_s22 + $0x688] sm:$0xff] %vm2038_vm2, %v5692_v34  ;;  %v2409_v30 = vadd.f32 %v2408_v45, %v2407_v5 }
 0x283   : > { %2100 = vst.msk [vmem:[%s4295_s22 + $0x1e8] sm:$0xff] %vm2038_vm2, %v1453_v38  ;;  %v3184_v20 = vadd.f32 %v3183_v36, %v3182_v57  ;;  %v2875_v45 = vmul.f32 %v1453_v38, %v1453_v38  ;;  %v2416_v36 = vsel %vm2038_vm2, %v1453_v38, 0.0  ;;  %v399_v57 = vld [vmem:[%s4248_s13 + $0x598] sm:$0xff] }
 0x284   : > { %v2411_v10 = vadd.f32 %v2410_v1, %v2409_v30  ;;  %v447_v30 = vld [vmem:[%s4248_s13 + $0x718] sm:$0xff] }
 0x285   : > { %3922 = vmatmul.msk.f32.gmra.mxu2 %vm480_vm1, %v398_v16  ;;  %v5720_v51 = vpop.f32.mrf.mxu1  ;;  %v3187_v16 = vsel %vm2038_vm2, %v2873_v33, 0.0  ;;  %v3186_v17 = vadd.f32 %v3185_v61, %v3184_v20  ;;  %v3191_v61 = vsel %vm2038_vm2, %v2875_v45, 0.0  ;;  %v2878_v45 = vmul.f32 %v4410_v63, %v4410_v63 }
 0x286   : > { %3970 = vmatmul.msk.f32.gmra.mxu3 %vm480_vm1, %v446_v29  ;;  %v5726_v13 = vpop.f32.mrf.mxu2  ;;  %v5728_v21 = vpop.f32.mrf.mxu3  ;;  %v2413_v5 = vadd.f32 %v2412_v54, %v2411_v10  ;;  %2153 = vst.msk [vmem:[%s4295_s22 + $0x390] sm:$0xff] %vm2038_vm2, %v5720_v51  ;;  %v3189_v29 = vsel %vm2038_vm2, %v2874_v44, 0.0 }
 0x287   : > { %2201 = vst.msk [vmem:[%s4295_s22 + $0x510] sm:$0xff] %vm2038_vm2, %v5726_v13  ;;  %v3188_v56 = vadd.f32 %v3187_v16, %v3186_v17 }
 0x288   : > { %v2415_v33 = vadd.f32 %v2414_v11, %v2413_v5  ;;  %2249 = vst.msk [vmem:[%s4295_s22 + $0x690] sm:$0xff] %vm2038_vm2, %v5728_v21 }
 0x289   : > { %v3190_v38 = vadd.f32 %v3189_v29, %v3188_v56 }
 0x28a   : > { %v1456_v34 = vpop.f32.mrf.mxu0  ;;  %v2417_v44 = vadd.f32 %v2416_v36, %v2415_v33  ;;  %v2879_v33 = vmul.f32 %v4426_v4, %v4426_v4 }
 0x28b   : > { %2101 = vst.msk [vmem:[%s4295_s22 + $0x1f0] sm:$0xff] %vm2038_vm2, %v1456_v34  ;;  %v2876_v1 = vmul.f32 %v1456_v34, %v1456_v34  ;;  %v2418_v54 = vsel %vm2038_vm2, %v1456_v34, 0.0  ;;  %v3192_v10 = vadd.f32 %v3191_v61, %v3190_v38  ;;  %v400_v38 = vld [vmem:[%s4248_s13 + $0x5a0] sm:$0xff] }
 0x28c   : > { %v2419_v16 = vadd.f32 %v2418_v54, %v2417_v44  ;;  %v448_v44 = vld [vmem:[%s4248_s13 + $0x720] sm:$0xff] }
 0x28d   : > { %3923 = vmatmul.msk.f32.gmra.mxu2 %vm480_vm1, %v399_v57  ;;  %v3193_v20 = vsel %vm2038_vm2, %v2876_v1, 0.0  ;;  %v5748_v17 = vpop.f32.mrf.mxu1  ;;  %v2422_v57 = vsel %vm2038_vm2, %v4410_v63, 0.0  ;;  %v3197_v63 = vsel %vm2038_vm2, %v2878_v45, 0.0 }
 0x28e   : > { %3971 = vmatmul.msk.f32.gmra.mxu3 %vm480_vm1, %v447_v30  ;;  %v5757_v36 = vpop.f32.mrf.mxu3  ;;  %v3194_v1 = vadd.f32 %v3193_v20, %v3192_v10  ;;  %2154 = vst.msk [vmem:[%s4295_s22 + $0x398] sm:$0xff] %vm2038_vm2, %v5748_v17  ;;  %v2424_v20 = vsel %vm2038_vm2, %v4426_v4, 0.0  ;;  %v2880_v10 = vmul.f32 %v4442_v9, %v4442_v9  ;;  %v2881_v4 = vmul.f32 %v4458_v14, %v4458_v14 }
 0x28f   : > { %2250 = vst.msk [vmem:[%s4295_s22 + $0x698] sm:$0xff] %vm2038_vm2, %v5757_v36 }
 0x290   : > { %v5755_v29 = vpop.f32.mrf.mxu2  ;;  %v3201_v45 = vsel %vm2038_vm2, %v2880_v10, 0.0 }
 0x291   : > { %2202 = vst.msk [vmem:[%s4295_s22 + $0x518] sm:$0xff] %vm2038_vm2, %v5755_v29 }
 0x292   : > { %v1459_v11 = vpop.f32.mrf.mxu0 }
 0x293   : > { %2102 = vst.msk [vmem:[%s4295_s22 + $0x1f8] sm:$0xff] %vm2038_vm2, %v1459_v11  ;;  %v2420_v34 = vsel %vm2038_vm2, %v1459_v11, 0.0  ;;  %v2877_v5 = vmul.f32 %v1459_v11, %v1459_v11 }
 0x294   : > { %v2421_v56 = vadd.f32 %v2420_v34, %v2419_v16  ;;  %v3199_v34 = vsel %vm2038_vm2, %v2879_v33, 0.0  ;;  %v2882_v33 = vmul.f32 %v4474_v19, %v4474_v19 }
 0x295   : > { %v3195_v30 = vsel %vm2038_vm2, %v2877_v5, 0.0  ;;  %3924 = vmatmul.msk.f32.gmra.mxu2 %vm480_vm1, %v400_v38  ;;  %v2426_v5 = vsel %vm2038_vm2, %v4442_v9, 0.0 }
 0x296   : > { %v2423_v61 = vadd.f32 %v2422_v57, %v2421_v56  ;;  %v3196_v54 = vadd.f32 %v3195_v30, %v3194_v1  ;;  %3972 = vmatmul.msk.f32.gmra.mxu3 %vm480_vm1, %v448_v44  ;;  %v5787_v57 = vpop.f32.mrf.mxu1  ;;  %v2428_v30 = vsel %vm2038_vm2, %v4458_v14, 0.0  ;;  %v3203_v44 = vsel %vm2038_vm2, %v2881_v4, 0.0 }
 0x297   : > { %2155 = vst.msk [vmem:[%s4295_s22 + $0x3a0] sm:$0xff] %vm2038_vm2, %v5787_v57  ;;  %v2430_v14 = vsel %vm2038_vm2, %v4474_v19, 0.0  ;;  %v2884_v4 = vmul.f32 %v4506_v32, %v4506_v32 }
 0x298   : > { %v2425_v16 = vadd.f32 %v2424_v20, %v2423_v61  ;;  %v3198_v11 = vadd.f32 %v3197_v63, %v3196_v54  ;;  %v5797_v9 = vpop.f32.mrf.mxu2  ;;  %v5799_v61 = vpop.f32.mrf.mxu3  ;;  %v2883_v20 = vmul.f32 %v4490_v25, %v4490_v25 }
 0x299   : > { %2203 = vst.msk [vmem:[%s4295_s22 + $0x520] sm:$0xff] %vm2038_vm2, %v5797_v9 }
 0x29a   : > { %v2427_v1 = vadd.f32 %v2426_v5, %v2425_v16  ;;  %v3200_v56 = vadd.f32 %v3199_v34, %v3198_v11  ;;  %2251 = vst.msk [vmem:[%s4295_s22 + $0x6a0] sm:$0xff] %vm2038_vm2, %v5799_v61  ;;  %v401_v16 = vld [vmem:[%s4248_s13 + $0x5a8] sm:$0xff]  ;;  %v3205_v34 = vsel %vm2038_vm2, %v2882_v33, 0.0  ;;  %v2432_v5 = vsel %vm2038_vm2, %v4490_v25, 0.0 }
 0x29b   : > { %v449_v11 = vld [vmem:[%s4248_s13 + $0x728] sm:$0xff] }
 0x29c   : > { %v2429_v54 = vadd.f32 %v2428_v30, %v2427_v1  ;;  %v3202_v38 = vadd.f32 %v3201_v45, %v3200_v56  ;;  %v3207_v56 = vsel %vm2038_vm2, %v2883_v20, 0.0  ;;  %v2434_v45 = vsel %vm2038_vm2, %v4506_v32, 0.0 }
 0x29d   : > { %3925 = vmatmul.msk.f32.gmra.mxu2 %vm480_vm1, %v401_v16  ;;  %v2885_v30 = vmul.f32 %v4522_v40, %v4522_v40 }
 0x29e   : > { %v2431_v10 = vadd.f32 %v2430_v14, %v2429_v54  ;;  %v3204_v63 = vadd.f32 %v3203_v44, %v3202_v38  ;;  %3973 = vmatmul.msk.f32.gmra.mxu3 %vm480_vm1, %v449_v11  ;;  %v5826_v54 = vpop.f32.mrf.mxu1  ;;  %v3209_v38 = vsel %vm2038_vm2, %v2884_v4, 0.0  ;;  %v2436_v44 = vsel %vm2038_vm2, %v4522_v40, 0.0  ;;  %v402_v4 = vld [vmem:[%s4248_s13 + $0x5b0] sm:$0xff] }
 0x29f   : > { %v2886_v14 = vmul.f32 %v4538_v47, %v4538_v47  ;;  %2156 = vst.msk [vmem:[%s4295_s22 + $0x3a8] sm:$0xff] %vm2038_vm2, %v5826_v54  ;;  %v3211_v16 = vsel %vm2038_vm2, %v2885_v30, 0.0  ;;  %v2438_v40 = vsel %vm2038_vm2, %v4538_v47, 0.0  ;;  %v2887_v11 = vmul.f32 %v4554_v55, %v4554_v55 }
 0x2a0   : > { %v2433_v19 = vadd.f32 %v2432_v5, %v2431_v10  ;;  %v3206_v1 = vadd.f32 %v3205_v34, %v3204_v63  ;;  %v5836_v32 = vpop.f32.mrf.mxu2  ;;  %v5838_v20 = vpop.f32.mrf.mxu3 }
 0x2a1   : > { %2204 = vst.msk [vmem:[%s4295_s22 + $0x528] sm:$0xff] %vm2038_vm2, %v5836_v32 }
 0x2a2   : > { %v2435_v25 = vadd.f32 %v2434_v45, %v2433_v19  ;;  %v3208_v33 = vadd.f32 %v3207_v56, %v3206_v1  ;;  %2252 = vst.msk [vmem:[%s4295_s22 + $0x6a8] sm:$0xff] %vm2038_vm2, %v5838_v20  ;;  %v450_v19 = vld [vmem:[%s4248_s13 + $0x730] sm:$0xff]  ;;  %v3213_v1 = vsel %vm2038_vm2, %v2886_v14, 0.0  ;;  %v2440_v56 = vsel %vm2038_vm2, %v4554_v55, 0.0 }
 0x2a3   : > { %v2888_v45 = vmul.f32 %v4570_v62, %v4570_v62 }
 0x2a4   : > { %v2437_v10 = vadd.f32 %v2436_v44, %v2435_v25  ;;  %v3210_v63 = vadd.f32 %v3209_v38, %v3208_v33  ;;  %v3215_v25 = vsel %vm2038_vm2, %v2887_v11, 0.0  ;;  %v2442_v33 = vsel %vm2038_vm2, %v4570_v62, 0.0 }
 0x2a5   : > { %3926 = vmatmul.msk.f32.gmra.mxu2 %vm480_vm1, %v402_v4  ;;  %v2889_v38 = vmul.f32 %v4586_v6, %v4586_v6  ;;  %v2891_v4 = vmul.f32 %v4618_v23, %v4618_v23 }
 0x2a6   : > { %v2439_v34 = vadd.f32 %v2438_v40, %v2437_v10  ;;  %v3212_v5 = vadd.f32 %v3211_v16, %v3210_v63  ;;  %3974 = vmatmul.msk.f32.gmra.mxu3 %vm480_vm1, %v450_v19  ;;  %v5865_v14 = vpop.f32.mrf.mxu1  ;;  %v3217_v10 = vsel %vm2038_vm2, %v2888_v45, 0.0  ;;  %v2444_v63 = vsel %vm2038_vm2, %v4586_v6, 0.0  ;;  %v451_v45 = vld [vmem:[%s4248_s13 + $0x738] sm:$0xff] }
 0x2a7   : > { %v2890_v16 = vmul.f32 %v4602_v15, %v4602_v15  ;;  %2157 = vst.msk [vmem:[%s4295_s22 + $0x3b0] sm:$0xff] %vm2038_vm2, %v5865_v14  ;;  %v2446_v6 = vsel %vm2038_vm2, %v4602_v15, 0.0 }
 0x2a8   : > { %v2441_v47 = vadd.f32 %v2440_v56, %v2439_v34  ;;  %v3214_v30 = vadd.f32 %v3213_v1, %v3212_v5  ;;  %v5875_v62 = vpop.f32.mrf.mxu2  ;;  %v5877_v40 = vpop.f32.mrf.mxu3  ;;  %v3219_v5 = vsel %vm2038_vm2, %v2889_v38, 0.0  ;;  %v403_v56 = vld [vmem:[%s4248_s13 + $0x5b8] sm:$0xff]  ;;  %v3223_v38 = vsel %vm2038_vm2, %v2891_v4, 0.0 }
 0x2a9   : > { %2205 = vst.msk [vmem:[%s4295_s22 + $0x530] sm:$0xff] %vm2038_vm2, %v5875_v62 }
 0x2aa   : > { %v2443_v55 = vadd.f32 %v2442_v33, %v2441_v47  ;;  %v3216_v44 = vadd.f32 %v3215_v25, %v3214_v30  ;;  %2253 = vst.msk [vmem:[%s4295_s22 + $0x6b0] sm:$0xff] %vm2038_vm2, %v5877_v40  ;;  %v3221_v47 = vsel %vm2038_vm2, %v2890_v16, 0.0  ;;  %v2448_v30 = vsel %vm2038_vm2, %v4618_v23, 0.0 }
 0x2ab   : > { %v2892_v25 = vmul.f32 %v4634_v35, %v4634_v35 }
 0x2ac   : > { %v2445_v11 = vadd.f32 %v2444_v63, %v2443_v55  ;;  %v3218_v34 = vadd.f32 %v3217_v10, %v3216_v44  ;;  %v2450_v55 = vsel %vm2038_vm2, %v4634_v35, 0.0  ;;  %v2893_v44 = vmul.f32 %v4650_v49, %v4650_v49 }
 0x2ad   : > { %3927 = vmatmul.msk.f32.gmra.mxu2 %vm480_vm1, %v403_v56  ;;  %v3225_v16 = vsel %vm2038_vm2, %v2892_v25, 0.0 }
 0x2ae   : > { %v2447_v19 = vadd.f32 %v2446_v6, %v2445_v11  ;;  %v3220_v1 = vadd.f32 %v3219_v5, %v3218_v34  ;;  %3975 = vmatmul.msk.f32.gmra.mxu3 %vm480_vm1, %v451_v45  ;;  %v5904_v63 = vpop.f32.mrf.mxu1  ;;  %v2452_v11 = vsel %vm2038_vm2, %v4650_v49, 0.0  ;;  %v2894_v34 = vmul.f32 %v4668_v0, %v4668_v0 }
 0x2af   : > { %2158 = vst.msk [vmem:[%s4295_s22 + $0x3b8] sm:$0xff] %vm2038_vm2, %v5904_v63  ;;  %v2454_v49 = vsel %vm2038_vm2, %v4668_v0, 0.0 }
 0x2b0   : > { %v2449_v15 = vadd.f32 %v2448_v30, %v2447_v19  ;;  %v3222_v33 = vadd.f32 %v3221_v47, %v3220_v1  ;;  %v5914_v35 = vpop.f32.mrf.mxu2  ;;  %v5916_v5 = vpop.f32.mrf.mxu3  ;;  %v3227_v19 = vsel %vm2038_vm2, %v2893_v44, 0.0  ;;  %v2895_v1 = vmul.f32 %v4691_v18, %v4691_v18  ;;  %v404_v47 = vld [vmem:[%s4248_s13 + $0x5c0] sm:$0xff] }
 0x2b1   : > { %2206 = vst.msk [vmem:[%s4295_s22 + $0x538] sm:$0xff] %vm2038_vm2, %v5914_v35  ;;  %v452_v30 = vld [vmem:[%s4248_s13 + $0x740] sm:$0xff]  ;;  %v3229_v25 = vsel %vm2038_vm2, %v2894_v34, 0.0 }
 0x2b2   : > { %v2451_v23 = vadd.f32 %v2450_v55, %v2449_v15  ;;  %v3224_v10 = vadd.f32 %v3223_v38, %v3222_v33  ;;  %2254 = vst.msk [vmem:[%s4295_s22 + $0x6b8] sm:$0xff] %vm2038_vm2, %v5916_v5  ;;  %v2456_v15 = vsel %vm2038_vm2, %v4691_v18, 0.0  ;;  %v7494_v33 = vld [vmem:[#allocation10_spill] sm:$0xff]  ;;  %v3231_v44 = vsel %vm2038_vm2, %v2895_v1, 0.0 }
 0x2b3   : > { %v2896_v38 = vmul.f32 %v7494_v33, %v7494_v33 }
 0x2b4   : > { %v2453_v6 = vadd.f32 %v2452_v11, %v2451_v23  ;;  %v3226_v4 = vadd.f32 %v3225_v16, %v3224_v10  ;;  %v2458_v23 = vsel %vm2038_vm2, %v7494_v33, 0.0  ;;  %v7495_v10 = vld [vmem:[#allocation12_spill] sm:$0xff] }
 0x2b5   : > { %3928 = vmatmul.msk.f32.gmra.mxu2 %vm480_vm1, %v404_v47  ;;  %v2897_v16 = vmul.f32 %v7495_v10, %v7495_v10 }
 0x2b6   : > { %v2455_v56 = vadd.f32 %v2454_v49, %v2453_v6  ;;  %v3228_v45 = vadd.f32 %v3227_v19, %v3226_v4  ;;  %3976 = vmatmul.msk.f32.gmra.mxu3 %vm480_vm1, %v452_v30  ;;  %v5943_v34 = vpop.f32.mrf.mxu1  ;;  %v3233_v6 = vsel %vm2038_vm2, %v2896_v38, 0.0  ;;  %v2460_v4 = vsel %vm2038_vm2, %v7495_v10, 0.0  ;;  %v405_v38 = vld [vmem:[%s4248_s13 + $0x5c8] sm:$0xff] }
 0x2b7   : > { %v2898_v19 = vmul.f32 %v4791_v60, %v4791_v60  ;;  %2159 = vst.msk [vmem:[%s4295_s22 + $0x3c0] sm:$0xff] %vm2038_vm2, %v5943_v34  ;;  %v3235_v47 = vsel %vm2038_vm2, %v2897_v16, 0.0  ;;  %v2462_v30 = vsel %vm2038_vm2, %v4791_v60, 0.0 }
 0x2b8   : > { %v2457_v0 = vadd.f32 %v2456_v15, %v2455_v56  ;;  %v3230_v55 = vadd.f32 %v3229_v25, %v3228_v45  ;;  %v5953_v49 = vpop.f32.mrf.mxu2  ;;  %v5955_v1 = vpop.f32.mrf.mxu3  ;;  %v2899_v25 = vmul.f32 %v4834_v8, %v4834_v8 }
 0x2b9   : > { %2207 = vst.msk [vmem:[%s4295_s22 + $0x540] sm:$0xff] %vm2038_vm2, %v5953_v49 }
 0x2ba   : > { %v2459_v18 = vadd.f32 %v2458_v23, %v2457_v0  ;;  %v3232_v11 = vadd.f32 %v3231_v44, %v3230_v55  ;;  %2255 = vst.msk [vmem:[%s4295_s22 + $0x6c0] sm:$0xff] %vm2038_vm2, %v5955_v1  ;;  %v453_v0 = vld [vmem:[%s4248_s13 + $0x748] sm:$0xff]  ;;  %v3237_v55 = vsel %vm2038_vm2, %v2898_v19, 0.0  ;;  %v2464_v44 = vsel %vm2038_vm2, %v4834_v8, 0.0 }
 0x2bb   : > { %v2900_v23 = vmul.f32 %v4877_v28, %v4877_v28  ;;  %v3239_v16 = vsel %vm2038_vm2, %v2899_v25, 0.0 }
 0x2bc   : > { %v2461_v56 = vadd.f32 %v2460_v4, %v2459_v18  ;;  %v3234_v45 = vadd.f32 %v3233_v6, %v3232_v11  ;;  %v2466_v18 = vsel %vm2038_vm2, %v4877_v28, 0.0  ;;  %v2901_v11 = vmul.f32 %v4920_v53, %v4920_v53 }
 0x2bd   : > { %3929 = vmatmul.msk.f32.gmra.mxu2 %vm480_vm1, %v405_v38  ;;  %v3241_v19 = vsel %vm2038_vm2, %v2900_v23, 0.0 }
 0x2be   : > { %v2463_v15 = vadd.f32 %v2462_v30, %v2461_v56  ;;  %v3236_v33 = vadd.f32 %v3235_v47, %v3234_v45  ;;  %3977 = vmatmul.msk.f32.gmra.mxu3 %vm480_vm1, %v453_v0  ;;  %v5982_v4 = vpop.f32.mrf.mxu1  ;;  %v2468_v56 = vsel %vm2038_vm2, %v4920_v53, 0.0  ;;  %v2902_v45 = vmul.f32 %v4963_v22, %v4963_v22 }
 0x2bf   : > { %2160 = vst.msk [vmem:[%s4295_s22 + $0x3c8] sm:$0xff] %vm2038_vm2, %v5982_v4  ;;  %v2470_v53 = vsel %vm2038_vm2, %v4963_v22, 0.0 }
 0x2c0   : > { %v2465_v60 = vadd.f32 %v2464_v44, %v2463_v15  ;;  %v3238_v10 = vadd.f32 %v3237_v55, %v3236_v33  ;;  %v5992_v28 = vpop.f32.mrf.mxu2  ;;  %v3243_v15 = vsel %vm2038_vm2, %v2901_v11, 0.0  ;;  %v2903_v33 = vmul.f32 %v5006_v27, %v5006_v27  ;;  %v406_v55 = vld [vmem:[%s4248_s13 + $0x5d0] sm:$0xff] }
 0x2c1   : > { %v5994_v47 = vpop.f32.mrf.mxu3  ;;  %2208 = vst.msk [vmem:[%s4295_s22 + $0x548] sm:$0xff] %vm2038_vm2, %v5992_v28  ;;  %v454_v44 = vld [vmem:[%s4248_s13 + $0x750] sm:$0xff]  ;;  %v3245_v23 = vsel %vm2038_vm2, %v2902_v45, 0.0  ;;  %v2474_v11 = vsel %vm2038_vm2, %v5049_v52, 0.0  ;;  %v2476_v45 = vsel %vm2038_vm2, %v5090_v7, 0.0 }
 0x2c2   : > { %v2467_v8 = vadd.f32 %v2466_v18, %v2465_v60  ;;  %v3240_v6 = vadd.f32 %v3239_v16, %v3238_v10  ;;  %2256 = vst.msk [vmem:[%s4295_s22 + $0x6c8] sm:$0xff] %vm2038_vm2, %v5994_v47  ;;  %v2472_v60 = vsel %vm2038_vm2, %v5006_v27, 0.0  ;;  %v2904_v10 = vmul.f32 %v5049_v52, %v5049_v52 }
 0x2c3   : > { %v3247_v18 = vsel %vm2038_vm2, %v2903_v33, 0.0 }
 0x2c4   : > { %v2469_v30 = vadd.f32 %v2468_v56, %v2467_v8  ;;  %v3242_v25 = vadd.f32 %v3241_v19, %v3240_v6  ;;  %v2905_v8 = vmul.f32 %v5090_v7, %v5090_v7  ;;  %v3249_v56 = vsel %vm2038_vm2, %v2904_v10, 0.0 }
 0x2c5   : > { %3930 = vmatmul.msk.f32.gmra.mxu2 %vm480_vm1, %v406_v55  ;;  %v2478_v7 = vsel %vm2038_vm2, %v5130_v58, 0.0  ;;  %v2480_v10 = vsel %vm2038_vm2, %v5158_v42, 0.0 }
 0x2c6   : > { %v3244_v38 = vadd.f32 %v3243_v15, %v3242_v25  ;;  %v2471_v0 = vadd.f32 %v2470_v53, %v2469_v30  ;;  %3978 = vmatmul.msk.f32.gmra.mxu3 %vm480_vm1, %v454_v44  ;;  %v6021_v19 = vpop.f32.mrf.mxu1  ;;  %v2906_v30 = vmul.f32 %v5130_v58, %v5130_v58  ;;  %v3251_v33 = vsel %vm2038_vm2, %v2905_v8, 0.0  ;;  %v407_v44 = vld [vmem:[%s4248_s13 + $0x5d8] sm:$0xff] }
 0x2c7   : > { %2161 = vst.msk [vmem:[%s4295_s22 + $0x3d0] sm:$0xff] %vm2038_vm2, %v6021_v19  ;;  %v2909_v8 = vmul.f32 %v5202_v26, %v5202_v26 }
 0x2c8   : > { %v2473_v22 = vadd.f32 %v2472_v60, %v2471_v0  ;;  %v3246_v16 = vadd.f32 %v3245_v23, %v3244_v38  ;;  %v6031_v52 = vpop.f32.mrf.mxu2  ;;  %v2907_v38 = vmul.f32 %v5158_v42, %v5158_v42  ;;  %v455_v23 = vld [vmem:[%s4248_s13 + $0x758] sm:$0xff]  ;;  %v3253_v60 = vsel %vm2038_vm2, %v2906_v30, 0.0 }
 0x2c9   : > { %v6033_v25 = vpop.f32.mrf.mxu3  ;;  %2209 = vst.msk [vmem:[%s4295_s22 + $0x550] sm:$0xff] %vm2038_vm2, %v6031_v52  ;;  %v2910_v30 = vmul.f32 %v5224_v59, %v5224_v59 }
 0x2ca   : > { %v2475_v27 = vadd.f32 %v2474_v11, %v2473_v22  ;;  %v3248_v6 = vadd.f32 %v3247_v18, %v3246_v16  ;;  %2257 = vst.msk [vmem:[%s4295_s22 + $0x6d0] sm:$0xff] %vm2038_vm2, %v6033_v25  ;;  %v2908_v22 = vmul.f32 %v5180_v31, %v5180_v31  ;;  %v3255_v18 = vsel %vm2038_vm2, %v2907_v38, 0.0 }
 0x2cb   : > { %v2482_v11 = vsel %vm2038_vm2, %v5180_v31, 0.0  ;;  %v2911_v38 = vmul.f32 %v5251_v46, %v5251_v46 }
 0x2cc   : > { %v2477_v15 = vadd.f32 %v2476_v45, %v2475_v27  ;;  %v3250_v53 = vadd.f32 %v3249_v56, %v3248_v6  ;;  %v3257_v56 = vsel %vm2038_vm2, %v2908_v22, 0.0  ;;  %v2484_v45 = vsel %vm2038_vm2, %v5202_v26, 0.0 }
 0x2cd   : > { %3931 = vmatmul.msk.f32.gmra.mxu2 %vm480_vm1, %v407_v44  ;;  %v2486_v26 = vsel %vm2038_vm2, %v5224_v59, 0.0  ;;  %v408_v44 = vld [vmem:[%s4248_s13 + $0x5e0] sm:$0xff]  ;;  %v2912_v22 = vmul.f32 %v5278_v37, %v5278_v37 }
 0x2ce   : > { %v2479_v0 = vadd.f32 %v2478_v7, %v2477_v15  ;;  %v3252_v55 = vadd.f32 %v3251_v33, %v3250_v53  ;;  %3979 = vmatmul.msk.f32.gmra.mxu3 %vm480_vm1, %v455_v23  ;;  %v6060_v6 = vpop.f32.mrf.mxu1  ;;  %v3259_v7 = vsel %vm2038_vm2, %v2909_v8, 0.0  ;;  %v456_v23 = vld [vmem:[%s4248_s13 + $0x760] sm:$0xff] }
 0x2cf   : > { %2162 = vst.msk [vmem:[%s4295_s22 + $0x3d8] sm:$0xff] %vm2038_vm2, %v6060_v6 }
 0x2d0   : > { %v2481_v58 = vadd.f32 %v2480_v10, %v2479_v0  ;;  %v3254_v16 = vadd.f32 %v3253_v60, %v3252_v55  ;;  %v6070_v31 = vpop.f32.mrf.mxu2  ;;  %v3261_v60 = vsel %vm2038_vm2, %v2910_v30, 0.0  ;;  %v2488_v10 = vsel %vm2038_vm2, %v5251_v46, 0.0 }
 0x2d1   : > { %v6072_v15 = vpop.f32.mrf.mxu3  ;;  %2210 = vst.msk [vmem:[%s4295_s22 + $0x558] sm:$0xff] %vm2038_vm2, %v6070_v31 }
 0x2d2   : > { %v2483_v42 = vadd.f32 %v2482_v11, %v2481_v58  ;;  %v3256_v27 = vadd.f32 %v3255_v18, %v3254_v16  ;;  %2258 = vst.msk [vmem:[%s4295_s22 + $0x6d8] sm:$0xff] %vm2038_vm2, %v6072_v15  ;;  %v3263_v16 = vsel %vm2038_vm2, %v2911_v38, 0.0  ;;  %v2490_v18 = vsel %vm2038_vm2, %v5278_v37, 0.0 }
 0x2d3   : > { %v2913_v11 = vmul.f32 %v5305_v39, %v5305_v39 }
 0x2d4   : > { %v2485_v53 = vadd.f32 %v2484_v45, %v2483_v42  ;;  %v3258_v33 = vadd.f32 %v3257_v56, %v3256_v27  ;;  %v3265_v27 = vsel %vm2038_vm2, %v2912_v22, 0.0  ;;  %v2492_v56 = vsel %vm2038_vm2, %v5305_v39, 0.0 }
 0x2d5   : > { %3932 = vmatmul.msk.f32.gmra.mxu2 %vm480_vm1, %v408_v44  ;;  %v2914_v45 = vmul.f32 %v5331_v48, %v5331_v48  ;;  %v2494_v39 = vsel %vm2038_vm2, %v5331_v48, 0.0  ;;  %v457_v44 = vld [vmem:[%s4248_s13 + $0x768] sm:$0xff] }
 0x2d6   : > { %v2487_v0 = vadd.f32 %v2486_v26, %v2485_v53  ;;  %v3260_v55 = vadd.f32 %v3259_v7, %v3258_v33  ;;  %3980 = vmatmul.msk.f32.gmra.mxu3 %vm480_vm1, %v456_v23  ;;  %v6099_v42 = vpop.f32.mrf.mxu1  ;;  %v3267_v7 = vsel %vm2038_vm2, %v2913_v11, 0.0  ;;  %v2915_v26 = vmul.f32 %v5356_v41, %v5356_v41 }
 0x2d7   : > { %2163 = vst.msk [vmem:[%s4295_s22 + $0x3e0] sm:$0xff] %vm2038_vm2, %v6099_v42  ;;  %v3269_v23 = vsel %vm2038_vm2, %v2914_v45, 0.0 }
 0x2d8   : > { %v2489_v59 = vadd.f32 %v2488_v10, %v2487_v0  ;;  %v3262_v58 = vadd.f32 %v3261_v60, %v3260_v55  ;;  %v6109_v37 = vpop.f32.mrf.mxu2  ;;  %v409_v55 = vld [vmem:[%s4248_s13 + $0x5e8] sm:$0xff]  ;;  %v2496_v60 = vsel %vm2038_vm2, %v5356_v41, 0.0  ;;  %v2916_v10 = vmul.f32 %v5381_v43, %v5381_v43 }
 0x2d9   : > { %v6111_v30 = vpop.f32.mrf.mxu3  ;;  %2211 = vst.msk [vmem:[%s4295_s22 + $0x560] sm:$0xff] %vm2038_vm2, %v6109_v37 }
 0x2da   : > { %v2491_v46 = vadd.f32 %v2490_v18, %v2489_v59  ;;  %v3264_v8 = vadd.f32 %v3263_v16, %v3262_v58  ;;  %2259 = vst.msk [vmem:[%s4295_s22 + $0x6e0] sm:$0xff] %vm2038_vm2, %v6111_v30  ;;  %v3271_v59 = vsel %vm2038_vm2, %v2915_v26, 0.0  ;;  %v2498_v58 = vsel %vm2038_vm2, %v5381_v43, 0.0 }
 0x2db   : > { %v2917_v16 = vmul.f32 %v5406_v3, %v5406_v3 }
 0x2dc   : > { %v2493_v53 = vadd.f32 %v2492_v56, %v2491_v46  ;;  %v3266_v33 = vadd.f32 %v3265_v27, %v3264_v8  ;;  %v3273_v46 = vsel %vm2038_vm2, %v2916_v10, 0.0  ;;  %v2500_v8 = vsel %vm2038_vm2, %v5406_v3, 0.0 }
 0x2dd   : > { %3933 = vmatmul.msk.f32.gmra.mxu2 %vm480_vm1, %v409_v55  ;;  %v2918_v27 = vmul.f32 %v5431_v12, %v5431_v12  ;;  %v2502_v3 = vsel %vm2038_vm2, %v5431_v12, 0.0 }
 0x2de   : > { %v2495_v38 = vadd.f32 %v2494_v39, %v2493_v53  ;;  %v3268_v0 = vadd.f32 %v3267_v7, %v3266_v33  ;;  %3981 = vmatmul.msk.f32.gmra.mxu3 %vm480_vm1, %v457_v44  ;;  %v6138_v11 = vpop.f32.mrf.mxu1  ;;  %v3275_v33 = vsel %vm2038_vm2, %v2917_v16, 0.0  ;;  %v2919_v7 = vmul.f32 %v5462_v24, %v5462_v24 }
 0x2df   : > { %2164 = vst.msk [vmem:[%s4295_s22 + $0x3e8] sm:$0xff] %vm2038_vm2, %v6138_v11  ;;  %v3277_v55 = vsel %vm2038_vm2, %v2918_v27, 0.0  ;;  %v2504_v44 = vsel %vm2038_vm2, %v5462_v24, 0.0 }
 0x2e0   : > { %v2497_v48 = vadd.f32 %v2496_v60, %v2495_v38  ;;  %v3270_v22 = vadd.f32 %v3269_v23, %v3268_v0  ;;  %v6148_v43 = vpop.f32.mrf.mxu2  ;;  %v410_v38 = vld [vmem:[%s4248_s13 + $0x5f0] sm:$0xff]  ;;  %v2920_v23 = vmul.f32 %v5488_v50, %v5488_v50  ;;  %v3279_v10 = vsel %vm2038_vm2, %v2919_v7, 0.0 }
 0x2e1   : > { %v6150_v56 = vpop.f32.mrf.mxu3  ;;  %2212 = vst.msk [vmem:[%s4295_s22 + $0x568] sm:$0xff] %vm2038_vm2, %v6148_v43  ;;  %v458_v0 = vld [vmem:[%s4248_s13 + $0x770] sm:$0xff] }
 0x2e2   : > { %v2499_v41 = vadd.f32 %v2498_v58, %v2497_v48  ;;  %v3272_v18 = vadd.f32 %v3271_v59, %v3270_v22  ;;  %2260 = vst.msk [vmem:[%s4295_s22 + $0x6e8] sm:$0xff] %vm2038_vm2, %v6150_v56  ;;  %v2506_v48 = vsel %vm2038_vm2, %v5488_v50, 0.0  ;;  %v7496_v22 = vld [vmem:[#allocation48_spill] sm:$0xff]  ;;  %v7498_v7 = vld [vmem:[#allocation54_spill] sm:$0xff] }
 0x2e3   : > { %v2921_v59 = vmul.f32 %v7496_v22, %v7496_v22 }
 0x2e4   : > { %v2501_v45 = vadd.f32 %v2500_v8, %v2499_v41  ;;  %v3274_v53 = vadd.f32 %v3273_v46, %v3272_v18  ;;  %v3281_v41 = vsel %vm2038_vm2, %v2920_v23, 0.0  ;;  %v2508_v18 = vsel %vm2038_vm2, %v7496_v22, 0.0  ;;  %v7497_v46 = vld [vmem:[#allocation51_spill] sm:$0xff] }
 0x2e5   : > { %3934 = vmatmul.msk.f32.gmra.mxu2 %vm480_vm1, %v410_v38  ;;  %v2922_v8 = vmul.f32 %v7497_v46, %v7497_v46  ;;  %v2512_v23 = vsel %vm2038_vm2, %v7498_v7, 0.0 }
 0x2e6   : > { %v2503_v39 = vadd.f32 %v2502_v3, %v2501_v45  ;;  %v3276_v26 = vadd.f32 %v3275_v33, %v3274_v53  ;;  %3982 = vmatmul.msk.f32.gmra.mxu3 %vm480_vm1, %v458_v0  ;;  %v6177_v16 = vpop.f32.mrf.mxu1  ;;  %v3283_v33 = vsel %vm2038_vm2, %v2921_v59, 0.0  ;;  %v2510_v3 = vsel %vm2038_vm2, %v7497_v46, 0.0  ;;  %v411_v0 = vld [vmem:[%s4248_s13 + $0x5f8] sm:$0xff] }
 0x2e7   : > { %2165 = vst.msk [vmem:[%s4295_s22 + $0x3f0] sm:$0xff] %vm2038_vm2, %v6177_v16 }
 0x2e8   : > { %v2505_v12 = vadd.f32 %v2504_v44, %v2503_v39  ;;  %v3278_v60 = vadd.f32 %v3277_v55, %v3276_v26  ;;  %v6187_v50 = vpop.f32.mrf.mxu2  ;;  %v2923_v39 = vmul.f32 %v7498_v7, %v7498_v7  ;;  %v459_v55 = vld [vmem:[%s4248_s13 + $0x778] sm:$0xff]  ;;  %v3285_v44 = vsel %vm2038_vm2, %v2922_v8, 0.0 }
 0x2e9   : > { %v6189_v27 = vpop.f32.mrf.mxu3  ;;  %2213 = vst.msk [vmem:[%s4295_s22 + $0x570] sm:$0xff] %vm2038_vm2, %v6187_v50 }
 0x2ea   : > { %v2507_v24 = vadd.f32 %v2506_v48, %v2505_v12  ;;  %v3280_v58 = vadd.f32 %v3279_v10, %v3278_v60  ;;  %2261 = vst.msk [vmem:[%s4295_s22 + $0x6f0] sm:$0xff] %vm2038_vm2, %v6189_v27  ;;  %v7499_v12 = vld [vmem:[#allocation57_spill] sm:$0xff]  ;;  %v3287_v22 = vsel %vm2038_vm2, %v2923_v39, 0.0 }
 0x2eb   : > { %v2924_v60 = vmul.f32 %v7499_v12, %v7499_v12  ;;  %v2514_v59 = vsel %vm2038_vm2, %v7499_v12, 0.0  ;;  %v460_v12 = vld [vmem:[%s4248_s13 + $0x780] sm:$0xff] }
 0x2ec   : > { %v2509_v45 = vadd.f32 %v2508_v18, %v2507_v24  ;;  %v3282_v53 = vadd.f32 %v3281_v41, %v3280_v58  ;;  %v7500_v24 = vld [vmem:[#allocation60_spill] sm:$0xff] }
 0x2ed   : > { %3935 = vmatmul.msk.f32.gmra.mxu2 %vm480_vm1, %v411_v0  ;;  %v2925_v58 = vmul.f32 %v7500_v24, %v7500_v24  ;;  %v3289_v8 = vsel %vm2038_vm2, %v2924_v60, 0.0 }
 0x2ee   : > { %v2511_v26 = vadd.f32 %v2510_v3, %v2509_v45  ;;  %v3284_v38 = vadd.f32 %v3283_v33, %v3282_v53  ;;  %3983 = vmatmul.msk.f32.gmra.mxu3 %vm480_vm1, %v459_v55  ;;  %v6216_v46 = vpop.f32.mrf.mxu1  ;;  %v2516_v45 = vsel %vm2038_vm2, %v7500_v24, 0.0  ;;  %v7501_v53 = vld [vmem:[#allocation63_spill] sm:$0xff]  ;;  %v2927_v55 = vmul.f32 %v5681_v2, %v5681_v2 }
 0x2ef   : > { %v2926_v33 = vmul.f32 %v7501_v53, %v7501_v53  ;;  %2166 = vst.msk [vmem:[%s4295_s22 + $0x3f8] sm:$0xff] %vm2038_vm2, %v6216_v46  ;;  %v2518_v0 = vsel %vm2038_vm2, %v7501_v53, 0.0  ;;  %v2930_v53 = vmul.f32 %v5787_v57, %v5787_v57 }
 0x2f0   : > { %v2513_v10 = vadd.f32 %v2512_v23, %v2511_v26  ;;  %v3286_v48 = vadd.f32 %v3285_v44, %v3284_v38  ;;  %v6226_v3 = vpop.f32.mrf.mxu2  ;;  %v3291_v38 = vsel %vm2038_vm2, %v2925_v58, 0.0  ;;  %v3295_v24 = vsel %vm2038_vm2, %v2927_v55, 0.0 }
 0x2f1   : > { %v6228_v7 = vpop.f32.mrf.mxu3  ;;  %2214 = vst.msk [vmem:[%s4295_s22 + $0x578] sm:$0xff] %vm2038_vm2, %v6226_v3  ;;  %v3293_v60 = vsel %vm2038_vm2, %v2926_v33, 0.0  ;;  %v2522_v58 = vsel %vm2038_vm2, %v5720_v51, 0.0 }
 0x2f2   : > { %v2515_v41 = vadd.f32 %v2514_v59, %v2513_v10  ;;  %v3288_v18 = vadd.f32 %v3287_v22, %v3286_v48  ;;  %2262 = vst.msk [vmem:[%s4295_s22 + $0x6f8] sm:$0xff] %vm2038_vm2, %v6228_v7  ;;  %v2520_v10 = vsel %vm2038_vm2, %v5681_v2, 0.0  ;;  %v2928_v48 = vmul.f32 %v5720_v51, %v5720_v51 }
 0x2f4   : > { %v2517_v39 = vadd.f32 %v2516_v45, %v2515_v41  ;;  %v3290_v26 = vadd.f32 %v3289_v8, %v3288_v18  ;;  %v2929_v41 = vmul.f32 %v5748_v17, %v5748_v17  ;;  %v3297_v8 = vsel %vm2038_vm2, %v2928_v48, 0.0 }
 0x2f5   : > { %v2524_v45 = vsel %vm2038_vm2, %v5748_v17, 0.0  ;;  %v2931_v17 = vmul.f32 %v5826_v54, %v5826_v54 }
 0x2f6   : > { %v3292_v44 = vadd.f32 %v3291_v38, %v3290_v26  ;;  %v2519_v23 = vadd.f32 %v2518_v0, %v2517_v39  ;;  %3984 = vmatmul.msk.f32.gmra.mxu3 %vm480_vm1, %v460_v12  ;;  %v3299_v38 = vsel %vm2038_vm2, %v2929_v41, 0.0  ;;  %v2526_v0 = vsel %vm2038_vm2, %v5787_v57, 0.0 }
 0x2f7   : > { %v3301_v12 = vsel %vm2038_vm2, %v2930_v53, 0.0 }
 0x2f8   : > { %v3294_v22 = vadd.f32 %v3293_v60, %v3292_v44  ;;  %v2521_v59 = vadd.f32 %v2520_v10, %v2519_v23  ;;  %v6258_v33 = vpop.f32.mrf.mxu2  ;;  %v461_v23 = vld [vmem:[%s4248_s13 + $0x788] sm:$0xff]  ;;  %v2528_v60 = vsel %vm2038_vm2, %v5826_v54, 0.0  ;;  %v2932_v10 = vmul.f32 %v5865_v14, %v5865_v14 }
 0x2f9   : > { %v6260_v39 = vpop.f32.mrf.mxu3  ;;  %2215 = vst.msk [vmem:[%s4295_s22 + $0x580] sm:$0xff] %vm2038_vm2, %v6258_v33 }
 0x2fa   : > { %v3296_v18 = vadd.f32 %v3295_v24, %v3294_v22  ;;  %v2523_v2 = vadd.f32 %v2522_v58, %v2521_v59  ;;  %2263 = vst.msk [vmem:[%s4295_s22 + $0x700] sm:$0xff] %vm2038_vm2, %v6260_v39  ;;  %v3303_v22 = vsel %vm2038_vm2, %v2931_v17, 0.0  ;;  %v2530_v59 = vsel %vm2038_vm2, %v5865_v14, 0.0  ;;  %v462_v17 = vld [vmem:[%s4248_s13 + $0x790] sm:$0xff] }
 0x2fb   : > { %v2933_v24 = vmul.f32 %v5904_v63, %v5904_v63  ;;  %v3305_v41 = vsel %vm2038_vm2, %v2932_v10, 0.0  ;;  %v2538_v10 = vsel %vm2038_vm2, %v6021_v19, 0.0 }
 0x2fc   : > { %v3298_v26 = vadd.f32 %v3297_v8, %v3296_v18  ;;  %v2525_v51 = vadd.f32 %v2524_v45, %v2523_v2  ;;  %v2532_v18 = vsel %vm2038_vm2, %v5904_v63, 0.0  ;;  %v2934_v2 = vmul.f32 %v5943_v34, %v5943_v34 }
 0x2fd   : > { %v2935_v63 = vmul.f32 %v5982_v4, %v5982_v4 }
 0x2fe   : > { %v3300_v55 = vadd.f32 %v3299_v38, %v3298_v26  ;;  %v2527_v44 = vadd.f32 %v2526_v0, %v2525_v51  ;;  %3985 = vmatmul.msk.f32.gmra.mxu3 %vm480_vm1, %v461_v23  ;;  %v3307_v26 = vsel %vm2038_vm2, %v2933_v24, 0.0  ;;  %v2534_v51 = vsel %vm2038_vm2, %v5943_v34, 0.0 }
 0x2ff   : > { %v2936_v23 = vmul.f32 %v6021_v19, %v6021_v19  ;;  %v2938_v24 = vmul.f32 %v6099_v42, %v6099_v42 }
 0x300   : > { %v3302_v57 = vadd.f32 %v3301_v12, %v3300_v55  ;;  %v2529_v48 = vadd.f32 %v2528_v60, %v2527_v44  ;;  %v6290_v8 = vpop.f32.mrf.mxu2  ;;  %v3309_v55 = vsel %vm2038_vm2, %v2934_v2, 0.0  ;;  %v2536_v44 = vsel %vm2038_vm2, %v5982_v4, 0.0 }
 0x301   : > { %v6292_v45 = vpop.f32.mrf.mxu3  ;;  %2216 = vst.msk [vmem:[%s4295_s22 + $0x588] sm:$0xff] %vm2038_vm2, %v6290_v8  ;;  %v3311_v60 = vsel %vm2038_vm2, %v2935_v63, 0.0  ;;  %v2542_v2 = vsel %vm2038_vm2, %v6099_v42, 0.0  ;;  %v2544_v63 = vsel %vm2038_vm2, %v6138_v11, 0.0  ;;  %v2941_v42 = vmul.f32 %v6216_v46, %v6216_v46 }
 0x302   : > { %v3304_v58 = vadd.f32 %v3303_v22, %v3302_v57  ;;  %v2531_v54 = vadd.f32 %v2530_v59, %v2529_v48  ;;  %2264 = vst.msk [vmem:[%s4295_s22 + $0x708] sm:$0xff] %vm2038_vm2, %v6292_v45  ;;  %v2937_v57 = vmul.f32 %v6060_v6, %v6060_v6  ;;  %v3313_v22 = vsel %vm2038_vm2, %v2936_v23, 0.0 }
 0x303   : > { %v2540_v59 = vsel %vm2038_vm2, %v6060_v6, 0.0  ;;  %v2939_v6 = vmul.f32 %v6138_v11, %v6138_v11  ;;  %v2548_v11 = vsel %vm2038_vm2, %v6216_v46, 0.0 }
 0x304   : > { %v3306_v53 = vadd.f32 %v3305_v41, %v3304_v58  ;;  %v2533_v14 = vadd.f32 %v2532_v18, %v2531_v54  ;;  %v3315_v18 = vsel %vm2038_vm2, %v2937_v57, 0.0  ;;  %v3323_v57 = vsel %vm2038_vm2, %v2941_v42, 0.0  ;;  %v7505_v42 = vld [vmem:[#allocation13_spill] sm:$0xff] }
 0x306   : > { %v3308_v38 = vadd.f32 %v3307_v26, %v3306_v53  ;;  %v2535_v0 = vadd.f32 %v2534_v51, %v2533_v14  ;;  %3986 = vmatmul.msk.f32.gmra.mxu3 %vm480_vm1, %v462_v17  ;;  %v463_v26 = vld [vmem:[%s4248_s13 + $0x798] sm:$0xff]  ;;  %v3317_v51 = vsel %vm2038_vm2, %v2938_v24, 0.0 }
 0x308   : > { %v3310_v34 = vadd.f32 %v3309_v55, %v3308_v38  ;;  %v2537_v12 = vadd.f32 %v2536_v44, %v2535_v0  ;;  %v6322_v58 = vpop.f32.mrf.mxu2  ;;  %v2940_v38 = vmul.f32 %v6177_v16, %v6177_v16  ;;  %v3319_v55 = vsel %vm2038_vm2, %v2939_v6, 0.0  ;;  %v7504_v6 = vld [vmem:[#allocation11_spill] sm:$0xff] }
 0x309   : > { %v6324_v54 = vpop.f32.mrf.mxu3  ;;  %2217 = vst.msk [vmem:[%s4295_s22 + $0x590] sm:$0xff] %vm2038_vm2, %v6322_v58  ;;  %v2546_v44 = vsel %vm2038_vm2, %v6177_v16, 0.0  ;;  %v7503_v16 = vld [vmem:[#allocation9_spill] sm:$0xff] }
 0x30a   : > { %v3312_v48 = vadd.f32 %v3311_v60, %v3310_v34  ;;  %v2539_v4 = vadd.f32 %v2538_v10, %v2537_v12  ;;  %2265 = vst.msk [vmem:[%s4295_s22 + $0x710] sm:$0xff] %vm2038_vm2, %v6324_v54  ;;  %v7502_v12 = vld [vmem:[#allocation8_spill] sm:$0xff]  ;;  %v3321_v10 = vsel %vm2038_vm2, %v2940_v38, 0.0  ;;  %v2943_v46 = vmul.f32 %v7503_v16, %v7503_v16 }
 0x30b   : > { %v2942_v60 = vmul.f32 %v7502_v12, %v7502_v12  ;;  %v2550_v24 = vsel %vm2038_vm2, %v7502_v12, 0.0  ;;  %v2554_v38 = vsel %vm2038_vm2, %v7504_v6, 0.0 }
 0x30c   : > { %v3314_v41 = vadd.f32 %v3313_v22, %v3312_v48  ;;  %v2541_v19 = vadd.f32 %v2540_v59, %v2539_v4 }
 0x30e   : > { %v3316_v53 = vadd.f32 %v3315_v18, %v3314_v41  ;;  %v2543_v14 = vadd.f32 %v2542_v2, %v2541_v19  ;;  %3987 = vmatmul.msk.f32.gmra.mxu3 %vm480_vm1, %v463_v26  ;;  %v464_v18 = vld [vmem:[%s4248_s13 + $0x7a0] sm:$0xff]  ;;  %v2552_v2 = vsel %vm2038_vm2, %v7503_v16, 0.0 }
 0x30f   : > { %v7507_v16 = vld [vmem:[#allocation15_spill] sm:$0xff] }
 0x310   : > { %v3318_v0 = vadd.f32 %v3317_v51, %v3316_v53  ;;  %v2545_v17 = vadd.f32 %v2544_v63, %v2543_v14  ;;  %v6355_v48 = vpop.f32.mrf.mxu2  ;;  %v2944_v53 = vmul.f32 %v7504_v6, %v7504_v6  ;;  %v3325_v14 = vsel %vm2038_vm2, %v2942_v60, 0.0  ;;  %v7508_v6 = vld [vmem:[#allocation16_spill] sm:$0xff] }
 0x311   : > { %v6357_v4 = vpop.f32.mrf.mxu3  ;;  %2218 = vst.msk [vmem:[%s4295_s22 + $0x598] sm:$0xff] %vm2038_vm2, %v6355_v48  ;;  %v3327_v63 = vsel %vm2038_vm2, %v2943_v46, 0.0  ;;  %v2947_v46 = vmul.f32 %v7507_v16, %v7507_v16 }
 0x312   : > { %v3320_v23 = vadd.f32 %v3319_v55, %v3318_v0  ;;  %v2547_v34 = vadd.f32 %v2546_v44, %v2545_v17  ;;  %2266 = vst.msk [vmem:[%s4295_s22 + $0x718] sm:$0xff] %vm2038_vm2, %v6357_v4  ;;  %v2945_v0 = vmul.f32 %v7505_v42, %v7505_v42  ;;  %v3329_v44 = vsel %vm2038_vm2, %v2944_v53, 0.0 }
 0x313   : > { %v2948_v53 = vmul.f32 %v7508_v6, %v7508_v6 }
 0x314   : > { %v3322_v22 = vadd.f32 %v3321_v10, %v3320_v23  ;;  %v2549_v59 = vadd.f32 %v2548_v11, %v2547_v34  ;;  %v2556_v11 = vsel %vm2038_vm2, %v7505_v42, 0.0  ;;  %v7506_v23 = vld [vmem:[#allocation14_spill] sm:$0xff] }
 0x315   : > { %v2946_v34 = vmul.f32 %v7506_v23, %v7506_v23 }
 0x316   : > { %v2551_v41 = vadd.f32 %v2550_v24, %v2549_v59  ;;  %v3324_v19 = vadd.f32 %v3323_v57, %v3322_v22  ;;  %3988 = vmatmul.msk.f32.gmra.mxu3 %vm480_vm1, %v464_v18  ;;  %v3331_v22 = vsel %vm2038_vm2, %v2945_v0, 0.0  ;;  %v2558_v59 = vsel %vm2038_vm2, %v7506_v23, 0.0 }
 0x317   : > { %v3333_v18 = vsel %vm2038_vm2, %v2946_v34, 0.0 }
 0x318   : > { %v2553_v26 = vadd.f32 %v2552_v2, %v2551_v41  ;;  %v3326_v51 = vadd.f32 %v3325_v14, %v3324_v19  ;;  %v6386_v12 = vpop.f32.mrf.mxu2  ;;  %v465_v19 = vld [vmem:[%s4248_s13 + $0x7a8] sm:$0xff]  ;;  %v2560_v2 = vsel %vm2038_vm2, %v7507_v16, 0.0 }
 0x319   : > { %v6388_v60 = vpop.f32.mrf.mxu3  ;;  %2219 = vst.msk [vmem:[%s4295_s22 + $0x5a0] sm:$0xff] %vm2038_vm2, %v6386_v12 }
 0x31a   : > { %v2555_v17 = vadd.f32 %v2554_v38, %v2553_v26  ;;  %v3328_v55 = vadd.f32 %v3327_v63, %v3326_v51  ;;  %2267 = vst.msk [vmem:[%s4295_s22 + $0x720] sm:$0xff] %vm2038_vm2, %v6388_v60  ;;  %v3335_v51 = vsel %vm2038_vm2, %v2947_v46, 0.0  ;;  %v2562_v63 = vsel %vm2038_vm2, %v7508_v6, 0.0  ;;  %v7509_v38 = vld [vmem:[#allocation17_spill] sm:$0xff]  ;;  %v7511_v46 = vld [vmem:[#allocation19_spill] sm:$0xff] }
 0x31b   : > { %v2949_v42 = vmul.f32 %v7509_v38, %v7509_v38  ;;  %v2568_v6 = vsel %vm2038_vm2, %v7511_v46, 0.0 }
 0x31c   : > { %v2557_v10 = vadd.f32 %v2556_v11, %v2555_v17  ;;  %v3330_v57 = vadd.f32 %v3329_v44, %v3328_v55  ;;  %v3337_v55 = vsel %vm2038_vm2, %v2948_v53, 0.0  ;;  %v2564_v44 = vsel %vm2038_vm2, %v7509_v38, 0.0  ;;  %v7510_v11 = vld [vmem:[#allocation18_spill] sm:$0xff]  ;;  %v7512_v53 = vld [vmem:[#allocation20_spill] sm:$0xff] }
 0x31d   : > { %v2950_v23 = vmul.f32 %v7510_v11, %v7510_v11  ;;  %v2566_v16 = vsel %vm2038_vm2, %v7510_v11, 0.0  ;;  %v2570_v38 = vsel %vm2038_vm2, %v7512_v53, 0.0 }
 0x31e   : > { %v2559_v24 = vadd.f32 %v2558_v59, %v2557_v10  ;;  %v3332_v41 = vadd.f32 %v3331_v22, %v3330_v57  ;;  %3989 = vmatmul.msk.f32.gmra.mxu3 %vm480_vm1, %v465_v19  ;;  %v3339_v59 = vsel %vm2038_vm2, %v2949_v42, 0.0  ;;  %v7513_v42 = vld [vmem:[#allocation21_spill] sm:$0xff] }
 0x31f   : > { %v2572_v11 = vsel %vm2038_vm2, %v7513_v42, 0.0 }
 0x320   : > { %v2561_v14 = vadd.f32 %v2560_v2, %v2559_v24  ;;  %v3334_v26 = vadd.f32 %v3333_v18, %v3332_v41  ;;  %v6418_v34 = vpop.f32.mrf.mxu2  ;;  %v2951_v24 = vmul.f32 %v7511_v46, %v7511_v46  ;;  %v466_v18 = vld [vmem:[%s4248_s13 + $0x7b0] sm:$0xff]  ;;  %v3341_v2 = vsel %vm2038_vm2, %v2950_v23, 0.0 }
 0x321   : > { %v6420_v10 = vpop.f32.mrf.mxu3  ;;  %2220 = vst.msk [vmem:[%s4295_s22 + $0x5a8] sm:$0xff] %vm2038_vm2, %v6418_v34  ;;  %v7514_v23 = vld [vmem:[#allocation22_spill] sm:$0xff] }
 0x322   : > { %v2563_v0 = vadd.f32 %v2562_v63, %v2561_v14  ;;  %v3336_v17 = vadd.f32 %v3335_v51, %v3334_v26  ;;  %2268 = vst.msk [vmem:[%s4295_s22 + $0x728] sm:$0xff] %vm2038_vm2, %v6420_v10  ;;  %v2952_v14 = vmul.f32 %v7512_v53, %v7512_v53  ;;  %v3343_v63 = vsel %vm2038_vm2, %v2951_v24, 0.0  ;;  %v467_v53 = vld [vmem:[%s4248_s13 + $0x7b8] sm:$0xff] }
 0x324   : > { %v2565_v57 = vadd.f32 %v2564_v44, %v2563_v0  ;;  %v3338_v22 = vadd.f32 %v3337_v55, %v3336_v17  ;;  %v2953_v0 = vmul.f32 %v7513_v42, %v7513_v42  ;;  %v3345_v44 = vsel %vm2038_vm2, %v2952_v14, 0.0 }
 0x326   : > { %v2567_v41 = vadd.f32 %v2566_v16, %v2565_v57  ;;  %v3340_v19 = vadd.f32 %v3339_v59, %v3338_v22  ;;  %3990 = vmatmul.msk.f32.gmra.mxu3 %vm480_vm1, %v466_v18  ;;  %v2954_v57 = vmul.f32 %v7514_v23, %v7514_v23  ;;  %v3347_v24 = vsel %vm2038_vm2, %v2953_v0, 0.0 }
 0x328   : > { %v2569_v26 = vadd.f32 %v2568_v6, %v2567_v41  ;;  %v3342_v51 = vadd.f32 %v3341_v2, %v3340_v19  ;;  %v6450_v22 = vpop.f32.mrf.mxu2  ;;  %v2574_v41 = vsel %vm2038_vm2, %v7514_v23, 0.0  ;;  %v7515_v19 = vld [vmem:[#allocation23_spill] sm:$0xff]  ;;  %v3349_v14 = vsel %vm2038_vm2, %v2954_v57, 0.0 }
 0x329   : > { %v6452_v59 = vpop.f32.mrf.mxu3  ;;  %2221 = vst.msk [vmem:[%s4295_s22 + $0x5b0] sm:$0xff] %vm2038_vm2, %v6450_v22  ;;  %v2955_v18 = vmul.f32 %v7515_v19, %v7515_v19 }
 0x32a   : > { %v2571_v17 = vadd.f32 %v2570_v38, %v2569_v26  ;;  %v3344_v55 = vadd.f32 %v3343_v63, %v3342_v51  ;;  %2269 = vst.msk [vmem:[%s4295_s22 + $0x730] sm:$0xff] %vm2038_vm2, %v6452_v59  ;;  %v2576_v26 = vsel %vm2038_vm2, %v7515_v19, 0.0  ;;  %v7516_v51 = vld [vmem:[#allocation24_spill] sm:$0xff] }
 0x32b   : > { %v2956_v63 = vmul.f32 %v7516_v51, %v7516_v51  ;;  %v3351_v0 = vsel %vm2038_vm2, %v2955_v18, 0.0 }
 0x32c   : > { %v2573_v16 = vadd.f32 %v2572_v11, %v2571_v17  ;;  %v3346_v46 = vadd.f32 %v3345_v44, %v3344_v55  ;;  %v2578_v17 = vsel %vm2038_vm2, %v7516_v51, 0.0  ;;  %v7517_v55 = vld [vmem:[#allocation25_spill] sm:$0xff] }
 0x32d   : > { %v2957_v44 = vmul.f32 %v7517_v55, %v7517_v55  ;;  %v3353_v57 = vsel %vm2038_vm2, %v2956_v63, 0.0 }
 0x32e   : > { %v2575_v2 = vadd.f32 %v2574_v41, %v2573_v16  ;;  %v3348_v6 = vadd.f32 %v3347_v24, %v3346_v46  ;;  %3991 = vmatmul.msk.f32.gmra.mxu3 %vm480_vm1, %v467_v53  ;;  %v2580_v16 = vsel %vm2038_vm2, %v7517_v55, 0.0  ;;  %v7518_v46 = vld [vmem:[#allocation26_spill] sm:$0xff] }
 0x32f   : > { %v2958_v24 = vmul.f32 %v7518_v46, %v7518_v46  ;;  %v2582_v53 = vsel %vm2038_vm2, %v7518_v46, 0.0 }
 0x330   : > { %v2577_v38 = vadd.f32 %v2576_v26, %v2575_v2  ;;  %v3350_v42 = vadd.f32 %v3349_v14, %v3348_v6  ;;  %v6482_v41 = vpop.f32.mrf.mxu2  ;;  %v3355_v6 = vsel %vm2038_vm2, %v2957_v44, 0.0  ;;  %v7520_v14 = vld [vmem:[#allocation28_spill] sm:$0xff] }
 0x331   : > { %v6484_v19 = vpop.f32.mrf.mxu3  ;;  %2222 = vst.msk [vmem:[%s4295_s22 + $0x5b8] sm:$0xff] %vm2038_vm2, %v6482_v41  ;;  %v2959_v26 = vmul.f32 %v7520_v14, %v7520_v14 }
 0x332   : > { %v2579_v11 = vadd.f32 %v2578_v17, %v2577_v38  ;;  %v3352_v23 = vadd.f32 %v3351_v0, %v3350_v42  ;;  %7519 = vst [vmem:[#allocation10_spill] sm:$0xff] %v6484_v19  ;;  %v468_v38 = vld [vmem:[%s4248_s13 + $0x7c0] sm:$0xff]  ;;  %v3357_v42 = vsel %vm2038_vm2, %v2958_v24, 0.0  ;;  %v2584_v0 = vsel %vm2038_vm2, %v7520_v14, 0.0  ;;  %v7521_v17 = vld [vmem:[#allocation30_spill] sm:$0xff] }
 0x333   : > { %2270 = vst.msk [vmem:[%s4295_s22 + $0x738] sm:$0xff] %vm2038_vm2, %v6484_v19  ;;  %v2960_v55 = vmul.f32 %v7521_v17, %v7521_v17 }
 0x334   : > { %v2581_v18 = vadd.f32 %v2580_v16, %v2579_v11  ;;  %v3354_v2 = vadd.f32 %v3353_v57, %v3352_v23  ;;  %v3359_v23 = vsel %vm2038_vm2, %v2959_v26, 0.0  ;;  %v2586_v57 = vsel %vm2038_vm2, %v7521_v17, 0.0  ;;  %v7522_v16 = vld [vmem:[#allocation32_spill] sm:$0xff] }
 0x335   : > { %v2961_v46 = vmul.f32 %v7522_v16, %v7522_v16  ;;  %v7525_v17 = vld [vmem:[#allocation36_spill] sm:$0xff] }
 0x336   : > { %v2583_v51 = vadd.f32 %v2582_v53, %v2581_v18  ;;  %v3356_v63 = vadd.f32 %v3355_v6, %v3354_v2  ;;  %3992 = vmatmul.msk.f32.gmra.mxu3 %vm480_vm1, %v468_v38  ;;  %v3361_v2 = vsel %vm2038_vm2, %v2960_v55, 0.0  ;;  %v2588_v6 = vsel %vm2038_vm2, %v7522_v16, 0.0  ;;  %v7523_v53 = vld [vmem:[#allocation34_spill] sm:$0xff] }
 0x337   : > { %v2962_v14 = vmul.f32 %v7523_v53, %v7523_v53  ;;  %v2963_v55 = vmul.f32 %v7525_v17, %v7525_v17  ;;  %v2592_v16 = vsel %vm2038_vm2, %v7525_v17, 0.0 }
 0x338   : > { %v2585_v44 = vadd.f32 %v2584_v0, %v2583_v51  ;;  %v3358_v11 = vadd.f32 %v3357_v42, %v3356_v63  ;;  %v6514_v51 = vpop.f32.mrf.mxu2  ;;  %v3363_v42 = vsel %vm2038_vm2, %v2961_v46, 0.0  ;;  %v2590_v0 = vsel %vm2038_vm2, %v7523_v53, 0.0 }
 0x339   : > { %v6516_v26 = vpop.f32.mrf.mxu3  ;;  %2223 = vst.msk [vmem:[%s4295_s22 + $0x5c0] sm:$0xff] %vm2038_vm2, %v6514_v51 }
 0x33a   : > { %v2587_v24 = vadd.f32 %v2586_v57, %v2585_v44  ;;  %v3360_v18 = vadd.f32 %v3359_v23, %v3358_v11  ;;  %7524 = vst [vmem:[#allocation12_spill] sm:$0xff] %v6516_v26  ;;  %v469_v23 = vld [vmem:[%s4248_s13 + $0x7c8] sm:$0xff]  ;;  %v3365_v57 = vsel %vm2038_vm2, %v2962_v14, 0.0 }
 0x33b   : > { %2271 = vst.msk [vmem:[%s4295_s22 + $0x740] sm:$0xff] %vm2038_vm2, %v6516_v26 }
 0x33c   : > { %v2589_v63 = vadd.f32 %v2588_v6, %v2587_v24  ;;  %v3362_v38 = vadd.f32 %v3361_v2, %v3360_v18  ;;  %v7526_v24 = vld [vmem:[#allocation38_spill] sm:$0xff]  ;;  %v3367_v6 = vsel %vm2038_vm2, %v2963_v55, 0.0 }
 0x33d   : > { %v2964_v46 = vmul.f32 %v7526_v24, %v7526_v24  ;;  %v2594_v53 = vsel %vm2038_vm2, %v7526_v24, 0.0 }
 0x33e   : > { %v2591_v44 = vadd.f32 %v2590_v0, %v2589_v63  ;;  %v3364_v11 = vadd.f32 %v3363_v42, %v3362_v38  ;;  %3993 = vmatmul.msk.f32.gmra.mxu3 %vm480_vm1, %v469_v23  ;;  %v7527_v63 = vld [vmem:[#allocation40_spill] sm:$0xff]  ;;  %v7528_v23 = vld [vmem:[#allocation42_spill] sm:$0xff] }
 0x33f   : > { %v2965_v14 = vmul.f32 %v7527_v63, %v7527_v63  ;;  %v3369_v0 = vsel %vm2038_vm2, %v2964_v46, 0.0  ;;  %v2596_v17 = vsel %vm2038_vm2, %v7527_v63, 0.0  ;;  %v2598_v46 = vsel %vm2038_vm2, %v7528_v23, 0.0  ;;  %v470_v63 = vld [vmem:[%s4248_s13 + $0x7d0] sm:$0xff] }
 0x340   : > { %v2593_v18 = vadd.f32 %v2592_v16, %v2591_v44  ;;  %v3366_v2 = vadd.f32 %v3365_v57, %v3364_v11  ;;  %v2966_v44 = vmul.f32 %v7528_v23, %v7528_v23  ;;  %v6546_v11 = vpop.f32.mrf.mxu2 }
 0x341   : > { %v6548_v55 = vpop.f32.mrf.mxu3  ;;  %2224 = vst.msk [vmem:[%s4295_s22 + $0x5c8] sm:$0xff] %vm2038_vm2, %v6546_v11  ;;  %v3371_v24 = vsel %vm2038_vm2, %v2965_v14, 0.0 }
 0x342   : > { %v2595_v38 = vadd.f32 %v2594_v53, %v2593_v18  ;;  %v3368_v42 = vadd.f32 %v3367_v6, %v3366_v2  ;;  %7529 = vst [vmem:[#allocation48_spill] sm:$0xff] %v6548_v55  ;;  %v7530_v18 = vld [vmem:[#allocation44_spill] sm:$0xff] }
 0x343   : > { %v2967_v2 = vmul.f32 %v7530_v18, %v7530_v18  ;;  %2272 = vst.msk [vmem:[%s4295_s22 + $0x748] sm:$0xff] %vm2038_vm2, %v6548_v55 }
 0x344   : > { %v2597_v57 = vadd.f32 %v2596_v17, %v2595_v38  ;;  %v3370_v16 = vadd.f32 %v3369_v0, %v3368_v42  ;;  %v3373_v38 = vsel %vm2038_vm2, %v2966_v44, 0.0  ;;  %v2600_v42 = vsel %vm2038_vm2, %v7530_v18, 0.0  ;;  %v7531_v0 = vld [vmem:[#allocation46_spill] sm:$0xff] }
 0x345   : > { %v2968_v14 = vmul.f32 %v7531_v0, %v7531_v0  ;;  %v3375_v26 = vsel %vm2038_vm2, %v2967_v2, 0.0 }
 0x346   : > { %v3372_v6 = vadd.f32 %v3371_v24, %v3370_v16  ;;  %v2599_v53 = vadd.f32 %v2598_v46, %v2597_v57  ;;  %3994 = vmatmul.msk.f32.gmra.mxu3 %vm480_vm1, %v470_v63  ;;  %v2602_v57 = vsel %vm2038_vm2, %v7531_v0, 0.0  ;;  %v7532_v16 = vld [vmem:[#allocation49_spill] sm:$0xff]  ;;  %v7533_v63 = vld [vmem:[#allocation52_spill] sm:$0xff] }
 0x347   : > { %v2969_v44 = vmul.f32 %v7532_v16, %v7532_v16  ;;  %v3377_v18 = vsel %vm2038_vm2, %v2968_v14, 0.0  ;;  %v2604_v55 = vsel %vm2038_vm2, %v7532_v16, 0.0  ;;  %v7535_v14 = vld [vmem:[#allocation55_spill] sm:$0xff] }
 0x348   : > { %v2601_v17 = vadd.f32 %v2600_v42, %v2599_v53  ;;  %v3374_v23 = vadd.f32 %v3373_v38, %v3372_v6  ;;  %v2970_v6 = vmul.f32 %v7533_v63, %v7533_v63  ;;  %v6578_v53 = vpop.f32.mrf.mxu2  ;;  %v471_v16 = vld [vmem:[%s4248_s13 + $0x7d8] sm:$0xff] }
 0x349   : > { %v6580_v2 = vpop.f32.mrf.mxu3  ;;  %2225 = vst.msk [vmem:[%s4295_s22 + $0x5d0] sm:$0xff] %vm2038_vm2, %v6578_v53  ;;  %v3379_v0 = vsel %vm2038_vm2, %v2969_v44, 0.0 }
 0x34a   : > { %v2603_v24 = vadd.f32 %v2602_v57, %v2601_v17  ;;  %v3376_v46 = vadd.f32 %v3375_v26, %v3374_v23  ;;  %7534 = vst [vmem:[#allocation51_spill] sm:$0xff] %v6580_v2  ;;  %v2606_v26 = vsel %vm2038_vm2, %v7533_v63, 0.0  ;;  %v2971_v17 = vmul.f32 %v7535_v14, %v7535_v14 }
 0x34b   : > { %2273 = vst.msk [vmem:[%s4295_s22 + $0x750] sm:$0xff] %vm2038_vm2, %v6580_v2 }
 0x34c   : > { %v2605_v38 = vadd.f32 %v2604_v55, %v2603_v24  ;;  %v3378_v42 = vadd.f32 %v3377_v18, %v3376_v46  ;;  %v3381_v55 = vsel %vm2038_vm2, %v2970_v6, 0.0  ;;  %v2608_v24 = vsel %vm2038_vm2, %v7535_v14, 0.0  ;;  %v7536_v46 = vld [vmem:[#allocation58_spill] sm:$0xff] }
 0x34d   : > { %v2972_v44 = vmul.f32 %v7536_v46, %v7536_v46  ;;  %v3383_v19 = vsel %vm2038_vm2, %v2971_v17, 0.0 }
 0x34e   : > { %v2607_v23 = vadd.f32 %v2606_v26, %v2605_v38  ;;  %v3380_v57 = vadd.f32 %v3379_v0, %v3378_v42  ;;  %3995 = vmatmul.msk.f32.gmra.mxu3 %vm480_vm1, %v471_v16  ;;  %v2610_v38 = vsel %vm2038_vm2, %v7536_v46, 0.0  ;;  %v7537_v42 = vld [vmem:[#allocation61_spill] sm:$0xff]  ;;  %v7538_v16 = vld [vmem:[#allocation64_spill] sm:$0xff] }
 0x34f   : > { %v2973_v6 = vmul.f32 %v7537_v42, %v7537_v42  ;;  %v3385_v14 = vsel %vm2038_vm2, %v2972_v44, 0.0  ;;  %v2612_v2 = vsel %vm2038_vm2, %v7537_v42, 0.0  ;;  %v7539_v44 = vld [vmem:[#allocation66_spill] sm:$0xff]  ;;  %v472_v42 = vld [vmem:[%s4248_s13 + $0x7e0] sm:$0xff] }
 0x350   : > { %v2609_v18 = vadd.f32 %v2608_v24, %v2607_v23  ;;  %v3382_v63 = vadd.f32 %v3381_v55, %v3380_v57  ;;  %v2974_v23 = vmul.f32 %v7538_v16, %v7538_v16  ;;  %v6610_v57 = vpop.f32.mrf.mxu2 }
 0x351   : > { %v6612_v17 = vpop.f32.mrf.mxu3  ;;  %2226 = vst.msk [vmem:[%s4295_s22 + $0x5d8] sm:$0xff] %vm2038_vm2, %v6610_v57  ;;  %v3387_v46 = vsel %vm2038_vm2, %v2973_v6, 0.0  ;;  %v2976_v6 = vmul.f32 %v5726_v13, %v5726_v13 }
 0x352   : > { %v2611_v0 = vadd.f32 %v2610_v38, %v2609_v18  ;;  %v3384_v26 = vadd.f32 %v3383_v19, %v3382_v63  ;;  %v2614_v19 = vsel %vm2038_vm2, %v7538_v16, 0.0  ;;  %v2975_v18 = vmul.f32 %v7539_v44, %v7539_v44  ;;  %2274 = vst.msk [vmem:[%s4295_s22 + $0x758] sm:$0xff] %vm2038_vm2, %v6612_v17 }
 0x354   : > { %v2613_v55 = vadd.f32 %v2612_v2, %v2611_v0  ;;  %v3386_v24 = vadd.f32 %v3385_v14, %v3384_v26  ;;  %v3389_v2 = vsel %vm2038_vm2, %v2974_v23, 0.0  ;;  %v2616_v0 = vsel %vm2038_vm2, %v7539_v44, 0.0 }
 0x355   : > { %v3391_v16 = vsel %vm2038_vm2, %v2975_v18, 0.0  ;;  %v2977_v23 = vmul.f32 %v5755_v29, %v5755_v29  ;;  %v2620_v44 = vsel %vm2038_vm2, %v5755_v29, 0.0  ;;  %v2979_v29 = vmul.f32 %v5836_v32, %v5836_v32 }
 0x356   : > { %v2615_v63 = vadd.f32 %v2614_v19, %v2613_v55  ;;  %v3388_v38 = vadd.f32 %v3387_v46, %v3386_v24  ;;  %3996 = vmatmul.msk.f32.gmra.mxu3 %vm480_vm1, %v472_v42  ;;  %v2618_v55 = vsel %vm2038_vm2, %v5726_v13, 0.0  ;;  %v3393_v19 = vsel %vm2038_vm2, %v2976_v6, 0.0 }
 0x358   : > { %v2617_v26 = vadd.f32 %v2616_v0, %v2615_v63  ;;  %v3390_v14 = vadd.f32 %v3389_v2, %v3388_v38  ;;  %v2978_v63 = vmul.f32 %v5797_v9, %v5797_v9  ;;  %v6642_v38 = vpop.f32.mrf.mxu2  ;;  %v3395_v2 = vsel %vm2038_vm2, %v2977_v23, 0.0 }
 0x359   : > { %v6644_v18 = vpop.f32.mrf.mxu3  ;;  %2227 = vst.msk [vmem:[%s4295_s22 + $0x5e0] sm:$0xff] %vm2038_vm2, %v6642_v38  ;;  %v2622_v0 = vsel %vm2038_vm2, %v5797_v9, 0.0  ;;  %v2980_v23 = vmul.f32 %v5875_v62, %v5875_v62 }
 0x35a   : > { %v2619_v24 = vadd.f32 %v2618_v55, %v2617_v26  ;;  %v3392_v46 = vadd.f32 %v3391_v16, %v3390_v14  ;;  %2275 = vst.msk [vmem:[%s4295_s22 + $0x760] sm:$0xff] %vm2038_vm2, %v6644_v18  ;;  %v473_v14 = vld [vmem:[%s4248_s13 + $0x7e8] sm:$0xff]  ;;  %v3397_v16 = vsel %vm2038_vm2, %v2978_v63, 0.0  ;;  %v2624_v55 = vsel %vm2038_vm2, %v5836_v32, 0.0 }
 0x35c   : > { %v2621_v42 = vadd.f32 %v2620_v44, %v2619_v24  ;;  %v3394_v13 = vadd.f32 %v3393_v19, %v3392_v46  ;;  %v3399_v46 = vsel %vm2038_vm2, %v2979_v29, 0.0  ;;  %v2626_v19 = vsel %vm2038_vm2, %v5875_v62, 0.0 }
 0x35d   : > { %v2981_v44 = vmul.f32 %v5914_v35, %v5914_v35 }
 0x35e   : > { %v2623_v6 = vadd.f32 %v2622_v0, %v2621_v42  ;;  %v3396_v26 = vadd.f32 %v3395_v2, %v3394_v13  ;;  %3997 = vmatmul.msk.f32.gmra.mxu3 %vm480_vm1, %v473_v14  ;;  %v3401_v42 = vsel %vm2038_vm2, %v2980_v23, 0.0  ;;  %v2628_v13 = vsel %vm2038_vm2, %v5914_v35, 0.0  ;;  %v474_v23 = vld [vmem:[%s4248_s13 + $0x7f0] sm:$0xff] }
 0x35f   : > { %v2982_v2 = vmul.f32 %v5953_v49, %v5953_v49  ;;  %v2630_v14 = vsel %vm2038_vm2, %v5953_v49, 0.0  ;;  %v2983_v35 = vmul.f32 %v5992_v28, %v5992_v28 }
 0x360   : > { %v2625_v9 = vadd.f32 %v2624_v55, %v2623_v6  ;;  %v3398_v24 = vadd.f32 %v3397_v16, %v3396_v26  ;;  %v6674_v0 = vpop.f32.mrf.mxu2  ;;  %v3403_v26 = vsel %vm2038_vm2, %v2981_v44, 0.0 }
 0x361   : > { %v6676_v29 = vpop.f32.mrf.mxu3  ;;  %2228 = vst.msk [vmem:[%s4295_s22 + $0x5e8] sm:$0xff] %vm2038_vm2, %v6674_v0  ;;  %v3407_v44 = vsel %vm2038_vm2, %v2983_v35, 0.0 }
 0x362   : > { %v2627_v63 = vadd.f32 %v2626_v19, %v2625_v9  ;;  %v3400_v32 = vadd.f32 %v3399_v46, %v3398_v24  ;;  %2276 = vst.msk [vmem:[%s4295_s22 + $0x768] sm:$0xff] %vm2038_vm2, %v6676_v29  ;;  %v3405_v9 = vsel %vm2038_vm2, %v2982_v2, 0.0  ;;  %v2632_v24 = vsel %vm2038_vm2, %v5992_v28, 0.0 }
 0x363   : > { %v2984_v46 = vmul.f32 %v6031_v52, %v6031_v52  ;;  %v2636_v2 = vsel %vm2038_vm2, %v6070_v31, 0.0 }
 0x364   : > { %v2629_v6 = vadd.f32 %v2628_v13, %v2627_v63  ;;  %v3402_v62 = vadd.f32 %v3401_v42, %v3400_v32  ;;  %v2634_v63 = vsel %vm2038_vm2, %v6031_v52, 0.0  ;;  %v2985_v32 = vmul.f32 %v6070_v31, %v6070_v31 }
 0x365   : > { %v3409_v13 = vsel %vm2038_vm2, %v2984_v46, 0.0  ;;  %v2987_v31 = vmul.f32 %v6148_v43, %v6148_v43  ;;  %v2640_v46 = vsel %vm2038_vm2, %v6148_v43, 0.0 }
 0x366   : > { %v2631_v16 = vadd.f32 %v2630_v14, %v2629_v6  ;;  %v3404_v55 = vadd.f32 %v3403_v26, %v3402_v62  ;;  %3998 = vmatmul.msk.f32.gmra.mxu3 %vm480_vm1, %v474_v23  ;;  %v2986_v6 = vmul.f32 %v6109_v37, %v6109_v37  ;;  %v3411_v35 = vsel %vm2038_vm2, %v2985_v32, 0.0 }
 0x367   : > { %v2989_v32 = vmul.f32 %v6226_v3, %v6226_v3 }
 0x368   : > { %v2633_v49 = vadd.f32 %v2632_v24, %v2631_v16  ;;  %v3406_v19 = vadd.f32 %v3405_v9, %v3404_v55  ;;  %v6706_v62 = vpop.f32.mrf.mxu2  ;;  %v2638_v16 = vsel %vm2038_vm2, %v6109_v37, 0.0  ;;  %v475_v9 = vld [vmem:[%s4248_s13 + $0x7f8] sm:$0xff]  ;;  %v3413_v24 = vsel %vm2038_vm2, %v2986_v6, 0.0  ;;  %s4072_s13 = sshra.s32 %s3615_s9, 4  ;;  %s4073_s13 = int_to_ptr.hbm [resolvable:$true] %s4072_s13 }
 0x369   : > { %v6708_v26 = vpop.f32.mrf.mxu3  ;;  %2229 = vst.msk [vmem:[%s4295_s22 + $0x5f0] sm:$0xff] %vm2038_vm2, %v6706_v62  ;;  %s4074_s14 = scalar_lea.hbm %s4073_s13, 1  ;;  %p4079_p0 = scmp.lt.s32.totalorder %s4073_s13, %s7302_s3 }
 0x36a   : > { %v2635_v42 = vadd.f32 %v2634_v63, %v2633_v49  ;;  %v3408_v28 = vadd.f32 %v3407_v44, %v3406_v19  ;;  %2277 = vst.msk [vmem:[%s4295_s22 + $0x770] sm:$0xff] %vm2038_vm2, %v6708_v26  ;;  %v2988_v49 = vmul.f32 %v6187_v50, %v6187_v50  ;;  %v3415_v44 = vsel %vm2038_vm2, %v2987_v31, 0.0  ;;  %p4075_p11 = scmp.ne.s32.totalorder %s4073_s13, %s4074_s14  ;;  %p4080_p1 = scmp.lt.s32.totalorder %s4078_s27, %s4074_s14 }
 0x36b   : > { %v2642_v63 = vsel %vm2038_vm2, %v6187_v50, 0.0  ;;  %v3419_v50 = vsel %vm2038_vm2, %v2989_v32, 0.0 }
 0x36c   : > { %v2637_v14 = vadd.f32 %v2636_v2, %v2635_v42  ;;  %v3410_v52 = vadd.f32 %v3409_v13, %v3408_v28  ;;  %v3417_v43 = vsel %vm2038_vm2, %v2988_v49, 0.0  ;;  %v2644_v13 = vsel %vm2038_vm2, %v6226_v3, 0.0  ;;  %p4076_p12 = pnand %p4075_p11, %p4217_p5  ;;  %p4081_p2 = por %p4080_p1, %p4079_p0 }
 0x36d   : > { %v2990_v2 = vmul.f32 %v6258_v33, %v6258_v33  ;;  %v2991_v3 = vmul.f32 %v6290_v8, %v6290_v8 }
 0x36e   : > { %v2639_v55 = vadd.f32 %v2638_v16, %v2637_v14  ;;  %v3412_v23 = vadd.f32 %v3411_v35, %v3410_v52  ;;  %3999 = vmatmul.msk.f32.gmra.mxu3 %vm480_vm1, %v475_v9  ;;  %v2646_v16 = vsel %vm2038_vm2, %v6258_v33, 0.0  ;;  %v2648_v9 = vsel %vm2038_vm2, %v6290_v8, 0.0  ;;  %p4077_p13 = pneg %p4076_p12 }
 0x36f   : > { %v3423_v33 = vsel %vm2038_vm2, %v2991_v3, 0.0  ;;  %v2652_v8 = vsel %vm2038_vm2, %v6355_v48, 0.0  ;;  %v2996_v3 = vmul.f32 %v6450_v22, %v6450_v22 }
 0x370   : > { %v2641_v37 = vadd.f32 %v2640_v46, %v2639_v55  ;;  %v3414_v19 = vadd.f32 %v3413_v24, %v3412_v23  ;;  %v6738_v6 = vpop.f32.mrf.mxu2  ;;  %v3421_v23 = vsel %vm2038_vm2, %v2990_v2, 0.0  ;;  %v2992_v24 = vmul.f32 %v6322_v58, %v6322_v58  ;;  %p4082_p3 = pnand %p4081_p2, %p4077_p13 }
 0x371   : > { %v6740_v14 = vpop.f32.mrf.mxu3  ;;  %2230 = vst.msk [vmem:[%s4295_s22 + $0x5f8] sm:$0xff] %vm2038_vm2, %v6738_v6  ;;  %v2654_v2 = vsel %vm2038_vm2, %v6386_v12, 0.0 }
 0x372   : > { %v2643_v42 = vadd.f32 %v2642_v63, %v2641_v37  ;;  %v3416_v28 = vadd.f32 %v3415_v44, %v3414_v19  ;;  %2278 = vst.msk [vmem:[%s4295_s22 + $0x778] sm:$0xff] %vm2038_vm2, %v6740_v14  ;;  %v2650_v37 = vsel %vm2038_vm2, %v6322_v58, 0.0  ;;  %v2993_v19 = vmul.f32 %v6355_v48, %v6355_v48 }
 0x373   : > { %v3425_v32 = vsel %vm2038_vm2, %v2992_v24, 0.0 }
 0x374   : > { %v2645_v52 = vadd.f32 %v2644_v13, %v2643_v42  ;;  %v3418_v35 = vadd.f32 %v3417_v43, %v3416_v28  ;;  %v2994_v42 = vmul.f32 %v6386_v12, %v6386_v12  ;;  %v3427_v58 = vsel %vm2038_vm2, %v2993_v19, 0.0 }
 0x375   : > { %v2658_v12 = vsel %vm2038_vm2, %v6450_v22, 0.0 }
 0x376   : > { %v3420_v31 = vadd.f32 %v3419_v50, %v3418_v35  ;;  %v2647_v55 = vadd.f32 %v2646_v16, %v2645_v52  ;;  %v2995_v52 = vmul.f32 %v6418_v34, %v6418_v34  ;;  %v3429_v50 = vsel %vm2038_vm2, %v2994_v42, 0.0 }
 0x377   : > { %v2656_v16 = vsel %vm2038_vm2, %v6418_v34, 0.0  ;;  %v2660_v34 = vsel %vm2038_vm2, %v6482_v41, 0.0 }
 0x378   : > { %v3422_v46 = vadd.f32 %v3421_v23, %v3420_v31  ;;  %v2649_v49 = vadd.f32 %v2648_v9, %v2647_v55  ;;  %v3431_v23 = vsel %vm2038_vm2, %v2995_v52, 0.0  ;;  %v2997_v9 = vmul.f32 %v6482_v41, %v6482_v41 }
 0x379   : > { %v6768_v28 = vpop.f32.mrf.mxu3 }
 0x37a   : > { %v3424_v44 = vadd.f32 %v3423_v33, %v3422_v46  ;;  %v2651_v63 = vadd.f32 %v2650_v37, %v2649_v49  ;;  %2279 = vst.msk [vmem:[%s4295_s22 + $0x780] sm:$0xff] %vm2038_vm2, %v6768_v28  ;;  %v3433_v49 = vsel %vm2038_vm2, %v2996_v3, 0.0  ;;  %v2998_v33 = vmul.f32 %v6514_v51, %v6514_v51 }
 0x37b   : > { %v3435_v22 = vsel %vm2038_vm2, %v2997_v9, 0.0  ;;  %v3002_v3 = vmul.f32 %v6642_v38, %v6642_v38  ;;  %v3003_v9 = vmul.f32 %v6674_v0, %v6674_v0 }
 0x37c   : > { %v3426_v43 = vadd.f32 %v3425_v32, %v3424_v44  ;;  %v2653_v13 = vadd.f32 %v2652_v8, %v2651_v63  ;;  %v2662_v63 = vsel %vm2038_vm2, %v6514_v51, 0.0  ;;  %v2999_v32 = vmul.f32 %v6546_v11, %v6546_v11 }
 0x37d   : > { %v3437_v42 = vsel %vm2038_vm2, %v2998_v33, 0.0  ;;  %v2666_v51 = vsel %vm2038_vm2, %v6578_v53, 0.0  ;;  %v3005_v33 = vmul.f32 %v6738_v6, %v6738_v6 }
 0x37e   : > { %v3428_v35 = vadd.f32 %v3427_v58, %v3426_v43  ;;  %v2655_v48 = vadd.f32 %v2654_v2, %v2653_v13  ;;  %v2664_v43 = vsel %vm2038_vm2, %v6546_v11, 0.0  ;;  %v3000_v13 = vmul.f32 %v6578_v53, %v6578_v53 }
 0x37f   : > { %v3439_v52 = vsel %vm2038_vm2, %v2999_v32, 0.0  ;;  %v2668_v11 = vsel %vm2038_vm2, %v6610_v57, 0.0 }
 0x380   : > { %v3430_v31 = vadd.f32 %v3429_v50, %v3428_v35  ;;  %v2657_v55 = vadd.f32 %v2656_v16, %v2655_v48  ;;  %v3001_v35 = vmul.f32 %v6610_v57, %v6610_v57  ;;  %v3441_v16 = vsel %vm2038_vm2, %v3000_v13, 0.0 }
 0x381   : > { %v6793_v37 = vpop.f32.mrf.mxu3 }
 0x382   : > { %v3432_v24 = vadd.f32 %v3431_v23, %v3430_v31  ;;  %v2659_v46 = vadd.f32 %v2658_v12, %v2657_v55  ;;  %2280 = vst.msk [vmem:[%s4295_s22 + $0x788] sm:$0xff] %vm2038_vm2, %v6793_v37  ;;  %v3443_v53 = vsel %vm2038_vm2, %v3001_v35, 0.0  ;;  %v2670_v12 = vsel %vm2038_vm2, %v6642_v38, 0.0 }
 0x383   : > { %v3447_v38 = vsel %vm2038_vm2, %v3003_v9, 0.0 }
 0x384   : > { %v3434_v19 = vadd.f32 %v3433_v49, %v3432_v24  ;;  %v2661_v44 = vadd.f32 %v2660_v34, %v2659_v46  ;;  %v3445_v46 = vsel %vm2038_vm2, %v3002_v3, 0.0  ;;  %v2672_v49 = vsel %vm2038_vm2, %v6674_v0, 0.0  ;;  %v7540_v0 = vld [vmem:[#allocation27_spill] sm:$0xff] }
 0x385   : > { %v3004_v34 = vmul.f32 %v6706_v62, %v6706_v62 }
 0x386   : > { %v3436_v8 = vadd.f32 %v3435_v22, %v3434_v19  ;;  %v2663_v41 = vadd.f32 %v2662_v63, %v2661_v44  ;;  %v2674_v22 = vsel %vm2038_vm2, %v6706_v62, 0.0  ;;  %v2676_v63 = vsel %vm2038_vm2, %v6738_v6, 0.0  ;;  %v7541_v62 = vld [vmem:[#allocation29_spill] sm:$0xff] }
 0x387   : > { %v2678_v6 = vsel %vm2038_vm2, %v7540_v0, 0.0 }
 0x388   : > { %v3438_v58 = vadd.f32 %v3437_v42, %v3436_v8  ;;  %v2665_v2 = vadd.f32 %v2664_v43, %v2663_v41  ;;  %v3006_v41 = vmul.f32 %v7540_v0, %v7540_v0  ;;  %v3449_v42 = vsel %vm2038_vm2, %v3004_v34, 0.0  ;;  %v7544_v34 = vld [vmem:[#allocation35_spill] sm:$0xff] }
 0x389   : > { %v6818_v31 = vpop.f32.mrf.mxu3  ;;  %v3451_v43 = vsel %vm2038_vm2, %v3005_v33, 0.0  ;;  %v3010_v33 = vmul.f32 %v7544_v34, %v7544_v34 }
 0x38a   : > { %v3440_v48 = vadd.f32 %v3439_v52, %v3438_v58  ;;  %v2667_v50 = vadd.f32 %v2666_v51, %v2665_v2  ;;  %2281 = vst.msk [vmem:[%s4295_s22 + $0x790] sm:$0xff] %vm2038_vm2, %v6818_v31  ;;  %v3007_v52 = vmul.f32 %v7541_v62, %v7541_v62 }
 0x38c   : > { %v3442_v55 = vadd.f32 %v3441_v16, %v3440_v48  ;;  %v2669_v23 = vadd.f32 %v2668_v11, %v2667_v50  ;;  %v2680_v48 = vsel %vm2038_vm2, %v7541_v62, 0.0  ;;  %v7542_v50 = vld [vmem:[#allocation31_spill] sm:$0xff]  ;;  %v3453_v11 = vsel %vm2038_vm2, %v3006_v41, 0.0 }
 0x38d   : > { %v3008_v16 = vmul.f32 %v7542_v50, %v7542_v50 }
 0x38e   : > { %v3444_v24 = vadd.f32 %v3443_v53, %v3442_v55  ;;  %v2671_v57 = vadd.f32 %v2670_v12, %v2669_v23  ;;  %v3455_v23 = vsel %vm2038_vm2, %v3007_v52, 0.0  ;;  %v2682_v53 = vsel %vm2038_vm2, %v7542_v50, 0.0  ;;  %v7543_v12 = vld [vmem:[#allocation33_spill] sm:$0xff] }
 0x38f   : > { %v3009_v9 = vmul.f32 %v7543_v12, %v7543_v12 }
 0x390   : > { %v3446_v19 = vadd.f32 %v3445_v46, %v3444_v24  ;;  %v2673_v44 = vadd.f32 %v2672_v49, %v2671_v57  ;;  %v3457_v46 = vsel %vm2038_vm2, %v3008_v16, 0.0  ;;  %v2684_v49 = vsel %vm2038_vm2, %v7543_v12, 0.0 }
 0x391   : > { %v6844_v13 = vpop.f32.mrf.mxu3 }
 0x392   : > { %v3448_v32 = vadd.f32 %v3447_v38, %v3446_v19  ;;  %v2675_v8 = vadd.f32 %v2674_v22, %v2673_v44  ;;  %2282 = vst.msk [vmem:[%s4295_s22 + $0x798] sm:$0xff] %vm2038_vm2, %v6844_v13  ;;  %v3459_v22 = vsel %vm2038_vm2, %v3009_v9, 0.0 }
 0x394   : > { %v3450_v58 = vadd.f32 %v3449_v42, %v3448_v32  ;;  %v2677_v2 = vadd.f32 %v2676_v63, %v2675_v8  ;;  %v2686_v63 = vsel %vm2038_vm2, %v7544_v34, 0.0  ;;  %v7545_v32 = vld [vmem:[#allocation37_spill] sm:$0xff]  ;;  %v3461_v42 = vsel %vm2038_vm2, %v3010_v33, 0.0 }
 0x395   : > { %v3011_v8 = vmul.f32 %v7545_v32, %v7545_v32 }
 0x396   : > { %v2679_v51 = vadd.f32 %v2678_v6, %v2677_v2  ;;  %v3452_v35 = vadd.f32 %v3451_v43, %v3450_v58  ;;  %v2688_v43 = vsel %vm2038_vm2, %v7545_v32, 0.0  ;;  %v7546_v58 = vld [vmem:[#allocation39_spill] sm:$0xff] }
 0x397   : > { %v3012_v2 = vmul.f32 %v7546_v58, %v7546_v58  ;;  %v3463_v6 = vsel %vm2038_vm2, %v3011_v8, 0.0 }
 0x398   : > { %v2681_v3 = vadd.f32 %v2680_v48, %v2679_v51  ;;  %v3454_v55 = vadd.f32 %v3453_v11, %v3452_v35  ;;  %v2690_v51 = vsel %vm2038_vm2, %v7546_v58, 0.0  ;;  %v7547_v35 = vld [vmem:[#allocation41_spill] sm:$0xff] }
 0x399   : > { %v6868_v19 = vpop.f32.mrf.mxu3  ;;  %v3013_v48 = vmul.f32 %v7547_v35, %v7547_v35  ;;  %v3465_v11 = vsel %vm2038_vm2, %v3012_v2, 0.0 }
 0x39a   : > { %v2683_v24 = vadd.f32 %v2682_v53, %v2681_v3  ;;  %v3456_v57 = vadd.f32 %v3455_v23, %v3454_v55  ;;  %2283 = vst.msk [vmem:[%s4295_s22 + $0x7a0] sm:$0xff] %vm2038_vm2, %v6868_v19  ;;  %v2692_v3 = vsel %vm2038_vm2, %v7547_v35, 0.0  ;;  %v7548_v55 = vld [vmem:[#allocation43_spill] sm:$0xff] }
 0x39b   : > { %v3014_v23 = vmul.f32 %v7548_v55, %v7548_v55 }
 0x39c   : > { %v2685_v44 = vadd.f32 %v2684_v49, %v2683_v24  ;;  %v3458_v38 = vadd.f32 %v3457_v46, %v3456_v57  ;;  %v3467_v24 = vsel %vm2038_vm2, %v3013_v48, 0.0  ;;  %v2694_v57 = vsel %vm2038_vm2, %v7548_v55, 0.0  ;;  %v7549_v46 = vld [vmem:[#allocation45_spill] sm:$0xff] }
 0x39d   : > { %v3015_v49 = vmul.f32 %v7549_v46, %v7549_v46 }
 0x39e   : > { %v2687_v0 = vadd.f32 %v2686_v63, %v2685_v44  ;;  %v3460_v41 = vadd.f32 %v3459_v22, %v3458_v38  ;;  %v3469_v44 = vsel %vm2038_vm2, %v3014_v23, 0.0  ;;  %v2696_v38 = vsel %vm2038_vm2, %v7549_v46, 0.0  ;;  %v7550_v22 = vld [vmem:[#allocation47_spill] sm:$0xff] }
 0x39f   : > { %v3016_v63 = vmul.f32 %v7550_v22, %v7550_v22 }
 0x3a0   : > { %v2689_v62 = vadd.f32 %v2688_v43, %v2687_v0  ;;  %v3462_v52 = vadd.f32 %v3461_v42, %v3460_v41  ;;  %v3471_v0 = vsel %vm2038_vm2, %v3015_v49, 0.0  ;;  %v2698_v41 = vsel %vm2038_vm2, %v7550_v22, 0.0  ;;  %v7551_v42 = vld [vmem:[#allocation50_spill] sm:$0xff] }
 0x3a1   : > { %v6893_v53 = vpop.f32.mrf.mxu3  ;;  %v3017_v43 = vmul.f32 %v7551_v42, %v7551_v42 }
 0x3a2   : > { %v2691_v50 = vadd.f32 %v2690_v51, %v2689_v62  ;;  %v3464_v16 = vadd.f32 %v3463_v6, %v3462_v52  ;;  %2284 = vst.msk [vmem:[%s4295_s22 + $0x7a8] sm:$0xff] %vm2038_vm2, %v6893_v53  ;;  %v3473_v62 = vsel %vm2038_vm2, %v3016_v63, 0.0  ;;  %v2700_v52 = vsel %vm2038_vm2, %v7551_v42, 0.0  ;;  %v7552_v6 = vld [vmem:[#allocation53_spill] sm:$0xff] }
 0x3a3   : > { %v3018_v51 = vmul.f32 %v7552_v6, %v7552_v6 }
 0x3a4   : > { %v2693_v12 = vadd.f32 %v2692_v3, %v2691_v50  ;;  %v3466_v9 = vadd.f32 %v3465_v11, %v3464_v16  ;;  %v3475_v16 = vsel %vm2038_vm2, %v3017_v43, 0.0  ;;  %v2702_v11 = vsel %vm2038_vm2, %v7552_v6, 0.0  ;;  %v7553_v3 = vld [vmem:[#allocation56_spill] sm:$0xff]  ;;  %v7557_v6 = vld [vmem:[#allocation67_spill] sm:$0xff] }
 0x3a5   : > { %v3019_v55 = vmul.f32 %v7553_v3, %v7553_v3 }
 0x3a6   : > { %v2695_v34 = vadd.f32 %v2694_v57, %v2693_v12  ;;  %v3468_v33 = vadd.f32 %v3467_v24, %v3466_v9  ;;  %v3477_v9 = vsel %vm2038_vm2, %v3018_v51, 0.0  ;;  %v2704_v24 = vsel %vm2038_vm2, %v7553_v3, 0.0  ;;  %v7554_v57 = vld [vmem:[#allocation59_spill] sm:$0xff] }
 0x3a7   : > { %v3020_v46 = vmul.f32 %v7554_v57, %v7554_v57  ;;  %v3023_v51 = vmul.f32 %v7557_v6, %v7557_v6  ;;  %v3024_v3 = vmul.f32 %v5728_v21, %v5728_v21 }
 0x3a8   : > { %v2697_v32 = vadd.f32 %v2696_v38, %v2695_v34  ;;  %v3470_v8 = vadd.f32 %v3469_v44, %v3468_v33  ;;  %v3479_v33 = vsel %vm2038_vm2, %v3019_v55, 0.0  ;;  %v2706_v44 = vsel %vm2038_vm2, %v7554_v57, 0.0  ;;  %v7555_v38 = vld [vmem:[#allocation62_spill] sm:$0xff] }
 0x3a9   : > { %v6918_v35 = vpop.f32.mrf.mxu3  ;;  %v3021_v22 = vmul.f32 %v7555_v38, %v7555_v38 }
 0x3aa   : > { %v2699_v58 = vadd.f32 %v2698_v41, %v2697_v32  ;;  %v3472_v2 = vadd.f32 %v3471_v0, %v3470_v8  ;;  %2285 = vst.msk [vmem:[%s4295_s22 + $0x7b0] sm:$0xff] %vm2038_vm2, %v6918_v35  ;;  %v3481_v8 = vsel %vm2038_vm2, %v3020_v46, 0.0  ;;  %v2708_v0 = vsel %vm2038_vm2, %v7555_v38, 0.0  ;;  %v7556_v41 = vld [vmem:[#allocation65_spill] sm:$0xff] }
 0x3ab   : > { %v3022_v42 = vmul.f32 %v7556_v41, %v7556_v41 }
 0x3ac   : > { %v2701_v48 = vadd.f32 %v2700_v52, %v2699_v58  ;;  %v3474_v50 = vadd.f32 %v3473_v62, %v3472_v2  ;;  %v3483_v62 = vsel %vm2038_vm2, %v3021_v22, 0.0  ;;  %v2710_v52 = vsel %vm2038_vm2, %v7556_v41, 0.0 }
 0x3ad   : > { %v2720_v41 = vsel %vm2038_vm2, %v5838_v20, 0.0 }
 0x3ae   : > { %v2703_v23 = vadd.f32 %v2702_v11, %v2701_v48  ;;  %v3476_v12 = vadd.f32 %v3475_v16, %v3474_v50  ;;  %v3485_v16 = vsel %vm2038_vm2, %v3022_v42, 0.0  ;;  %v2712_v11 = vsel %vm2038_vm2, %v7557_v6, 0.0 }
 0x3af   : > { %v3028_v42 = vmul.f32 %v5877_v40, %v5877_v40 }
 0x3b0   : > { %v2705_v49 = vadd.f32 %v2704_v24, %v2703_v23  ;;  %v3478_v34 = vadd.f32 %v3477_v9, %v3476_v12  ;;  %v3487_v12 = vsel %vm2038_vm2, %v3023_v51, 0.0  ;;  %v2714_v9 = vsel %vm2038_vm2, %v5728_v21, 0.0 }
 0x3b1   : > { %v6943_v43 = vpop.f32.mrf.mxu3  ;;  %v3025_v24 = vmul.f32 %v5757_v36, %v5757_v36 }
 0x3b2   : > { %v2707_v63 = vadd.f32 %v2706_v44, %v2705_v49  ;;  %v3480_v32 = vadd.f32 %v3479_v33, %v3478_v34  ;;  %2286 = vst.msk [vmem:[%s4295_s22 + $0x7b8] sm:$0xff] %vm2038_vm2, %v6943_v43  ;;  %v3489_v49 = vsel %vm2038_vm2, %v3024_v3, 0.0  ;;  %v2716_v34 = vsel %vm2038_vm2, %v5757_v36, 0.0 }
 0x3b3   : > { %v3026_v33 = vmul.f32 %v5799_v61, %v5799_v61  ;;  %v3491_v21 = vsel %vm2038_vm2, %v3025_v24, 0.0  ;;  %v2728_v24 = vsel %vm2038_vm2, %v5994_v47, 0.0 }
 0x3b4   : > { %v2709_v58 = vadd.f32 %v2708_v0, %v2707_v63  ;;  %v3482_v2 = vadd.f32 %v3481_v8, %v3480_v32  ;;  %v2718_v63 = vsel %vm2038_vm2, %v5799_v61, 0.0  ;;  %v3027_v32 = vmul.f32 %v5838_v20, %v5838_v20 }
 0x3b5   : > { %v3493_v0 = vsel %vm2038_vm2, %v3026_v33, 0.0  ;;  %v2722_v61 = vsel %vm2038_vm2, %v5877_v40, 0.0  ;;  %v2724_v20 = vsel %vm2038_vm2, %v5916_v5, 0.0  ;;  %v3033_v33 = vmul.f32 %v6072_v15, %v6072_v15 }
 0x3b6   : > { %v2711_v48 = vadd.f32 %v2710_v52, %v2709_v58  ;;  %v3484_v50 = vadd.f32 %v3483_v62, %v3482_v2  ;;  %v3495_v62 = vsel %vm2038_vm2, %v3027_v32, 0.0  ;;  %v3029_v52 = vmul.f32 %v5916_v5, %v5916_v5 }
 0x3b8   : > { %v2713_v55 = vadd.f32 %v2712_v11, %v2711_v48  ;;  %v3486_v23 = vadd.f32 %v3485_v16, %v3484_v50  ;;  %v3497_v48 = vsel %vm2038_vm2, %v3028_v42, 0.0  ;;  %v3030_v50 = vmul.f32 %v5955_v1, %v5955_v1 }
 0x3b9   : > { %v6968_v44 = vpop.f32.mrf.mxu3  ;;  %v3499_v40 = vsel %vm2038_vm2, %v3029_v52, 0.0 }
 0x3ba   : > { %v2715_v57 = vadd.f32 %v2714_v9, %v2713_v55  ;;  %v3488_v46 = vadd.f32 %v3487_v12, %v3486_v23  ;;  %2287 = vst.msk [vmem:[%s4295_s22 + $0x7c0] sm:$0xff] %vm2038_vm2, %v6968_v44  ;;  %v2726_v55 = vsel %vm2038_vm2, %v5955_v1, 0.0  ;;  %v3031_v23 = vmul.f32 %v5994_v47, %v5994_v47 }
 0x3bb   : > { %v3501_v9 = vsel %vm2038_vm2, %v3030_v50, 0.0  ;;  %v2730_v1 = vsel %vm2038_vm2, %v6033_v25, 0.0  ;;  %v2732_v47 = vsel %vm2038_vm2, %v6072_v15, 0.0 }
 0x3bc   : > { %v2717_v38 = vadd.f32 %v2716_v34, %v2715_v57  ;;  %v3490_v22 = vadd.f32 %v3489_v49, %v3488_v46  ;;  %v3032_v57 = vmul.f32 %v6033_v25, %v6033_v25  ;;  %v3503_v34 = vsel %vm2038_vm2, %v3031_v23, 0.0 }
 0x3bd   : > { %v3507_v25 = vsel %vm2038_vm2, %v3033_v33, 0.0  ;;  %v2742_v23 = vsel %vm2038_vm2, %v6260_v39, 0.0 }
 0x3be   : > { %v2719_v8 = vadd.f32 %v2718_v63, %v2717_v38  ;;  %v3492_v36 = vadd.f32 %v3491_v21, %v3490_v22  ;;  %v3505_v21 = vsel %vm2038_vm2, %v3032_v57, 0.0  ;;  %v3034_v63 = vmul.f32 %v6111_v30, %v6111_v30 }
 0x3bf   : > { %v3040_v57 = vmul.f32 %v6324_v54, %v6324_v54 }
 0x3c0   : > { %v2721_v58 = vadd.f32 %v2720_v41, %v2719_v8  ;;  %v3494_v2 = vadd.f32 %v3493_v0, %v3492_v36  ;;  %v2734_v0 = vsel %vm2038_vm2, %v6111_v30, 0.0  ;;  %v3035_v41 = vmul.f32 %v6150_v56, %v6150_v56 }
 0x3c1   : > { %v6993_v16 = vpop.f32.mrf.mxu3  ;;  %v2738_v30 = vsel %vm2038_vm2, %v6189_v27, 0.0 }
 0x3c2   : > { %v2723_v6 = vadd.f32 %v2722_v61, %v2721_v58  ;;  %v3496_v51 = vadd.f32 %v3495_v62, %v3494_v2  ;;  %2288 = vst.msk [vmem:[%s4295_s22 + $0x7c8] sm:$0xff] %vm2038_vm2, %v6993_v16  ;;  %v3509_v58 = vsel %vm2038_vm2, %v3034_v63, 0.0  ;;  %v2736_v2 = vsel %vm2038_vm2, %v6150_v56, 0.0 }
 0x3c3   : > { %v3036_v62 = vmul.f32 %v6189_v27, %v6189_v27  ;;  %v2740_v56 = vsel %vm2038_vm2, %v6228_v7, 0.0 }
 0x3c4   : > { %v2725_v11 = vadd.f32 %v2724_v20, %v2723_v6  ;;  %v3498_v3 = vadd.f32 %v3497_v48, %v3496_v51  ;;  %v3511_v6 = vsel %vm2038_vm2, %v3035_v41, 0.0  ;;  %v3037_v51 = vmul.f32 %v6228_v7, %v6228_v7 }
 0x3c5   : > { %v3513_v50 = vsel %vm2038_vm2, %v3036_v62, 0.0 }
 0x3c6   : > { %v3500_v12 = vadd.f32 %v3499_v40, %v3498_v3  ;;  %v2727_v5 = vadd.f32 %v2726_v55, %v2725_v11  ;;  %v3038_v11 = vmul.f32 %v6260_v39, %v6260_v39  ;;  %v3515_v27 = vsel %vm2038_vm2, %v3037_v51, 0.0 }
 0x3c7   : > { %v2746_v39 = vsel %vm2038_vm2, %v6324_v54, 0.0 }
 0x3c8   : > { %v2729_v46 = vadd.f32 %v2728_v24, %v2727_v5  ;;  %v3502_v49 = vadd.f32 %v3501_v9, %v3500_v12  ;;  %v3039_v12 = vmul.f32 %v6292_v45, %v6292_v45  ;;  %v3517_v9 = vsel %vm2038_vm2, %v3038_v11, 0.0 }
 0x3c9   : > { %v7018_v32 = vpop.f32.mrf.mxu3  ;;  %v2744_v24 = vsel %vm2038_vm2, %v6292_v45, 0.0  ;;  %v2748_v45 = vsel %vm2038_vm2, %v6357_v4, 0.0 }
 0x3ca   : > { %v2731_v38 = vadd.f32 %v2730_v1, %v2729_v46  ;;  %v3504_v22 = vadd.f32 %v3503_v34, %v3502_v49  ;;  %2289 = vst.msk [vmem:[%s4295_s22 + $0x7d0] sm:$0xff] %vm2038_vm2, %v7018_v32  ;;  %v3519_v34 = vsel %vm2038_vm2, %v3039_v12, 0.0  ;;  %v3041_v1 = vmul.f32 %v6357_v4, %v6357_v4 }
 0x3cc   : > { %v2733_v8 = vadd.f32 %v2732_v47, %v2731_v38  ;;  %v3506_v36 = vadd.f32 %v3505_v21, %v3504_v22  ;;  %v3521_v22 = vsel %vm2038_vm2, %v3040_v57, 0.0  ;;  %v3042_v21 = vmul.f32 %v6388_v60, %v6388_v60 }
 0x3cd   : > { %v3523_v54 = vsel %vm2038_vm2, %v3041_v1, 0.0 }
 0x3ce   : > { %v2735_v42 = vadd.f32 %v2734_v0, %v2733_v8  ;;  %v3508_v15 = vadd.f32 %v3507_v25, %v3506_v36  ;;  %v2750_v36 = vsel %vm2038_vm2, %v6388_v60, 0.0  ;;  %v3043_v25 = vmul.f32 %v6420_v10, %v6420_v10 }
 0x3cf   : > { %v3525_v41 = vsel %vm2038_vm2, %v3042_v21, 0.0  ;;  %v2754_v60 = vsel %vm2038_vm2, %v6452_v59, 0.0 }
 0x3d0   : > { %v2737_v61 = vadd.f32 %v2736_v2, %v2735_v42  ;;  %v3510_v52 = vadd.f32 %v3509_v58, %v3508_v15  ;;  %v2752_v42 = vsel %vm2038_vm2, %v6420_v10, 0.0  ;;  %v3044_v15 = vmul.f32 %v6452_v59, %v6452_v59 }
 0x3d1   : > { %v7043_v3 = vpop.f32.mrf.mxu3  ;;  %v3527_v62 = vsel %vm2038_vm2, %v3043_v25, 0.0  ;;  %v3051_v25 = vmul.f32 %v6676_v29, %v6676_v29 }
 0x3d2   : > { %v2739_v48 = vadd.f32 %v2738_v30, %v2737_v61  ;;  %v3512_v20 = vadd.f32 %v3511_v6, %v3510_v52  ;;  %2290 = vst.msk [vmem:[%s4295_s22 + $0x7d8] sm:$0xff] %vm2038_vm2, %v7043_v3  ;;  %v7558_v61 = vld [vmem:[#allocation10_spill] sm:$0xff]  ;;  %v3529_v51 = vsel %vm2038_vm2, %v3044_v15, 0.0 }
 0x3d3   : > { %v3045_v52 = vmul.f32 %v7558_v61, %v7558_v61  ;;  %v2756_v10 = vsel %vm2038_vm2, %v7558_v61, 0.0 }
 0x3d4   : > { %v2741_v40 = vadd.f32 %v2740_v56, %v2739_v48  ;;  %v3514_v55 = vadd.f32 %v3513_v50, %v3512_v20  ;;  %v7559_v48 = vld [vmem:[#allocation12_spill] sm:$0xff] }
 0x3d5   : > { %v3046_v20 = vmul.f32 %v7559_v48, %v7559_v48  ;;  %v3531_v59 = vsel %vm2038_vm2, %v3045_v52, 0.0 }
 0x3d6   : > { %v2743_v5 = vadd.f32 %v2742_v23, %v2741_v40  ;;  %v3516_v7 = vadd.f32 %v3515_v27, %v3514_v55  ;;  %v2758_v40 = vsel %vm2038_vm2, %v7559_v48, 0.0  ;;  %v7560_v55 = vld [vmem:[#allocation48_spill] sm:$0xff]  ;;  %v2774_v48 = vsel %vm2038_vm2, %v6768_v28, 0.0 }
 0x3d7   : > { %v3047_v27 = vmul.f32 %v7560_v55, %v7560_v55 }
 0x3d8   : > { %v2745_v46 = vadd.f32 %v2744_v24, %v2743_v5  ;;  %v3518_v49 = vadd.f32 %v3517_v9, %v3516_v7  ;;  %v3533_v5 = vsel %vm2038_vm2, %v3046_v20, 0.0  ;;  %v2760_v7 = vsel %vm2038_vm2, %v7560_v55, 0.0  ;;  %v7561_v9 = vld [vmem:[#allocation51_spill] sm:$0xff] }
 0x3d9   : > { %v7068_v47 = vpop.f32.mrf.mxu3  ;;  %v3048_v24 = vmul.f32 %v7561_v9, %v7561_v9  ;;  %v3055_v20 = vmul.f32 %v6793_v37, %v6793_v37 }
 0x3da   : > { %v2747_v33 = vadd.f32 %v2746_v39, %v2745_v46  ;;  %v3520_v38 = vadd.f32 %v3519_v34, %v3518_v49  ;;  %2291 = vst.msk [vmem:[%s4295_s22 + $0x7e0] sm:$0xff] %vm2038_vm2, %v7068_v47  ;;  %v3535_v49 = vsel %vm2038_vm2, %v3047_v27, 0.0  ;;  %v2762_v34 = vsel %vm2038_vm2, %v7561_v9, 0.0 }
 0x3db   : > { %v3049_v39 = vmul.f32 %v6612_v17, %v6612_v17 }
 0x3dc   : > { %v2749_v63 = vadd.f32 %v2748_v45, %v2747_v33  ;;  %v3522_v8 = vadd.f32 %v3521_v22, %v3520_v38  ;;  %v3537_v38 = vsel %vm2038_vm2, %v3048_v24, 0.0  ;;  %v2764_v22 = vsel %vm2038_vm2, %v6612_v17, 0.0 }
 0x3dd   : > { %v3050_v45 = vmul.f32 %v6644_v18, %v6644_v18  ;;  %v3058_v24 = vmul.f32 %v6868_v19, %v6868_v19 }
 0x3de   : > { %v2751_v0 = vadd.f32 %v2750_v36, %v2749_v63  ;;  %v3524_v4 = vadd.f32 %v3523_v54, %v3522_v8  ;;  %v3539_v54 = vsel %vm2038_vm2, %v3049_v39, 0.0  ;;  %v2766_v36 = vsel %vm2038_vm2, %v6644_v18, 0.0 }
 0x3df   : > { %v2770_v18 = vsel %vm2038_vm2, %v6708_v26, 0.0 }
 0x3e0   : > { %v2753_v58 = vadd.f32 %v2752_v42, %v2751_v0  ;;  %v3526_v2 = vadd.f32 %v3525_v41, %v3524_v4  ;;  %v3541_v4 = vsel %vm2038_vm2, %v3050_v45, 0.0  ;;  %v2768_v41 = vsel %vm2038_vm2, %v6676_v29, 0.0 }
 0x3e1   : > { %v7093_v50 = vpop.f32.mrf.mxu3  ;;  %v3052_v42 = vmul.f32 %v6708_v26, %v6708_v26  ;;  %v2772_v29 = vsel %vm2038_vm2, %v6740_v14, 0.0 }
 0x3e2   : > { %v2755_v6 = vadd.f32 %v2754_v60, %v2753_v58  ;;  %v3528_v30 = vadd.f32 %v3527_v62, %v3526_v2  ;;  %2292 = vst.msk [vmem:[%s4295_s22 + $0x7e8] sm:$0xff] %vm2038_vm2, %v7093_v50  ;;  %v3543_v2 = vsel %vm2038_vm2, %v3051_v25, 0.0  ;;  %v3053_v62 = vmul.f32 %v6740_v14, %v6740_v14 }
 0x3e3   : > { %v3545_v52 = vsel %vm2038_vm2, %v3052_v42, 0.0  ;;  %v3063_v42 = vmul.f32 %v6993_v16, %v6993_v16 }
 0x3e4   : > { %v2757_v56 = vadd.f32 %v2756_v10, %v2755_v6  ;;  %v3530_v11 = vadd.f32 %v3529_v51, %v3528_v30  ;;  %v3054_v6 = vmul.f32 %v6768_v28, %v6768_v28  ;;  %v3547_v26 = vsel %vm2038_vm2, %v3053_v62, 0.0 }
 0x3e5   : > { %v2778_v28 = vsel %vm2038_vm2, %v6818_v31, 0.0 }
 0x3e6   : > { %v2759_v23 = vadd.f32 %v2758_v40, %v2757_v56  ;;  %v3532_v12 = vadd.f32 %v3531_v59, %v3530_v11  ;;  %v3549_v11 = vsel %vm2038_vm2, %v3054_v6, 0.0  ;;  %v2776_v59 = vsel %vm2038_vm2, %v6793_v37, 0.0 }
 0x3e7   : > { %v3056_v40 = vmul.f32 %v6818_v31, %v6818_v31  ;;  %v2780_v37 = vsel %vm2038_vm2, %v6844_v13, 0.0  ;;  %v2782_v31 = vsel %vm2038_vm2, %v6868_v19, 0.0  ;;  %v2786_v19 = vsel %vm2038_vm2, %v6918_v35, 0.0 }
 0x3e8   : > { %v2761_v57 = vadd.f32 %v2760_v7, %v2759_v23  ;;  %v3534_v46 = vadd.f32 %v3533_v5, %v3532_v12  ;;  %v3551_v23 = vsel %vm2038_vm2, %v3055_v20, 0.0  ;;  %v3057_v12 = vmul.f32 %v6844_v13, %v6844_v13 }
 0x3e9   : > { %v7118_v21 = vpop.f32.mrf.mxu3  ;;  %v3553_v9 = vsel %vm2038_vm2, %v3056_v40, 0.0  ;;  %v2784_v13 = vsel %vm2038_vm2, %v6893_v53, 0.0 }
 0x3ea   : > { %v2763_v1 = vadd.f32 %v2762_v34, %v2761_v57  ;;  %v3536_v33 = vadd.f32 %v3535_v49, %v3534_v46  ;;  %2293 = vst.msk [vmem:[%s4295_s22 + $0x7f0] sm:$0xff] %vm2038_vm2, %v7118_v21  ;;  %v3555_v49 = vsel %vm2038_vm2, %v3057_v12, 0.0  ;;  %v3059_v34 = vmul.f32 %v6893_v53, %v6893_v53 }
 0x3eb   : > { %v2788_v53 = vsel %vm2038_vm2, %v6943_v43, 0.0  ;;  %v3068_v40 = vmul.f32 %v7118_v21, %v7118_v21 }
 0x3ec   : > { %v2765_v63 = vadd.f32 %v2764_v22, %v2763_v1  ;;  %v3538_v8 = vadd.f32 %v3537_v38, %v3536_v33  ;;  %v3557_v33 = vsel %vm2038_vm2, %v3058_v24, 0.0  ;;  %v3060_v38 = vmul.f32 %v6918_v35, %v6918_v35 }
 0x3ed   : > { %v2790_v35 = vsel %vm2038_vm2, %v6968_v44, 0.0 }
 0x3ee   : > { %v2767_v0 = vadd.f32 %v2766_v36, %v2765_v63  ;;  %v3540_v17 = vadd.f32 %v3539_v54, %v3538_v8  ;;  %v3559_v63 = vsel %vm2038_vm2, %v3059_v34, 0.0  ;;  %v3061_v8 = vmul.f32 %v6943_v43, %v6943_v43 }
 0x3ef   : > { %v3561_v25 = vsel %vm2038_vm2, %v3060_v38, 0.0  ;;  %v2792_v43 = vsel %vm2038_vm2, %v6993_v16, 0.0  ;;  %v2796_v16 = vsel %vm2038_vm2, %v7043_v3, 0.0 }
 0x3f0   : > { %v2769_v15 = vadd.f32 %v2768_v41, %v2767_v0  ;;  %v3542_v58 = vadd.f32 %v3541_v4, %v3540_v17  ;;  %v3062_v0 = vmul.f32 %v6968_v44, %v6968_v44  ;;  %v3563_v41 = vsel %vm2038_vm2, %v3061_v8, 0.0 }
 0x3f1   : > { %v7143_v30 = vpop.f32.mrf.mxu3  ;;  %v2794_v44 = vsel %vm2038_vm2, %v7018_v32, 0.0 }
 0x3f2   : > { %v2771_v60 = vadd.f32 %v2770_v18, %v2769_v15  ;;  %v3544_v61 = vadd.f32 %v3543_v2, %v3542_v58  ;;  %2294 = vst.msk [vmem:[%s4295_s22 + $0x7f8] sm:$0xff] %vm2038_vm2, %v7143_v30  ;;  %v3565_v2 = vsel %vm2038_vm2, %v3062_v0, 0.0  ;;  %v3064_v18 = vmul.f32 %v7018_v32, %v7018_v32 }
 0x3f3   : > { %v2798_v32 = vsel %vm2038_vm2, %v7068_v47, 0.0  ;;  %v2804_v12 = vsel %vm2038_vm2, %v7143_v30, 0.0 }
 0x3f4   : > { %v2773_v51 = vadd.f32 %v2772_v29, %v2771_v60  ;;  %v3546_v10 = vadd.f32 %v3545_v52, %v3544_v61  ;;  %v3567_v61 = vsel %vm2038_vm2, %v3063_v42, 0.0  ;;  %v3065_v52 = vmul.f32 %v7043_v3, %v7043_v3 }
 0x3f5   : > { %v2800_v3 = vsel %vm2038_vm2, %v7093_v50, 0.0 }
 0x3f6   : > { %v3548_v56 = vadd.f32 %v3547_v26, %v3546_v10  ;;  %v2775_v14 = vadd.f32 %v2774_v48, %v2773_v51  ;;  %v3569_v51 = vsel %vm2038_vm2, %v3064_v18, 0.0  ;;  %v3066_v10 = vmul.f32 %v7068_v47, %v7068_v47 }
 0x3f7   : > { %v3571_v20 = vsel %vm2038_vm2, %v3065_v52, 0.0 }
 0x3f8   : > { %v3550_v55 = vadd.f32 %v3549_v11, %v3548_v56  ;;  %v2777_v27 = vadd.f32 %v2776_v59, %v2775_v14  ;;  %v3067_v56 = vmul.f32 %v7093_v50, %v7093_v50  ;;  %v3573_v59 = vsel %vm2038_vm2, %v3066_v10, 0.0 }
 0x3fa   : > { %v3552_v5 = vadd.f32 %v3551_v23, %v3550_v55  ;;  %v2779_v7 = vadd.f32 %v2778_v28, %v2777_v27  ;;  %v3069_v55 = vmul.f32 %v7143_v30, %v7143_v30  ;;  %v3575_v47 = vsel %vm2038_vm2, %v3067_v56, 0.0 }
 0x3fb   : > { %v2802_v28 = vsel %vm2038_vm2, %v7118_v21, 0.0 }
 0x3fc   : > { %v3554_v57 = vadd.f32 %v3553_v9, %v3552_v5  ;;  %v2781_v46 = vadd.f32 %v2780_v37, %v2779_v7  ;;  %v3577_v7 = vsel %vm2038_vm2, %v3068_v40, 0.0  ;;  %v3579_v9 = vsel %vm2038_vm2, %v3069_v55, 0.0 }
 0x3fe   : > { %v3556_v39 = vadd.f32 %v3555_v49, %v3554_v57  ;;  %v2783_v1 = vadd.f32 %v2782_v31, %v2781_v46 }
 0x400   : > { %v3558_v22 = vadd.f32 %v3557_v33, %v3556_v39  ;;  %v2785_v45 = vadd.f32 %v2784_v13, %v2783_v1 }
 0x402   : > { %v3560_v54 = vadd.f32 %v3559_v63, %v3558_v22  ;;  %v2787_v36 = vadd.f32 %v2786_v19, %v2785_v45 }
 0x404   : > { %v3562_v17 = vadd.f32 %v3561_v25, %v3560_v54  ;;  %v2789_v4 = vadd.f32 %v2788_v53, %v2787_v36 }
 0x406   : > { %v3564_v15 = vadd.f32 %v3563_v41, %v3562_v17  ;;  %v2791_v58 = vadd.f32 %v2790_v35, %v2789_v4 }
 0x408   : > { %v3566_v62 = vadd.f32 %v3565_v2, %v3564_v15  ;;  %v2793_v60 = vadd.f32 %v2792_v43, %v2791_v58 }
 0x40a   : > { %v3568_v29 = vadd.f32 %v3567_v61, %v3566_v62  ;;  %v2795_v6 = vadd.f32 %v2794_v44, %v2793_v60 }
 0x40c   : > { %v3570_v26 = vadd.f32 %v3569_v51, %v3568_v29  ;;  %v2797_v48 = vadd.f32 %v2796_v16, %v2795_v6 }
 0x40e   : > { %v3572_v14 = vadd.f32 %v3571_v20, %v3570_v26  ;;  %v2799_v11 = vadd.f32 %v2798_v32, %v2797_v48 }
 0x410   : > { %v3574_v27 = vadd.f32 %v3573_v59, %v3572_v14  ;;  %v2801_v23 = vadd.f32 %v2800_v3, %v2799_v11 }
 0x412   : > { %v3576_v5 = vadd.f32 %v3575_v47, %v3574_v27  ;;  %v2803_v50 = vadd.f32 %v2802_v28, %v2801_v23 }
 0x414   : > { %v3578_v37 = vadd.f32 %v3577_v7, %v3576_v5  ;;  %v2805_v24 = vadd.f32 %v2804_v12, %v2803_v50 }
 0x416   : > { %v2806_v57 = vrot.slane %v2805_v24, 4  ;;  %v3580_v46 = vadd.f32 %v3579_v9, %v3578_v37 }
 0x418   : > { %v2807_v49 = vadd.f32 %v2806_v57, %v2805_v24  ;;  %v3581_v21 = vrot.slane %v3580_v46, 4 }
 0x41a   : > { %v2808_v31 = vrot.slane %v2807_v49, 2  ;;  %v3582_v34 = vadd.f32 %v3581_v21, %v3580_v46 }
 0x41c   : > { %v2809_v30 = vadd.f32 %v2808_v31, %v2807_v49  ;;  %v3583_v39 = vrot.slane %v3582_v34, 2 }
 0x41e   : > { %v2810_v1 = vrot.slane %v2809_v30, 1  ;;  %v3584_v33 = vadd.f32 %v3583_v39, %v3582_v34 }
 0x420   : > { %v2811_v13 = vadd.f32 %v2810_v1, %v2809_v30  ;;  %v3585_v38 = vrot.slane %v3584_v33, 1 }
 0x422   : > { %2813 = vst.msk [vmem:[%s201_s7] sm:$0x1] %vm2812_vm3, %v2811_v13  ;;  %v3586_v22 = vadd.f32 %v3585_v38, %v3584_v33 }
 0x423   : > { %4085 = shalt.err (!%p4082_p3)
}
 0x424   : > { %4014 = dma.vmem_to_hbm [thread:$0]  (%p4217_p5), %s3613_s8, 16, %s3615_s9, %s3594_s19   ;;  %3587 = vst.msk [vmem:[%s207_s10] sm:$0x1] %vm2812_vm3, %v3586_v22 }
 0x425   : > { %s3598_s30 = scalar_lea.sflag [#allocation5], %s7228_s23  ;;  %s4100_s5 = sshra.s32 %s3628_s12, 4  ;;  %s4101_s5 = int_to_ptr.hbm [resolvable:$true] %s4100_s5 }
 0x426   : > { %s4102_s6 = scalar_lea.hbm %s4101_s5, 1  ;;  %s4106_s14 = scalar_lea.hbm %s7303_s4, 16 }
 0x427   : > { %p4103_p4 = scmp.ne.s32.totalorder %s4101_s5, %s4102_s6  ;;  %p4107_p9 = scmp.lt.s32.totalorder %s4101_s5, %s7303_s4 }
 0x428   : > { %p4108_p10 = scmp.lt.s32.totalorder %s4106_s14, %s4102_s6 }
 0x429   : > { %p4104_p7 = pnand %p4103_p4, %p4217_p5 }
 0x42a   : > { %p4109_p11 = por %p4108_p10, %p4107_p9 }
 0x42b   : > { %p4105_p8 = pneg %p4104_p7 }
 0x42d   : > { %p4110_p12 = pnand %p4109_p11, %p4105_p8 }
 0x42f   : > { %4113 = shalt.err (!%p4110_p12)
}
 0x430   : > { %4015 = dma.vmem_to_hbm [thread:$0]  (%p4217_p5), %s3626_s11, 16, %s3628_s12, %s3598_s30  }
 0x431 PF: > { %p4025_p13 = scmp.ge.s32.totalorder %s4152_s18, 2  ;;  %s3647_s23 = sand.u32 1, %s4140_s15  }
 0x432   : > { %s3648_s8 = scalar_lea.sflag [#allocation3], %s3647_s23 }
 0x433   : > { %p4019_p0 = pnand %p4025_p13, %p4221_p6 }
 0x435   : > { %p4020_p1 = pneg %p4019_p0 }
 0x437   : > { %4131 = dma.done.wait (%p4020_p1), %s3648_s8, 16  }
 0x438   : > { %4133 = vsyncadd (%p4020_p1), %s3648_s8, 4294967280  ;;  %s3657_s9 = scalar_lea.sflag [#allocation5], %s3647_s23 }
 0x439   : > { %4135 = dma.done.wait (%p4020_p1), %s3657_s9, 16  }
 0x43a   : > { %4137 = vsyncadd (%p4020_p1), %s3657_s9, 4294967280  ;;  %p18_p5 = scmp.ge.s32.totalorder %s4204_s21, 18   ;;  %s7562_s15 = smov %s4144_s16 }
 0x43b   : > { %s7563_s16 = smov %s4148_s17  ;;  %s7564_s17 = smov %s4215_s24 }
 0x43c   : > { %s7565_s18 = smov %s4204_s21  ;;  %20 = sbr.rel (!%p18_p5) target bundleno = 5 (0x5), region = 92 }
 0x441   :  { %3662 = vsyncpa [#allocation3], 1 }
 0x442   :  { %3664 = vsyncpa [#allocation3 + $0x1], 1 }
 0x443   :  { %3665 = vsyncpa [#allocation5], 1 }
 0x444   :  { %3667 = vsyncpa [#allocation5 + $0x1], 1 }

</bundles_post_ra>
